<compile_context>
chip_gen: v7x
topology: tpu7x:2x2x1
jax: 0.10.0
libtpu: 0.0.40
codegen_flags: <defaults>
</compile_context>

<pallas_src>
import functools
import math

import jax
import jax.numpy as jnp
from jax.experimental import pallas as pl
from jax.experimental.pallas import tpu as pltpu


# ------------------------------ Fused kernel -------------------------------- #

def _fused_block_kernel(
    ir_ref, oe_ref, kr_ref, mask_ref,
    wq1_ref, wv1_ref, wo1_ref,
    wq2_ref, wv2_ref, wo2_ref,
    ln1w_ref, ln1b_ref, ln2w_ref, ln2b_ref, ln3w_ref, ln3b_ref,
    w1_ref, b1_ref, w2_ref, b2_ref,
    o_ref, buf_ref,
    *, nb, seq, n_heads, qd, kd, eps):
    """Processes `nb` batch elements per grid step; intermediates live in VMEM/vregs."""
    f32 = jnp.float32
    bf16 = jnp.bfloat16

    x_in = ir_ref[...]       # (nb*seq, E)  inputRes rows
    x_out = oe_ref[...]      # (nb*seq, E)  outputEncoding rows
    mask = mask_ref[...]     # (seq, seq)   causal mask (0 / -inf)

    def softmax_last(s):
        m = jnp.max(s, axis=-1, keepdims=True)
        e = jnp.exp(s - m)
        return e * pl.reciprocal(jnp.sum(e, axis=-1, keepdims=True), approx=True)

    def attention(att_idx, b, q_rows, v_rows, wo_ref, add_mask):
        # q_rows: (seq, H*qd) queries (scale already folded into the weights)
        # v_rows: (seq, H*kd) values;  kr_ref[att_idx, b, h]: (kd, seq) torch-reflowed keys.
        acc = None
        for h in range(n_heads):                       # static unroll, H is tiny
            qh = q_rows[:, h * qd:(h + 1) * qd]
            vh = v_rows[:, h * kd:(h + 1) * kd]
            s = jnp.dot(qh, kr_ref[att_idx, b, h], preferred_element_type=f32)   # (seq, seq)
            if add_mask:
                s = s + mask                           # mask before scaling (scale is in wq)
            p = softmax_last(s)
            head = jnp.dot(p, vh, preferred_element_type=f32)                    # (seq, vd)
            contrib = jnp.dot(head, wo_ref[h], preferred_element_type=f32)       # (seq, E)
            acc = contrib if acc is None else acc + contrib   # == concat(heads) @ Wo
        return acc

    def layer_norm(z, w, b):
        # LayerNorm over the last TWO dims (seq, E), biased variance (torch semantics)
        mu = jnp.mean(z)
        zc = z - mu
        var = jnp.mean(zc * zc)
        return zc * jax.lax.rsqrt(var + eps) * w + b

    # ---- MHA1 (masked self-attention on outputEncoding): batched Q/V projections ----
    q1 = jnp.dot(x_out, wq1_ref[...], preferred_element_type=f32)    # (nb*seq, H*qd)
    v1 = jnp.dot(x_out, wv1_ref[...], preferred_element_type=f32)    # (nb*seq, H*kd)
    ln1w, ln1b = ln1w_ref[...], ln1b_ref[...]
    for b in range(nb):
        r = slice(b * seq, (b + 1) * seq)
        att1 = attention(0, b, q1[r, :], v1[r, :], wo1_ref, True)
        buf_ref[r, :] = layer_norm(att1 + x_out[r, :], ln1w, ln1b)   # residual + LN1

    att1_n = buf_ref[...]                                            # (nb*seq, E)

    # ---- MHA2 (cross-attention: keys/values from inputRes, queries from att1_n, no mask) ----
    q2 = jnp.dot(att1_n, wq2_ref[...], preferred_element_type=f32)
    v2 = jnp.dot(x_in, wv2_ref[...], preferred_element_type=f32)
    ln2w, ln2b = ln2w_ref[...], ln2b_ref[...]
    for b in range(nb):
        r = slice(b * seq, (b + 1) * seq)
        att2 = attention(1, b, q2[r, :], v2[r, :], wo2_ref, False)
        # Residual 2 adds outputEncoding (as in the reference forward()), then LN2.
        buf_ref[r, :] = layer_norm(att2 + x_out[r, :], ln2w, ln2b)

    att2_n = buf_ref[...]                                            # (nb*seq, E)

    # ---- FFN (Linear -> ReLU -> Linear): bf16 weights/activations, f32 accumulation ----
    h1 = jnp.dot(att2_n.astype(bf16), w1_ref[...], preferred_element_type=f32) + b1_ref[...]
    h1 = jnp.maximum(h1, 0.0)
    fc = jnp.dot(h1.astype(bf16), w2_ref[...], preferred_element_type=f32) + b2_ref[...]

    # ---- residual + LN3, write output ----
    ln3w, ln3b = ln3w_ref[...], ln3b_ref[...]
    for b in range(nb):
        r = slice(b * seq, (b + 1) * seq)
        o_ref[r, :] = layer_norm(fc[r, :] + att2_n[r, :], ln3w, ln3b)


# ------------------------------ Model wrapper -------------------------------- #

def _use_batch_grid(batch):
    """Shard batch across TensorCores only on multi-TC chips (v7x); collapse otherwise."""
    if batch < 2:
        return False
    try:
        kind = jax.devices()[0].device_kind.lower()
    except Exception:
        return False
    return "v7" in kind


def output_transformer_block(params, inputRes, outputEncoding, *,
                             n_heads, key_size, query_size, value_size):
    B, S, E = outputEncoding.shape
    kd, qd, vd = key_size, query_size, value_size
    inner = params["ffn_w1"].shape[1]

    # --- minimal XLA glue on kernel inputs only: fused key projection + torch-style reflow ---
    # keys = emb @ Wk_h, then row-major (B,S,kd)->(B,kd,S) reflow per (attention, batch, head),
    # exactly what torch's keys.reshape(B, K, S) does.  Both attentions fused into one einsum.
    emb_stack = jnp.stack([outputEncoding, inputRes], axis=0)          # (2, B, S, E)
    k = jnp.einsum("abse,ahek->abhsk", emb_stack, params["wk_stack"])  # (2, B, H, S, kd)
    kr = k.reshape(2, B, n_heads, kd, S)                               # row-major reflow

    ir_flat = inputRes.reshape(B * S, E)
    oe_flat = outputEncoding.reshape(B * S, E)

    batch_grid = _use_batch_grid(B)
    nb = 1 if batch_grid else B
    grid = (B,) if batch_grid else (1,)

    if batch_grid:
        row_spec = pl.BlockSpec((S, E), lambda i: (i, 0))
        kr_spec = pl.BlockSpec((2, 1, n_heads, kd, S), lambda i: (0, i, 0, 0, 0))
        dims = ("parallel",)
    else:
        row_spec = pl.BlockSpec((B * S, E), lambda i: (0, 0))
        kr_spec = pl.BlockSpec((2, B, n_heads, kd, S), lambda i: (0, 0, 0, 0, 0))
        dims = ("arbitrary",)

    def const(shape):
        n = len(shape)
        return pl.BlockSpec(shape, lambda i, _n=n: (0,) * _n)

    kernel = functools.partial(_fused_block_kernel, nb=nb, seq=S, n_heads=n_heads,
                               qd=qd, kd=kd, eps=1e-5)

    operands = (ir_flat, oe_flat, kr, params["mask"],
                params["wq1_flat"], params["wv1_flat"], params["wo1"],
                params["wq2_flat"], params["wv2_flat"], params["wo2"],
                params["ln1_w"], params["ln1_b"], params["ln2_w"], params["ln2_b"],
                params["ln3_w"], params["ln3_b"],
                params["ffn_w1"], params["ffn_b1"], params["ffn_w2"], params["ffn_b2"])

    # Advisory cost estimate for XLA scheduling around the fused call.
    per_head = 2 * S * qd * S + 2 * S * S * vd + 2 * S * vd * E
    proj = 2 * S * E * (n_heads * qd) + 2 * S * E * (n_heads * kd)
    mha = proj + n_heads * per_head
    ffn = 2 * (2 * S * E * inner)
    flops = B * (2 * mha + ffn + 3 * 6 * S * E)
    transcendentals = B * (2 * n_heads * (S * S + S) + 3)
    bytes_accessed = sum(int(a.size) * a.dtype.itemsize for a in operands) + 4 * B * S * E
    cost = pl.CostEstimate(flops=int(flops), transcendentals=int(transcendentals),
                           bytes_accessed=int(bytes_accessed))

    in_specs = [
        row_spec,                            # inputRes rows
        row_spec,                            # outputEncoding rows
        kr_spec,                             # reflowed keys (both attentions)
        const((S, S)),                       # mask
        const((E, n_heads * qd)),            # wq1 (scale folded in)
        const((E, n_heads * kd)),            # wv1
        const((n_heads, vd, E)),             # wo1
        const((E, n_heads * qd)),            # wq2 (scale folded in)
        const((E, n_heads * kd)),            # wv2
        const((n_heads, vd, E)),             # wo2
        const((S, E)), const((S, E)),        # ln1 w, b
        const((S, E)), const((S, E)),        # ln2 w, b
        const((S, E)), const((S, E)),        # ln3 w, b
        const((E, inner)),                   # ffn w1 (bf16)
        const((1, inner)),                   # ffn b1
        const((inner, E)),                   # ffn w2 (bf16)
        const((1, E)),                       # ffn b2
    ]

    out2d = pl.pallas_call(
        kernel,
        out_shape=jax.ShapeDtypeStruct((B * S, E), jnp.float32),
        grid=grid,
        in_specs=in_specs,
        out_specs=row_spec,
        scratch_shapes=[pltpu.VMEM((nb * S, E), jnp.float32)],
        compiler_params=pltpu.CompilerParams(dimension_semantics=dims),
        cost_estimate=cost,
    )(*operands)
    return out2d.reshape(B, S, E)


# ----------------------------- Parameter init -------------------------------- #

def init_params(key, S, E, H, kd, qd, vd, inner):
    """Raw parameters mirroring the PyTorch module's initialization."""
    keys = iter(jax.random.split(key, 64))

    def u01(shape):
        return jax.random.uniform(next(keys), shape, jnp.float32, 0.0, 1.0)

    def mha_weights():
        wk = jnp.stack([u01((E, kd)) for _ in range(H)], axis=0)   # (H, E, kd)
        wv = jnp.stack([u01((E, kd)) for _ in range(H)], axis=0)   # valueWeights use keySize
        wq = jnp.stack([u01((E, qd)) for _ in range(H)], axis=0)   # (H, E, qd)
        wo = u01((H * vd, E)).reshape(H, vd, E)                    # weightMatrix split per head
        return wk, wv, wq, wo

    wk1, wv1, wq1, wo1 = mha_weights()
    wk2, wv2, wq2, wo2 = mha_weights()

    bound1 = 1.0 / math.sqrt(E)
    bound2 = 1.0 / math.sqrt(inner)
    return {
        "wk1": wk1, "wv1": wv1, "wq1": wq1, "wo1": wo1,
        "wk2": wk2, "wv2": wv2, "wq2": wq2, "wo2": wo2,
        "ln1_w": jnp.ones((S, E), jnp.float32), "ln1_b": jnp.zeros((S, E), jnp.float32),
        "ln2_w": jnp.ones((S, E), jnp.float32), "ln2_b": jnp.zeros((S, E), jnp.float32),
        "ln3_w": jnp.ones((S, E), jnp.float32), "ln3_b": jnp.zeros((S, E), jnp.float32),
        "ffn_w1": jax.random.uniform(next(keys), (E, inner), jnp.float32, -bound1, bound1),
        "ffn_b1": jax.random.uniform(next(keys), (1, inner), jnp.float32, -bound1, bound1),
        "ffn_w2": jax.random.uniform(next(keys), (inner, E), jnp.float32, -bound2, bound2),
        "ffn_b2": jax.random.uniform(next(keys), (1, E), jnp.float32, -bound2, bound2),
        # causal mask: 0 on/below diagonal, -inf above (as in the reference)
        "mask": jnp.where(jnp.arange(S)[None, :] <= jnp.arange(S)[:, None],
                          0.0, -jnp.inf).astype(jnp.float32),
    }


def prepare_params(raw, *, n_heads, key_size, query_size):
    """One-time preprocessing: stack/flatten weights, fold softmax scale, cast FFN to bf16."""
    kd, qd = key_size, query_size
    E = raw["wq1"].shape[1]
    inv_scale = 1.0 / int(math.sqrt(kd))      # int(np.sqrt(keySize)) truncation, per reference
    # (here 1/4, a power of two, so folding it into the query weights is numerically exact)

    def flat_heads(w):                        # (H, E, d) -> (E, H*d), head-major columns
        return jnp.transpose(w, (1, 0, 2)).reshape(E, -1)

    return {
        "wk_stack": jnp.stack([raw["wk1"], raw["wk2"]], axis=0),      # (2, H, E, kd)
        "wq1_flat": flat_heads(raw["wq1"]) * inv_scale,
        "wq2_flat": flat_heads(raw["wq2"]) * inv_scale,
        "wv1_flat": flat_heads(raw["wv1"]),
        "wv2_flat": flat_heads(raw["wv2"]),
        "wo1": raw["wo1"], "wo2": raw["wo2"],
        "ln1_w": raw["ln1_w"], "ln1_b": raw["ln1_b"],
        "ln2_w": raw["ln2_w"], "ln2_b": raw["ln2_b"],
        "ln3_w": raw["ln3_w"], "ln3_b": raw["ln3_b"],
        "ffn_w1": raw["ffn_w1"].astype(jnp.bfloat16),
        "ffn_b1": raw["ffn_b1"],
        "ffn_w2": raw["ffn_w2"].astype(jnp.bfloat16),
        "ffn_b2": raw["ffn_b2"],
        "mask": raw["mask"],
    }


# ---------------------------------- Main -------------------------------------- #

if __name__ == "__main__":
    B = 2                # batch
    S = 8                # maxSentenceSize
    E = 32               # inputEmbeddingSize == outputEmbeddingSize
    H = 2                # attention heads
    KD = QD = VD = 16    # keySize == querySize == valueSize (required by the reference's shapes)
    INNER = 2048         # FeedForward inner dim (hard-coded in the module)

    root = jax.random.PRNGKey(0)
    k_in, k_out, k_par = jax.random.split(root, 3)
    inputRes = jax.random.normal(k_in, (B, S, E), jnp.float32) * 0.1
    outputEncoding = jax.random.normal(k_out, (B, S, E), jnp.float32) * 0.1

    raw = init_params(k_par, S, E, H, KD, QD, VD, INNER)
    params = prepare_params(raw, n_heads=H, key_size=KD, query_size=QD)

    fwd = jax.jit(functools.partial(output_transformer_block,
                                    n_heads=H, key_size=KD, query_size=QD, value_size=VD))
    out = jax.block_until_ready(fwd(params, inputRes, outputEncoding))

    assert out.shape == (B, S, E), out.shape
    assert bool(jnp.all(jnp.isfinite(out)))
    print("KERNEL_OK")
</pallas_src>

<mosaic_0001>
module attributes {stable_mosaic.version = 11 : i64} {
  func.func @_fused_block_kernel(%arg0: i32, %arg1: memref<16x32xf32, #tpu.memory_space<vmem>>, %arg2: memref<16x32xf32, #tpu.memory_space<vmem>>, %arg3: memref<2x2x2x16x8xf32, #tpu.memory_space<vmem>>, %arg4: memref<8x8xf32, #tpu.memory_space<vmem>>, %arg5: memref<32x32xf32, #tpu.memory_space<vmem>>, %arg6: memref<32x32xf32, #tpu.memory_space<vmem>>, %arg7: memref<2x16x32xf32, #tpu.memory_space<vmem>>, %arg8: memref<32x32xf32, #tpu.memory_space<vmem>>, %arg9: memref<32x32xf32, #tpu.memory_space<vmem>>, %arg10: memref<2x16x32xf32, #tpu.memory_space<vmem>>, %arg11: memref<8x32xf32, #tpu.memory_space<vmem>>, %arg12: memref<8x32xf32, #tpu.memory_space<vmem>>, %arg13: memref<8x32xf32, #tpu.memory_space<vmem>>, %arg14: memref<8x32xf32, #tpu.memory_space<vmem>>, %arg15: memref<8x32xf32, #tpu.memory_space<vmem>>, %arg16: memref<8x32xf32, #tpu.memory_space<vmem>>, %arg17: memref<32x2048xbf16, #tpu.memory_space<vmem>>, %arg18: memref<1x2048xf32, #tpu.memory_space<vmem>>, %arg19: memref<2048x32xbf16, #tpu.memory_space<vmem>>, %arg20: memref<1x32xf32, #tpu.memory_space<vmem>>, %arg21: memref<16x32xf32, #tpu.memory_space<vmem>>, %arg22: memref<16x32xf32, #tpu.memory_space<vmem>>) attributes {dimension_semantics = [#tpu.dimension_semantics<arbitrary>], iteration_bounds = array<i64: 1>, scalar_prefetch = 0 : i64, scratch_operands = 1 : i64, tpu.core_type = #tpu.core_type<tc>, window_params = [{pipeline_mode = #tpu.pipeline_mode<synchronous>, transform_indices = @transform_0, window_bounds = array<i64: 16, 32>}, {pipeline_mode = #tpu.pipeline_mode<synchronous>, transform_indices = @transform_1, window_bounds = array<i64: 16, 32>}, {pipeline_mode = #tpu.pipeline_mode<synchronous>, transform_indices = @transform_2, window_bounds = array<i64: 2, 2, 2, 16, 8>}, {pipeline_mode = #tpu.pipeline_mode<synchronous>, transform_indices = @transform_3, window_bounds = array<i64: 8, 8>}, {pipeline_mode = #tpu.pipeline_mode<synchronous>, transform_indices = @transform_4, window_bounds = array<i64: 32, 32>}, {pipeline_mode = #tpu.pipeline_mode<synchronous>, transform_indices = @transform_5, window_bounds = array<i64: 32, 32>}, {pipeline_mode = #tpu.pipeline_mode<synchronous>, transform_indices = @transform_6, window_bounds = array<i64: 2, 16, 32>}, {pipeline_mode = #tpu.pipeline_mode<synchronous>, transform_indices = @transform_7, window_bounds = array<i64: 32, 32>}, {pipeline_mode = #tpu.pipeline_mode<synchronous>, transform_indices = @transform_8, window_bounds = array<i64: 32, 32>}, {pipeline_mode = #tpu.pipeline_mode<synchronous>, transform_indices = @transform_9, window_bounds = array<i64: 2, 16, 32>}, {pipeline_mode = #tpu.pipeline_mode<synchronous>, transform_indices = @transform_10, window_bounds = array<i64: 8, 32>}, {pipeline_mode = #tpu.pipeline_mode<synchronous>, transform_indices = @transform_11, window_bounds = array<i64: 8, 32>}, {pipeline_mode = #tpu.pipeline_mode<synchronous>, transform_indices = @transform_12, window_bounds = array<i64: 8, 32>}, {pipeline_mode = #tpu.pipeline_mode<synchronous>, transform_indices = @transform_13, window_bounds = array<i64: 8, 32>}, {pipeline_mode = #tpu.pipeline_mode<synchronous>, transform_indices = @transform_14, window_bounds = array<i64: 8, 32>}, {pipeline_mode = #tpu.pipeline_mode<synchronous>, transform_indices = @transform_15, window_bounds = array<i64: 8, 32>}, {pipeline_mode = #tpu.pipeline_mode<synchronous>, transform_indices = @transform_16, window_bounds = array<i64: 32, 2048>}, {pipeline_mode = #tpu.pipeline_mode<synchronous>, transform_indices = @transform_17, window_bounds = array<i64: 1, 2048>}, {pipeline_mode = #tpu.pipeline_mode<synchronous>, transform_indices = @transform_18, window_bounds = array<i64: 2048, 32>}, {pipeline_mode = #tpu.pipeline_mode<synchronous>, transform_indices = @transform_19, window_bounds = array<i64: 1, 32>}, {pipeline_mode = #tpu.pipeline_mode<synchronous>, transform_indices = @transform_20, window_bounds = array<i64: 16, 32>}]} {
    %c0 = arith.constant 0 : index
    %c0_0 = arith.constant 0 : index
    %0 = vector.load %arg1[%c0, %c0_0] : memref<16x32xf32, #tpu.memory_space<vmem>>, vector<16x32xf32>
    %c0_1 = arith.constant 0 : index
    %c0_2 = arith.constant 0 : index
    %1 = vector.load %arg2[%c0_1, %c0_2] : memref<16x32xf32, #tpu.memory_space<vmem>>, vector<16x32xf32>
    %c0_3 = arith.constant 0 : index
    %c0_4 = arith.constant 0 : index
    %2 = vector.load %arg4[%c0_3, %c0_4] : memref<8x8xf32, #tpu.memory_space<vmem>>, vector<8x8xf32>
    %c0_5 = arith.constant 0 : index
    %c0_6 = arith.constant 0 : index
    %3 = vector.load %arg5[%c0_5, %c0_6] : memref<32x32xf32, #tpu.memory_space<vmem>>, vector<32x32xf32>
    %cst = arith.constant dense<0.000000e+00> : vector<16x32xf32>
    %4 = tpu.matmul %1, %3, %cst {dimension_numbers = #tpu.dot_dimension_numbers<[1], [0], [0], [1], [0, 0, 1, 1], [], []>} : vector<16x32xf32>, vector<32x32xf32>, vector<16x32xf32> -> vector<16x32xf32>
    %c0_7 = arith.constant 0 : index
    %c0_8 = arith.constant 0 : index
    %5 = vector.load %arg6[%c0_7, %c0_8] : memref<32x32xf32, #tpu.memory_space<vmem>>, vector<32x32xf32>
    %cst_9 = arith.constant dense<0.000000e+00> : vector<16x32xf32>
    %6 = tpu.matmul %1, %5, %cst_9 {dimension_numbers = #tpu.dot_dimension_numbers<[1], [0], [0], [1], [0, 0, 1, 1], [], []>} : vector<16x32xf32>, vector<32x32xf32>, vector<16x32xf32> -> vector<16x32xf32>
    %c0_10 = arith.constant 0 : index
    %c0_11 = arith.constant 0 : index
    %7 = vector.load %arg11[%c0_10, %c0_11] : memref<8x32xf32, #tpu.memory_space<vmem>>, vector<8x32xf32>
    %c0_12 = arith.constant 0 : index
    %c0_13 = arith.constant 0 : index
    %8 = vector.load %arg12[%c0_12, %c0_13] : memref<8x32xf32, #tpu.memory_space<vmem>>, vector<8x32xf32>
    %9 = vector.extract_strided_slice %4 {offsets = [0, 0], sizes = [8, 32], strides = [1, 1]} : vector<16x32xf32> to vector<8x32xf32>
    %10 = vector.extract_strided_slice %6 {offsets = [0, 0], sizes = [8, 32], strides = [1, 1]} : vector<16x32xf32> to vector<8x32xf32>
    %11 = vector.extract_strided_slice %9 {offsets = [0, 0], sizes = [8, 16], strides = [1, 1]} : vector<8x32xf32> to vector<8x16xf32>
    %12 = vector.extract_strided_slice %10 {offsets = [0, 0], sizes = [8, 16], strides = [1, 1]} : vector<8x32xf32> to vector<8x16xf32>
    %c0_14 = arith.constant 0 : index
    %c0_15 = arith.constant 0 : index
    %c0_16 = arith.constant 0 : index
    %c0_17 = arith.constant 0 : index
    %c0_18 = arith.constant 0 : index
    %13 = vector.load %arg3[%c0_14, %c0_15, %c0_16, %c0_17, %c0_18] : memref<2x2x2x16x8xf32, #tpu.memory_space<vmem>>, vector<1x1x1x16x8xf32>
    %14 = vector.shape_cast %13 : vector<1x1x1x16x8xf32> to vector<16x8xf32>
    %cst_19 = arith.constant dense<0.000000e+00> : vector<8x8xf32>
    %15 = tpu.matmul %11, %14, %cst_19 {dimension_numbers = #tpu.dot_dimension_numbers<[1], [0], [0], [1], [0, 0, 1, 1], [], []>} : vector<8x16xf32>, vector<16x8xf32>, vector<8x8xf32> -> vector<8x8xf32>
    %16 = arith.addf %15, %2 : vector<8x8xf32>
    %cst_20 = arith.constant dense<0xFF800000> : vector<8xf32>
    %17 = vector.multi_reduction <maximumf>, %16, %cst_20 [1] : vector<8x8xf32> to vector<8xf32>
    %18 = vector.shape_cast %17 : vector<8xf32> to vector<8x1xf32>
    %19 = vector.broadcast %18 : vector<8x1xf32> to vector<8x8xf32>
    %20 = arith.subf %16, %19 : vector<8x8xf32>
    %21 = math.exp %20 : vector<8x8xf32>
    %cst_21 = arith.constant dense<0.000000e+00> : vector<8xf32>
    %22 = vector.multi_reduction <add>, %21, %cst_21 [1] : vector<8x8xf32> to vector<8xf32>
    %23 = vector.shape_cast %22 : vector<8xf32> to vector<8x1xf32>
    %24 = tpu.reciprocal %23 {approx = true} : vector<8x1xf32> -> vector<8x1xf32>
    %25 = vector.broadcast %24 : vector<8x1xf32> to vector<8x8xf32>
    %26 = arith.mulf %21, %25 : vector<8x8xf32>
    %cst_22 = arith.constant dense<0.000000e+00> : vector<8x16xf32>
    %27 = tpu.matmul %26, %12, %cst_22 {dimension_numbers = #tpu.dot_dimension_numbers<[1], [0], [0], [1], [0, 0, 1, 1], [], []>} : vector<8x8xf32>, vector<8x16xf32>, vector<8x16xf32> -> vector<8x16xf32>
    %c0_23 = arith.constant 0 : index
    %c0_24 = arith.constant 0 : index
    %c0_25 = arith.constant 0 : index
    %28 = vector.load %arg7[%c0_23, %c0_24, %c0_25] : memref<2x16x32xf32, #tpu.memory_space<vmem>>, vector<1x16x32xf32>
    %29 = vector.shape_cast %28 : vector<1x16x32xf32> to vector<16x32xf32>
    %cst_26 = arith.constant dense<0.000000e+00> : vector<8x32xf32>
    %30 = tpu.matmul %27, %29, %cst_26 {dimension_numbers = #tpu.dot_dimension_numbers<[1], [0], [0], [1], [0, 0, 1, 1], [], []>} : vector<8x16xf32>, vector<16x32xf32>, vector<8x32xf32> -> vector<8x32xf32>
    %31 = vector.extract_strided_slice %9 {offsets = [0, 16], sizes = [8, 16], strides = [1, 1]} : vector<8x32xf32> to vector<8x16xf32>
    %32 = vector.extract_strided_slice %10 {offsets = [0, 16], sizes = [8, 16], strides = [1, 1]} : vector<8x32xf32> to vector<8x16xf32>
    %c0_27 = arith.constant 0 : index
    %c0_28 = arith.constant 0 : index
    %c1 = arith.constant 1 : index
    %c0_29 = arith.constant 0 : index
    %c0_30 = arith.constant 0 : index
    %33 = vector.load %arg3[%c0_27, %c0_28, %c1, %c0_29, %c0_30] : memref<2x2x2x16x8xf32, #tpu.memory_space<vmem>>, vector<1x1x1x16x8xf32>
    %34 = vector.shape_cast %33 : vector<1x1x1x16x8xf32> to vector<16x8xf32>
    %cst_31 = arith.constant dense<0.000000e+00> : vector<8x8xf32>
    %35 = tpu.matmul %31, %34, %cst_31 {dimension_numbers = #tpu.dot_dimension_numbers<[1], [0], [0], [1], [0, 0, 1, 1], [], []>} : vector<8x16xf32>, vector<16x8xf32>, vector<8x8xf32> -> vector<8x8xf32>
    %36 = arith.addf %35, %2 : vector<8x8xf32>
    %cst_32 = arith.constant dense<0xFF800000> : vector<8xf32>
    %37 = vector.multi_reduction <maximumf>, %36, %cst_32 [1] : vector<8x8xf32> to vector<8xf32>
    %38 = vector.shape_cast %37 : vector<8xf32> to vector<8x1xf32>
    %39 = vector.broadcast %38 : vector<8x1xf32> to vector<8x8xf32>
    %40 = arith.subf %36, %39 : vector<8x8xf32>
    %41 = math.exp %40 : vector<8x8xf32>
    %cst_33 = arith.constant dense<0.000000e+00> : vector<8xf32>
    %42 = vector.multi_reduction <add>, %41, %cst_33 [1] : vector<8x8xf32> to vector<8xf32>
    %43 = vector.shape_cast %42 : vector<8xf32> to vector<8x1xf32>
    %44 = tpu.reciprocal %43 {approx = true} : vector<8x1xf32> -> vector<8x1xf32>
    %45 = vector.broadcast %44 : vector<8x1xf32> to vector<8x8xf32>
    %46 = arith.mulf %41, %45 : vector<8x8xf32>
    %cst_34 = arith.constant dense<0.000000e+00> : vector<8x16xf32>
    %47 = tpu.matmul %46, %32, %cst_34 {dimension_numbers = #tpu.dot_dimension_numbers<[1], [0], [0], [1], [0, 0, 1, 1], [], []>} : vector<8x8xf32>, vector<8x16xf32>, vector<8x16xf32> -> vector<8x16xf32>
    %c1_35 = arith.constant 1 : index
    %c0_36 = arith.constant 0 : index
    %c0_37 = arith.constant 0 : index
    %48 = vector.load %arg7[%c1_35, %c0_36, %c0_37] : memref<2x16x32xf32, #tpu.memory_space<vmem>>, vector<1x16x32xf32>
    %49 = vector.shape_cast %48 : vector<1x16x32xf32> to vector<16x32xf32>
    %cst_38 = arith.constant dense<0.000000e+00> : vector<8x32xf32>
    %50 = tpu.matmul %47, %49, %cst_38 {dimension_numbers = #tpu.dot_dimension_numbers<[1], [0], [0], [1], [0, 0, 1, 1], [], []>} : vector<8x16xf32>, vector<16x32xf32>, vector<8x32xf32> -> vector<8x32xf32>
    %51 = arith.addf %30, %50 : vector<8x32xf32>
    %52 = vector.extract_strided_slice %1 {offsets = [0, 0], sizes = [8, 32], strides = [1, 1]} : vector<16x32xf32> to vector<8x32xf32>
    %53 = arith.addf %51, %52 : vector<8x32xf32>
    %54 = vector.shape_cast %53 : vector<8x32xf32> to vector<1x8x32xf32>
    %cst_39 = arith.constant dense<0.000000e+00> : vector<1xf32>
    %55 = vector.multi_reduction <add>, %54, %cst_39 [1, 2] : vector<1x8x32xf32> to vector<1xf32>
    %56 = vector.shape_cast %55 : vector<1xf32> to vector<1x1x1xf32>
    %57 = vector.extract %56[0, 0, 0] : f32 from vector<1x1x1xf32>
    %cst_40 = arith.constant 2.560000e+02 : f32
    %58 = arith.divf %57, %cst_40 : f32
    %59 = vector.broadcast %58 : f32 to vector<8x32xf32>
    %60 = arith.subf %53, %59 : vector<8x32xf32>
    %61 = arith.mulf %60, %60 : vector<8x32xf32>
    %62 = vector.shape_cast %61 : vector<8x32xf32> to vector<1x8x32xf32>
    %cst_41 = arith.constant dense<0.000000e+00> : vector<1xf32>
    %63 = vector.multi_reduction <add>, %62, %cst_41 [1, 2] : vector<1x8x32xf32> to vector<1xf32>
    %64 = vector.shape_cast %63 : vector<1xf32> to vector<1x1x1xf32>
    %65 = vector.extract %64[0, 0, 0] : f32 from vector<1x1x1xf32>
    %cst_42 = arith.constant 2.560000e+02 : f32
    %66 = arith.divf %65, %cst_42 : f32
    %cst_43 = arith.constant 9.99999974E-6 : f32
    %67 = arith.addf %66, %cst_43 : f32
    %68 = math.rsqrt %67 : f32
    %69 = vector.broadcast %68 : f32 to vector<8x32xf32>
    %70 = arith.mulf %60, %69 : vector<8x32xf32>
    %71 = arith.mulf %70, %7 : vector<8x32xf32>
    %72 = arith.addf %71, %8 : vector<8x32xf32>
    %c0_44 = arith.constant 0 : index
    %c0_45 = arith.constant 0 : index
    %73 = vector.load %arg22[%c0_44, %c0_45] : memref<16x32xf32, #tpu.memory_space<vmem>>, vector<8x32xf32>
    tpu.vector_store %arg22[%c0_44, %c0_45], %72 {strides = array<i32>} : memref<16x32xf32, #tpu.memory_space<vmem>>, vector<8x32xf32>,
    %74 = vector.extract_strided_slice %4 {offsets = [8, 0], sizes = [8, 32], strides = [1, 1]} : vector<16x32xf32> to vector<8x32xf32>
    %75 = vector.extract_strided_slice %6 {offsets = [8, 0], sizes = [8, 32], strides = [1, 1]} : vector<16x32xf32> to vector<8x32xf32>
    %76 = vector.extract_strided_slice %74 {offsets = [0, 0], sizes = [8, 16], strides = [1, 1]} : vector<8x32xf32> to vector<8x16xf32>
    %77 = vector.extract_strided_slice %75 {offsets = [0, 0], sizes = [8, 16], strides = [1, 1]} : vector<8x32xf32> to vector<8x16xf32>
    %c0_46 = arith.constant 0 : index
    %c1_47 = arith.constant 1 : index
    %c0_48 = arith.constant 0 : index
    %c0_49 = arith.constant 0 : index
    %c0_50 = arith.constant 0 : index
    %78 = vector.load %arg3[%c0_46, %c1_47, %c0_48, %c0_49, %c0_50] : memref<2x2x2x16x8xf32, #tpu.memory_space<vmem>>, vector<1x1x1x16x8xf32>
    %79 = vector.shape_cast %78 : vector<1x1x1x16x8xf32> to vector<16x8xf32>
    %cst_51 = arith.constant dense<0.000000e+00> : vector<8x8xf32>
    %80 = tpu.matmul %76, %79, %cst_51 {dimension_numbers = #tpu.dot_dimension_numbers<[1], [0], [0], [1], [0, 0, 1, 1], [], []>} : vector<8x16xf32>, vector<16x8xf32>, vector<8x8xf32> -> vector<8x8xf32>
    %81 = arith.addf %80, %2 : vector<8x8xf32>
    %cst_52 = arith.constant dense<0xFF800000> : vector<8xf32>
    %82 = vector.multi_reduction <maximumf>, %81, %cst_52 [1] : vector<8x8xf32> to vector<8xf32>
    %83 = vector.shape_cast %82 : vector<8xf32> to vector<8x1xf32>
    %84 = vector.broadcast %83 : vector<8x1xf32> to vector<8x8xf32>
    %85 = arith.subf %81, %84 : vector<8x8xf32>
    %86 = math.exp %85 : vector<8x8xf32>
    %cst_53 = arith.constant dense<0.000000e+00> : vector<8xf32>
    %87 = vector.multi_reduction <add>, %86, %cst_53 [1] : vector<8x8xf32> to vector<8xf32>
    %88 = vector.shape_cast %87 : vector<8xf32> to vector<8x1xf32>
    %89 = tpu.reciprocal %88 {approx = true} : vector<8x1xf32> -> vector<8x1xf32>
    %90 = vector.broadcast %89 : vector<8x1xf32> to vector<8x8xf32>
    %91 = arith.mulf %86, %90 : vector<8x8xf32>
    %cst_54 = arith.constant dense<0.000000e+00> : vector<8x16xf32>
    %92 = tpu.matmul %91, %77, %cst_54 {dimension_numbers = #tpu.dot_dimension_numbers<[1], [0], [0], [1], [0, 0, 1, 1], [], []>} : vector<8x8xf32>, vector<8x16xf32>, vector<8x16xf32> -> vector<8x16xf32>
    %c0_55 = arith.constant 0 : index
    %c0_56 = arith.constant 0 : index
    %c0_57 = arith.constant 0 : index
    %93 = vector.load %arg7[%c0_55, %c0_56, %c0_57] : memref<2x16x32xf32, #tpu.memory_space<vmem>>, vector<1x16x32xf32>
    %94 = vector.shape_cast %93 : vector<1x16x32xf32> to vector<16x32xf32>
    %cst_58 = arith.constant dense<0.000000e+00> : vector<8x32xf32>
    %95 = tpu.matmul %92, %94, %cst_58 {dimension_numbers = #tpu.dot_dimension_numbers<[1], [0], [0], [1], [0, 0, 1, 1], [], []>} : vector<8x16xf32>, vector<16x32xf32>, vector<8x32xf32> -> vector<8x32xf32>
    %96 = vector.extract_strided_slice %74 {offsets = [0, 16], sizes = [8, 16], strides = [1, 1]} : vector<8x32xf32> to vector<8x16xf32>
    %97 = vector.extract_strided_slice %75 {offsets = [0, 16], sizes = [8, 16], strides = [1, 1]} : vector<8x32xf32> to vector<8x16xf32>
    %c0_59 = arith.constant 0 : index
    %c1_60 = arith.constant 1 : index
    %c1_61 = arith.constant 1 : index
    %c0_62 = arith.constant 0 : index
    %c0_63 = arith.constant 0 : index
    %98 = vector.load %arg3[%c0_59, %c1_60, %c1_61, %c0_62, %c0_63] : memref<2x2x2x16x8xf32, #tpu.memory_space<vmem>>, vector<1x1x1x16x8xf32>
    %99 = vector.shape_cast %98 : vector<1x1x1x16x8xf32> to vector<16x8xf32>
    %cst_64 = arith.constant dense<0.000000e+00> : vector<8x8xf32>
    %100 = tpu.matmul %96, %99, %cst_64 {dimension_numbers = #tpu.dot_dimension_numbers<[1], [0], [0], [1], [0, 0, 1, 1], [], []>} : vector<8x16xf32>, vector<16x8xf32>, vector<8x8xf32> -> vector<8x8xf32>
    %101 = arith.addf %100, %2 : vector<8x8xf32>
    %cst_65 = arith.constant dense<0xFF800000> : vector<8xf32>
    %102 = vector.multi_reduction <maximumf>, %101, %cst_65 [1] : vector<8x8xf32> to vector<8xf32>
    %103 = vector.shape_cast %102 : vector<8xf32> to vector<8x1xf32>
    %104 = vector.broadcast %103 : vector<8x1xf32> to vector<8x8xf32>
    %105 = arith.subf %101, %104 : vector<8x8xf32>
    %106 = math.exp %105 : vector<8x8xf32>
    %cst_66 = arith.constant dense<0.000000e+00> : vector<8xf32>
    %107 = vector.multi_reduction <add>, %106, %cst_66 [1] : vector<8x8xf32> to vector<8xf32>
    %108 = vector.shape_cast %107 : vector<8xf32> to vector<8x1xf32>
    %109 = tpu.reciprocal %108 {approx = true} : vector<8x1xf32> -> vector<8x1xf32>
    %110 = vector.broadcast %109 : vector<8x1xf32> to vector<8x8xf32>
    %111 = arith.mulf %106, %110 : vector<8x8xf32>
    %cst_67 = arith.constant dense<0.000000e+00> : vector<8x16xf32>
    %112 = tpu.matmul %111, %97, %cst_67 {dimension_numbers = #tpu.dot_dimension_numbers<[1], [0], [0], [1], [0, 0, 1, 1], [], []>} : vector<8x8xf32>, vector<8x16xf32>, vector<8x16xf32> -> vector<8x16xf32>
    %c1_68 = arith.constant 1 : index
    %c0_69 = arith.constant 0 : index
    %c0_70 = arith.constant 0 : index
    %113 = vector.load %arg7[%c1_68, %c0_69, %c0_70] : memref<2x16x32xf32, #tpu.memory_space<vmem>>, vector<1x16x32xf32>
    %114 = vector.shape_cast %113 : vector<1x16x32xf32> to vector<16x32xf32>
    %cst_71 = arith.constant dense<0.000000e+00> : vector<8x32xf32>
    %115 = tpu.matmul %112, %114, %cst_71 {dimension_numbers = #tpu.dot_dimension_numbers<[1], [0], [0], [1], [0, 0, 1, 1], [], []>} : vector<8x16xf32>, vector<16x32xf32>, vector<8x32xf32> -> vector<8x32xf32>
    %116 = arith.addf %95, %115 : vector<8x32xf32>
    %117 = vector.extract_strided_slice %1 {offsets = [8, 0], sizes = [8, 32], strides = [1, 1]} : vector<16x32xf32> to vector<8x32xf32>
    %118 = arith.addf %116, %117 : vector<8x32xf32>
    %119 = vector.shape_cast %118 : vector<8x32xf32> to vector<1x8x32xf32>
    %cst_72 = arith.constant dense<0.000000e+00> : vector<1xf32>
    %120 = vector.multi_reduction <add>, %119, %cst_72 [1, 2] : vector<1x8x32xf32> to vector<1xf32>
    %121 = vector.shape_cast %120 : vector<1xf32> to vector<1x1x1xf32>
    %122 = vector.extract %121[0, 0, 0] : f32 from vector<1x1x1xf32>
    %cst_73 = arith.constant 2.560000e+02 : f32
    %123 = arith.divf %122, %cst_73 : f32
    %124 = vector.broadcast %123 : f32 to vector<8x32xf32>
    %125 = arith.subf %118, %124 : vector<8x32xf32>
    %126 = arith.mulf %125, %125 : vector<8x32xf32>
    %127 = vector.shape_cast %126 : vector<8x32xf32> to vector<1x8x32xf32>
    %cst_74 = arith.constant dense<0.000000e+00> : vector<1xf32>
    %128 = vector.multi_reduction <add>, %127, %cst_74 [1, 2] : vector<1x8x32xf32> to vector<1xf32>
    %129 = vector.shape_cast %128 : vector<1xf32> to vector<1x1x1xf32>
    %130 = vector.extract %129[0, 0, 0] : f32 from vector<1x1x1xf32>
    %cst_75 = arith.constant 2.560000e+02 : f32
    %131 = arith.divf %130, %cst_75 : f32
    %cst_76 = arith.constant 9.99999974E-6 : f32
    %132 = arith.addf %131, %cst_76 : f32
    %133 = math.rsqrt %132 : f32
    %134 = vector.broadcast %133 : f32 to vector<8x32xf32>
    %135 = arith.mulf %125, %134 : vector<8x32xf32>
    %136 = arith.mulf %135, %7 : vector<8x32xf32>
    %137 = arith.addf %136, %8 : vector<8x32xf32>
    %c8 = arith.constant 8 : index
    %c0_77 = arith.constant 0 : index
    %138 = vector.load %arg22[%c8, %c0_77] : memref<16x32xf32, #tpu.memory_space<vmem>>, vector<8x32xf32>
    tpu.vector_store %arg22[%c8, %c0_77], %137 {strides = array<i32>} : memref<16x32xf32, #tpu.memory_space<vmem>>, vector<8x32xf32>,
    %c0_78 = arith.constant 0 : index
    %c0_79 = arith.constant 0 : index
    %139 = vector.load %arg22[%c0_78, %c0_79] : memref<16x32xf32, #tpu.memory_space<vmem>>, vector<16x32xf32>
    %c0_80 = arith.constant 0 : index
    %c0_81 = arith.constant 0 : index
    %140 = vector.load %arg8[%c0_80, %c0_81] : memref<32x32xf32, #tpu.memory_space<vmem>>, vector<32x32xf32>
    %cst_82 = arith.constant dense<0.000000e+00> : vector<16x32xf32>
    %141 = tpu.matmul %139, %140, %cst_82 {dimension_numbers = #tpu.dot_dimension_numbers<[1], [0], [0], [1], [0, 0, 1, 1], [], []>} : vector<16x32xf32>, vector<32x32xf32>, vector<16x32xf32> -> vector<16x32xf32>
    %c0_83 = arith.constant 0 : index
    %c0_84 = arith.constant 0 : index
    %142 = vector.load %arg9[%c0_83, %c0_84] : memref<32x32xf32, #tpu.memory_space<vmem>>, vector<32x32xf32>
    %cst_85 = arith.constant dense<0.000000e+00> : vector<16x32xf32>
    %143 = tpu.matmul %0, %142, %cst_85 {dimension_numbers = #tpu.dot_dimension_numbers<[1], [0], [0], [1], [0, 0, 1, 1], [], []>} : vector<16x32xf32>, vector<32x32xf32>, vector<16x32xf32> -> vector<16x32xf32>
    %c0_86 = arith.constant 0 : index
    %c0_87 = arith.constant 0 : index
    %144 = vector.load %arg13[%c0_86, %c0_87] : memref<8x32xf32, #tpu.memory_space<vmem>>, vector<8x32xf32>
    %c0_88 = arith.constant 0 : index
    %c0_89 = arith.constant 0 : index
    %145 = vector.load %arg14[%c0_88, %c0_89] : memref<8x32xf32, #tpu.memory_space<vmem>>, vector<8x32xf32>
    %146 = vector.extract_strided_slice %141 {offsets = [0, 0], sizes = [8, 32], strides = [1, 1]} : vector<16x32xf32> to vector<8x32xf32>
    %147 = vector.extract_strided_slice %143 {offsets = [0, 0], sizes = [8, 32], strides = [1, 1]} : vector<16x32xf32> to vector<8x32xf32>
    %148 = vector.extract_strided_slice %146 {offsets = [0, 0], sizes = [8, 16], strides = [1, 1]} : vector<8x32xf32> to vector<8x16xf32>
    %149 = vector.extract_strided_slice %147 {offsets = [0, 0], sizes = [8, 16], strides = [1, 1]} : vector<8x32xf32> to vector<8x16xf32>
    %c1_90 = arith.constant 1 : index
    %c0_91 = arith.constant 0 : index
    %c0_92 = arith.constant 0 : index
    %c0_93 = arith.constant 0 : index
    %c0_94 = arith.constant 0 : index
    %150 = vector.load %arg3[%c1_90, %c0_91, %c0_92, %c0_93, %c0_94] : memref<2x2x2x16x8xf32, #tpu.memory_space<vmem>>, vector<1x1x1x16x8xf32>
    %151 = vector.shape_cast %150 : vector<1x1x1x16x8xf32> to vector<16x8xf32>
    %cst_95 = arith.constant dense<0.000000e+00> : vector<8x8xf32>
    %152 = tpu.matmul %148, %151, %cst_95 {dimension_numbers = #tpu.dot_dimension_numbers<[1], [0], [0], [1], [0, 0, 1, 1], [], []>} : vector<8x16xf32>, vector<16x8xf32>, vector<8x8xf32> -> vector<8x8xf32>
    %cst_96 = arith.constant dense<0xFF800000> : vector<8xf32>
    %153 = vector.multi_reduction <maximumf>, %152, %cst_96 [1] : vector<8x8xf32> to vector<8xf32>
    %154 = vector.shape_cast %153 : vector<8xf32> to vector<8x1xf32>
    %155 = vector.broadcast %154 : vector<8x1xf32> to vector<8x8xf32>
    %156 = arith.subf %152, %155 : vector<8x8xf32>
    %157 = math.exp %156 : vector<8x8xf32>
    %cst_97 = arith.constant dense<0.000000e+00> : vector<8xf32>
    %158 = vector.multi_reduction <add>, %157, %cst_97 [1] : vector<8x8xf32> to vector<8xf32>
    %159 = vector.shape_cast %158 : vector<8xf32> to vector<8x1xf32>
    %160 = tpu.reciprocal %159 {approx = true} : vector<8x1xf32> -> vector<8x1xf32>
    %161 = vector.broadcast %160 : vector<8x1xf32> to vector<8x8xf32>
    %162 = arith.mulf %157, %161 : vector<8x8xf32>
    %cst_98 = arith.constant dense<0.000000e+00> : vector<8x16xf32>
    %163 = tpu.matmul %162, %149, %cst_98 {dimension_numbers = #tpu.dot_dimension_numbers<[1], [0], [0], [1], [0, 0, 1, 1], [], []>} : vector<8x8xf32>, vector<8x16xf32>, vector<8x16xf32> -> vector<8x16xf32>
    %c0_99 = arith.constant 0 : index
    %c0_100 = arith.constant 0 : index
    %c0_101 = arith.constant 0 : index
    %164 = vector.load %arg10[%c0_99, %c0_100, %c0_101] : memref<2x16x32xf32, #tpu.memory_space<vmem>>, vector<1x16x32xf32>
    %165 = vector.shape_cast %164 : vector<1x16x32xf32> to vector<16x32xf32>
    %cst_102 = arith.constant dense<0.000000e+00> : vector<8x32xf32>
    %166 = tpu.matmul %163, %165, %cst_102 {dimension_numbers = #tpu.dot_dimension_numbers<[1], [0], [0], [1], [0, 0, 1, 1], [], []>} : vector<8x16xf32>, vector<16x32xf32>, vector<8x32xf32> -> vector<8x32xf32>
    %167 = vector.extract_strided_slice %146 {offsets = [0, 16], sizes = [8, 16], strides = [1, 1]} : vector<8x32xf32> to vector<8x16xf32>
    %168 = vector.extract_strided_slice %147 {offsets = [0, 16], sizes = [8, 16], strides = [1, 1]} : vector<8x32xf32> to vector<8x16xf32>
    %c1_103 = arith.constant 1 : index
    %c0_104 = arith.constant 0 : index
    %c1_105 = arith.constant 1 : index
    %c0_106 = arith.constant 0 : index
    %c0_107 = arith.constant 0 : index
    %169 = vector.load %arg3[%c1_103, %c0_104, %c1_105, %c0_106, %c0_107] : memref<2x2x2x16x8xf32, #tpu.memory_space<vmem>>, vector<1x1x1x16x8xf32>
    %170 = vector.shape_cast %169 : vector<1x1x1x16x8xf32> to vector<16x8xf32>
    %cst_108 = arith.constant dense<0.000000e+00> : vector<8x8xf32>
    %171 = tpu.matmul %167, %170, %cst_108 {dimension_numbers = #tpu.dot_dimension_numbers<[1], [0], [0], [1], [0, 0, 1, 1], [], []>} : vector<8x16xf32>, vector<16x8xf32>, vector<8x8xf32> -> vector<8x8xf32>
    %cst_109 = arith.constant dense<0xFF800000> : vector<8xf32>
    %172 = vector.multi_reduction <maximumf>, %171, %cst_109 [1] : vector<8x8xf32> to vector<8xf32>
    %173 = vector.shape_cast %172 : vector<8xf32> to vector<8x1xf32>
    %174 = vector.broadcast %173 : vector<8x1xf32> to vector<8x8xf32>
    %175 = arith.subf %171, %174 : vector<8x8xf32>
    %176 = math.exp %175 : vector<8x8xf32>
    %cst_110 = arith.constant dense<0.000000e+00> : vector<8xf32>
    %177 = vector.multi_reduction <add>, %176, %cst_110 [1] : vector<8x8xf32> to vector<8xf32>
    %178 = vector.shape_cast %177 : vector<8xf32> to vector<8x1xf32>
    %179 = tpu.reciprocal %178 {approx = true} : vector<8x1xf32> -> vector<8x1xf32>
    %180 = vector.broadcast %179 : vector<8x1xf32> to vector<8x8xf32>
    %181 = arith.mulf %176, %180 : vector<8x8xf32>
    %cst_111 = arith.constant dense<0.000000e+00> : vector<8x16xf32>
    %182 = tpu.matmul %181, %168, %cst_111 {dimension_numbers = #tpu.dot_dimension_numbers<[1], [0], [0], [1], [0, 0, 1, 1], [], []>} : vector<8x8xf32>, vector<8x16xf32>, vector<8x16xf32> -> vector<8x16xf32>
    %c1_112 = arith.constant 1 : index
    %c0_113 = arith.constant 0 : index
    %c0_114 = arith.constant 0 : index
    %183 = vector.load %arg10[%c1_112, %c0_113, %c0_114] : memref<2x16x32xf32, #tpu.memory_space<vmem>>, vector<1x16x32xf32>
    %184 = vector.shape_cast %183 : vector<1x16x32xf32> to vector<16x32xf32>
    %cst_115 = arith.constant dense<0.000000e+00> : vector<8x32xf32>
    %185 = tpu.matmul %182, %184, %cst_115 {dimension_numbers = #tpu.dot_dimension_numbers<[1], [0], [0], [1], [0, 0, 1, 1], [], []>} : vector<8x16xf32>, vector<16x32xf32>, vector<8x32xf32> -> vector<8x32xf32>
    %186 = arith.addf %166, %185 : vector<8x32xf32>
    %187 = vector.extract_strided_slice %1 {offsets = [0, 0], sizes = [8, 32], strides = [1, 1]} : vector<16x32xf32> to vector<8x32xf32>
    %188 = arith.addf %186, %187 : vector<8x32xf32>
    %189 = vector.shape_cast %188 : vector<8x32xf32> to vector<1x8x32xf32>
    %cst_116 = arith.constant dense<0.000000e+00> : vector<1xf32>
    %190 = vector.multi_reduction <add>, %189, %cst_116 [1, 2] : vector<1x8x32xf32> to vector<1xf32>
    %191 = vector.shape_cast %190 : vector<1xf32> to vector<1x1x1xf32>
    %192 = vector.extract %191[0, 0, 0] : f32 from vector<1x1x1xf32>
    %cst_117 = arith.constant 2.560000e+02 : f32
    %193 = arith.divf %192, %cst_117 : f32
    %194 = vector.broadcast %193 : f32 to vector<8x32xf32>
    %195 = arith.subf %188, %194 : vector<8x32xf32>
    %196 = arith.mulf %195, %195 : vector<8x32xf32>
    %197 = vector.shape_cast %196 : vector<8x32xf32> to vector<1x8x32xf32>
    %cst_118 = arith.constant dense<0.000000e+00> : vector<1xf32>
    %198 = vector.multi_reduction <add>, %197, %cst_118 [1, 2] : vector<1x8x32xf32> to vector<1xf32>
    %199 = vector.shape_cast %198 : vector<1xf32> to vector<1x1x1xf32>
    %200 = vector.extract %199[0, 0, 0] : f32 from vector<1x1x1xf32>
    %cst_119 = arith.constant 2.560000e+02 : f32
    %201 = arith.divf %200, %cst_119 : f32
    %cst_120 = arith.constant 9.99999974E-6 : f32
    %202 = arith.addf %201, %cst_120 : f32
    %203 = math.rsqrt %202 : f32
    %204 = vector.broadcast %203 : f32 to vector<8x32xf32>
    %205 = arith.mulf %195, %204 : vector<8x32xf32>
    %206 = arith.mulf %205, %144 : vector<8x32xf32>
    %207 = arith.addf %206, %145 : vector<8x32xf32>
    %c0_121 = arith.constant 0 : index
    %c0_122 = arith.constant 0 : index
    %208 = vector.load %arg22[%c0_121, %c0_122] : memref<16x32xf32, #tpu.memory_space<vmem>>, vector<8x32xf32>
    tpu.vector_store %arg22[%c0_121, %c0_122], %207 {strides = array<i32>} : memref<16x32xf32, #tpu.memory_space<vmem>>, vector<8x32xf32>,
    %209 = vector.extract_strided_slice %141 {offsets = [8, 0], sizes = [8, 32], strides = [1, 1]} : vector<16x32xf32> to vector<8x32xf32>
    %210 = vector.extract_strided_slice %143 {offsets = [8, 0], sizes = [8, 32], strides = [1, 1]} : vector<16x32xf32> to vector<8x32xf32>
    %211 = vector.extract_strided_slice %209 {offsets = [0, 0], sizes = [8, 16], strides = [1, 1]} : vector<8x32xf32> to vector<8x16xf32>
    %212 = vector.extract_strided_slice %210 {offsets = [0, 0], sizes = [8, 16], strides = [1, 1]} : vector<8x32xf32> to vector<8x16xf32>
    %c1_123 = arith.constant 1 : index
    %c1_124 = arith.constant 1 : index
    %c0_125 = arith.constant 0 : index
    %c0_126 = arith.constant 0 : index
    %c0_127 = arith.constant 0 : index
    %213 = vector.load %arg3[%c1_123, %c1_124, %c0_125, %c0_126, %c0_127] : memref<2x2x2x16x8xf32, #tpu.memory_space<vmem>>, vector<1x1x1x16x8xf32>
    %214 = vector.shape_cast %213 : vector<1x1x1x16x8xf32> to vector<16x8xf32>
    %cst_128 = arith.constant dense<0.000000e+00> : vector<8x8xf32>
    %215 = tpu.matmul %211, %214, %cst_128 {dimension_numbers = #tpu.dot_dimension_numbers<[1], [0], [0], [1], [0, 0, 1, 1], [], []>} : vector<8x16xf32>, vector<16x8xf32>, vector<8x8xf32> -> vector<8x8xf32>
    %cst_129 = arith.constant dense<0xFF800000> : vector<8xf32>
    %216 = vector.multi_reduction <maximumf>, %215, %cst_129 [1] : vector<8x8xf32> to vector<8xf32>
    %217 = vector.shape_cast %216 : vector<8xf32> to vector<8x1xf32>
    %218 = vector.broadcast %217 : vector<8x1xf32> to vector<8x8xf32>
    %219 = arith.subf %215, %218 : vector<8x8xf32>
    %220 = math.exp %219 : vector<8x8xf32>
    %cst_130 = arith.constant dense<0.000000e+00> : vector<8xf32>
    %221 = vector.multi_reduction <add>, %220, %cst_130 [1] : vector<8x8xf32> to vector<8xf32>
    %222 = vector.shape_cast %221 : vector<8xf32> to vector<8x1xf32>
    %223 = tpu.reciprocal %222 {approx = true} : vector<8x1xf32> -> vector<8x1xf32>
    %224 = vector.broadcast %223 : vector<8x1xf32> to vector<8x8xf32>
    %225 = arith.mulf %220, %224 : vector<8x8xf32>
    %cst_131 = arith.constant dense<0.000000e+00> : vector<8x16xf32>
    %226 = tpu.matmul %225, %212, %cst_131 {dimension_numbers = #tpu.dot_dimension_numbers<[1], [0], [0], [1], [0, 0, 1, 1], [], []>} : vector<8x8xf32>, vector<8x16xf32>, vector<8x16xf32> -> vector<8x16xf32>
    %c0_132 = arith.constant 0 : index
    %c0_133 = arith.constant 0 : index
    %c0_134 = arith.constant 0 : index
    %227 = vector.load %arg10[%c0_132, %c0_133, %c0_134] : memref<2x16x32xf32, #tpu.memory_space<vmem>>, vector<1x16x32xf32>
    %228 = vector.shape_cast %227 : vector<1x16x32xf32> to vector<16x32xf32>
    %cst_135 = arith.constant dense<0.000000e+00> : vector<8x32xf32>
    %229 = tpu.matmul %226, %228, %cst_135 {dimension_numbers = #tpu.dot_dimension_numbers<[1], [0], [0], [1], [0, 0, 1, 1], [], []>} : vector<8x16xf32>, vector<16x32xf32>, vector<8x32xf32> -> vector<8x32xf32>
    %230 = vector.extract_strided_slice %209 {offsets = [0, 16], sizes = [8, 16], strides = [1, 1]} : vector<8x32xf32> to vector<8x16xf32>
    %231 = vector.extract_strided_slice %210 {offsets = [0, 16], sizes = [8, 16], strides = [1, 1]} : vector<8x32xf32> to vector<8x16xf32>
    %c1_136 = arith.constant 1 : index
    %c1_137 = arith.constant 1 : index
    %c1_138 = arith.constant 1 : index
    %c0_139 = arith.constant 0 : index
    %c0_140 = arith.constant 0 : index
    %232 = vector.load %arg3[%c1_136, %c1_137, %c1_138, %c0_139, %c0_140] : memref<2x2x2x16x8xf32, #tpu.memory_space<vmem>>, vector<1x1x1x16x8xf32>
    %233 = vector.shape_cast %232 : vector<1x1x1x16x8xf32> to vector<16x8xf32>
    %cst_141 = arith.constant dense<0.000000e+00> : vector<8x8xf32>
    %234 = tpu.matmul %230, %233, %cst_141 {dimension_numbers = #tpu.dot_dimension_numbers<[1], [0], [0], [1], [0, 0, 1, 1], [], []>} : vector<8x16xf32>, vector<16x8xf32>, vector<8x8xf32> -> vector<8x8xf32>
    %cst_142 = arith.constant dense<0xFF800000> : vector<8xf32>
    %235 = vector.multi_reduction <maximumf>, %234, %cst_142 [1] : vector<8x8xf32> to vector<8xf32>
    %236 = vector.shape_cast %235 : vector<8xf32> to vector<8x1xf32>
    %237 = vector.broadcast %236 : vector<8x1xf32> to vector<8x8xf32>
    %238 = arith.subf %234, %237 : vector<8x8xf32>
    %239 = math.exp %238 : vector<8x8xf32>
    %cst_143 = arith.constant dense<0.000000e+00> : vector<8xf32>
    %240 = vector.multi_reduction <add>, %239, %cst_143 [1] : vector<8x8xf32> to vector<8xf32>
    %241 = vector.shape_cast %240 : vector<8xf32> to vector<8x1xf32>
    %242 = tpu.reciprocal %241 {approx = true} : vector<8x1xf32> -> vector<8x1xf32>
    %243 = vector.broadcast %242 : vector<8x1xf32> to vector<8x8xf32>
    %244 = arith.mulf %239, %243 : vector<8x8xf32>
    %cst_144 = arith.constant dense<0.000000e+00> : vector<8x16xf32>
    %245 = tpu.matmul %244, %231, %cst_144 {dimension_numbers = #tpu.dot_dimension_numbers<[1], [0], [0], [1], [0, 0, 1, 1], [], []>} : vector<8x8xf32>, vector<8x16xf32>, vector<8x16xf32> -> vector<8x16xf32>
    %c1_145 = arith.constant 1 : index
    %c0_146 = arith.constant 0 : index
    %c0_147 = arith.constant 0 : index
    %246 = vector.load %arg10[%c1_145, %c0_146, %c0_147] : memref<2x16x32xf32, #tpu.memory_space<vmem>>, vector<1x16x32xf32>
    %247 = vector.shape_cast %246 : vector<1x16x32xf32> to vector<16x32xf32>
    %cst_148 = arith.constant dense<0.000000e+00> : vector<8x32xf32>
    %248 = tpu.matmul %245, %247, %cst_148 {dimension_numbers = #tpu.dot_dimension_numbers<[1], [0], [0], [1], [0, 0, 1, 1], [], []>} : vector<8x16xf32>, vector<16x32xf32>, vector<8x32xf32> -> vector<8x32xf32>
    %249 = arith.addf %229, %248 : vector<8x32xf32>
    %250 = vector.extract_strided_slice %1 {offsets = [8, 0], sizes = [8, 32], strides = [1, 1]} : vector<16x32xf32> to vector<8x32xf32>
    %251 = arith.addf %249, %250 : vector<8x32xf32>
    %252 = vector.shape_cast %251 : vector<8x32xf32> to vector<1x8x32xf32>
    %cst_149 = arith.constant dense<0.000000e+00> : vector<1xf32>
    %253 = vector.multi_reduction <add>, %252, %cst_149 [1, 2] : vector<1x8x32xf32> to vector<1xf32>
    %254 = vector.shape_cast %253 : vector<1xf32> to vector<1x1x1xf32>
    %255 = vector.extract %254[0, 0, 0] : f32 from vector<1x1x1xf32>
    %cst_150 = arith.constant 2.560000e+02 : f32
    %256 = arith.divf %255, %cst_150 : f32
    %257 = vector.broadcast %256 : f32 to vector<8x32xf32>
    %258 = arith.subf %251, %257 : vector<8x32xf32>
    %259 = arith.mulf %258, %258 : vector<8x32xf32>
    %260 = vector.shape_cast %259 : vector<8x32xf32> to vector<1x8x32xf32>
    %cst_151 = arith.constant dense<0.000000e+00> : vector<1xf32>
    %261 = vector.multi_reduction <add>, %260, %cst_151 [1, 2] : vector<1x8x32xf32> to vector<1xf32>
    %262 = vector.shape_cast %261 : vector<1xf32> to vector<1x1x1xf32>
    %263 = vector.extract %262[0, 0, 0] : f32 from vector<1x1x1xf32>
    %cst_152 = arith.constant 2.560000e+02 : f32
    %264 = arith.divf %263, %cst_152 : f32
    %cst_153 = arith.constant 9.99999974E-6 : f32
    %265 = arith.addf %264, %cst_153 : f32
    %266 = math.rsqrt %265 : f32
    %267 = vector.broadcast %266 : f32 to vector<8x32xf32>
    %268 = arith.mulf %258, %267 : vector<8x32xf32>
    %269 = arith.mulf %268, %144 : vector<8x32xf32>
    %270 = arith.addf %269, %145 : vector<8x32xf32>
    %c8_154 = arith.constant 8 : index
    %c0_155 = arith.constant 0 : index
    %271 = vector.load %arg22[%c8_154, %c0_155] : memref<16x32xf32, #tpu.memory_space<vmem>>, vector<8x32xf32>
    tpu.vector_store %arg22[%c8_154, %c0_155], %270 {strides = array<i32>} : memref<16x32xf32, #tpu.memory_space<vmem>>, vector<8x32xf32>,
    %c0_156 = arith.constant 0 : index
    %c0_157 = arith.constant 0 : index
    %272 = vector.load %arg22[%c0_156, %c0_157] : memref<16x32xf32, #tpu.memory_space<vmem>>, vector<16x32xf32>
    %273 = arith.truncf %272 : vector<16x32xf32> to vector<16x32xbf16>
    %c0_158 = arith.constant 0 : index
    %c0_159 = arith.constant 0 : index
    %274 = vector.load %arg17[%c0_158, %c0_159] : memref<32x2048xbf16, #tpu.memory_space<vmem>>, vector<32x2048xbf16>
    %cst_160 = arith.constant dense<0.000000e+00> : vector<16x2048xf32>
    %275 = tpu.matmul %273, %274, %cst_160 {dimension_numbers = #tpu.dot_dimension_numbers<[1], [0], [0], [1], [0, 0, 1, 1], [], []>} : vector<16x32xbf16>, vector<32x2048xbf16>, vector<16x2048xf32> -> vector<16x2048xf32>
    %c0_161 = arith.constant 0 : index
    %c0_162 = arith.constant 0 : index
    %276 = vector.load %arg18[%c0_161, %c0_162] : memref<1x2048xf32, #tpu.memory_space<vmem>>, vector<1x2048xf32>
    %277 = vector.broadcast %276 : vector<1x2048xf32> to vector<16x2048xf32>
    %278 = arith.addf %275, %277 : vector<16x2048xf32>
    %cst_163 = arith.constant 0.000000e+00 : f32
    %279 = vector.broadcast %cst_163 : f32 to vector<16x2048xf32>
    %280 = arith.maximumf %278, %279 : vector<16x2048xf32>
    %281 = arith.truncf %280 : vector<16x2048xf32> to vector<16x2048xbf16>
    %c0_164 = arith.constant 0 : index
    %c0_165 = arith.constant 0 : index
    %282 = vector.load %arg19[%c0_164, %c0_165] : memref<2048x32xbf16, #tpu.memory_space<vmem>>, vector<2048x32xbf16>
    %cst_166 = arith.constant dense<0.000000e+00> : vector<16x32xf32>
    %283 = tpu.matmul %281, %282, %cst_166 {dimension_numbers = #tpu.dot_dimension_numbers<[1], [0], [0], [1], [0, 0, 1, 1], [], []>} : vector<16x2048xbf16>, vector<2048x32xbf16>, vector<16x32xf32> -> vector<16x32xf32>
    %c0_167 = arith.constant 0 : index
    %c0_168 = arith.constant 0 : index
    %284 = vector.load %arg20[%c0_167, %c0_168] : memref<1x32xf32, #tpu.memory_space<vmem>>, vector<1x32xf32>
    %285 = vector.broadcast %284 : vector<1x32xf32> to vector<16x32xf32>
    %286 = arith.addf %283, %285 : vector<16x32xf32>
    %c0_169 = arith.constant 0 : index
    %c0_170 = arith.constant 0 : index
    %287 = vector.load %arg15[%c0_169, %c0_170] : memref<8x32xf32, #tpu.memory_space<vmem>>, vector<8x32xf32>
    %c0_171 = arith.constant 0 : index
    %c0_172 = arith.constant 0 : index
    %288 = vector.load %arg16[%c0_171, %c0_172] : memref<8x32xf32, #tpu.memory_space<vmem>>, vector<8x32xf32>
    %289 = vector.extract_strided_slice %286 {offsets = [0, 0], sizes = [8, 32], strides = [1, 1]} : vector<16x32xf32> to vector<8x32xf32>
    %290 = vector.extract_strided_slice %272 {offsets = [0, 0], sizes = [8, 32], strides = [1, 1]} : vector<16x32xf32> to vector<8x32xf32>
    %291 = arith.addf %289, %290 : vector<8x32xf32>
    %292 = vector.shape_cast %291 : vector<8x32xf32> to vector<1x8x32xf32>
    %cst_173 = arith.constant dense<0.000000e+00> : vector<1xf32>
    %293 = vector.multi_reduction <add>, %292, %cst_173 [1, 2] : vector<1x8x32xf32> to vector<1xf32>
    %294 = vector.shape_cast %293 : vector<1xf32> to vector<1x1x1xf32>
    %295 = vector.extract %294[0, 0, 0] : f32 from vector<1x1x1xf32>
    %cst_174 = arith.constant 2.560000e+02 : f32
    %296 = arith.divf %295, %cst_174 : f32
    %297 = vector.broadcast %296 : f32 to vector<8x32xf32>
    %298 = arith.subf %291, %297 : vector<8x32xf32>
    %299 = arith.mulf %298, %298 : vector<8x32xf32>
    %300 = vector.shape_cast %299 : vector<8x32xf32> to vector<1x8x32xf32>
    %cst_175 = arith.constant dense<0.000000e+00> : vector<1xf32>
    %301 = vector.multi_reduction <add>, %300, %cst_175 [1, 2] : vector<1x8x32xf32> to vector<1xf32>
    %302 = vector.shape_cast %301 : vector<1xf32> to vector<1x1x1xf32>
    %303 = vector.extract %302[0, 0, 0] : f32 from vector<1x1x1xf32>
    %cst_176 = arith.constant 2.560000e+02 : f32
    %304 = arith.divf %303, %cst_176 : f32
    %cst_177 = arith.constant 9.99999974E-6 : f32
    %305 = arith.addf %304, %cst_177 : f32
    %306 = math.rsqrt %305 : f32
    %307 = vector.broadcast %306 : f32 to vector<8x32xf32>
    %308 = arith.mulf %298, %307 : vector<8x32xf32>
    %309 = arith.mulf %308, %287 : vector<8x32xf32>
    %310 = arith.addf %309, %288 : vector<8x32xf32>
    %c0_178 = arith.constant 0 : index
    %c0_179 = arith.constant 0 : index
    %311 = vector.load %arg21[%c0_178, %c0_179] : memref<16x32xf32, #tpu.memory_space<vmem>>, vector<8x32xf32>
    tpu.vector_store %arg21[%c0_178, %c0_179], %310 {strides = array<i32>} : memref<16x32xf32, #tpu.memory_space<vmem>>, vector<8x32xf32>,
    %312 = vector.extract_strided_slice %286 {offsets = [8, 0], sizes = [8, 32], strides = [1, 1]} : vector<16x32xf32> to vector<8x32xf32>
    %313 = vector.extract_strided_slice %272 {offsets = [8, 0], sizes = [8, 32], strides = [1, 1]} : vector<16x32xf32> to vector<8x32xf32>
    %314 = arith.addf %312, %313 : vector<8x32xf32>
    %315 = vector.shape_cast %314 : vector<8x32xf32> to vector<1x8x32xf32>
    %cst_180 = arith.constant dense<0.000000e+00> : vector<1xf32>
    %316 = vector.multi_reduction <add>, %315, %cst_180 [1, 2] : vector<1x8x32xf32> to vector<1xf32>
    %317 = vector.shape_cast %316 : vector<1xf32> to vector<1x1x1xf32>
    %318 = vector.extract %317[0, 0, 0] : f32 from vector<1x1x1xf32>
    %cst_181 = arith.constant 2.560000e+02 : f32
    %319 = arith.divf %318, %cst_181 : f32
    %320 = vector.broadcast %319 : f32 to vector<8x32xf32>
    %321 = arith.subf %314, %320 : vector<8x32xf32>
    %322 = arith.mulf %321, %321 : vector<8x32xf32>
    %323 = vector.shape_cast %322 : vector<8x32xf32> to vector<1x8x32xf32>
    %cst_182 = arith.constant dense<0.000000e+00> : vector<1xf32>
    %324 = vector.multi_reduction <add>, %323, %cst_182 [1, 2] : vector<1x8x32xf32> to vector<1xf32>
    %325 = vector.shape_cast %324 : vector<1xf32> to vector<1x1x1xf32>
    %326 = vector.extract %325[0, 0, 0] : f32 from vector<1x1x1xf32>
    %cst_183 = arith.constant 2.560000e+02 : f32
    %327 = arith.divf %326, %cst_183 : f32
    %cst_184 = arith.constant 9.99999974E-6 : f32
    %328 = arith.addf %327, %cst_184 : f32
    %329 = math.rsqrt %328 : f32
    %330 = vector.broadcast %329 : f32 to vector<8x32xf32>
    %331 = arith.mulf %321, %330 : vector<8x32xf32>
    %332 = arith.mulf %331, %287 : vector<8x32xf32>
    %333 = arith.addf %332, %288 : vector<8x32xf32>
    %c8_185 = arith.constant 8 : index
    %c0_186 = arith.constant 0 : index
    %334 = vector.load %arg21[%c8_185, %c0_186] : memref<16x32xf32, #tpu.memory_space<vmem>>, vector<8x32xf32>
    tpu.vector_store %arg21[%c8_185, %c0_186], %333 {strides = array<i32>} : memref<16x32xf32, #tpu.memory_space<vmem>>, vector<8x32xf32>,
    return
  }
  func.func @transform_0(%arg0: i32) -> (i32, i32) {
    %c0_i32 = arith.constant 0 : i32
    %c0_i32_0 = arith.constant 0 : i32
    %c0_i32_1 = arith.constant 0 : i32
    return %c0_i32, %c0_i32_0 : i32, i32
  }
  func.func @transform_1(%arg0: i32) -> (i32, i32) {
    %c0_i32 = arith.constant 0 : i32
    %c0_i32_0 = arith.constant 0 : i32
    %c0_i32_1 = arith.constant 0 : i32
    return %c0_i32, %c0_i32_0 : i32, i32
  }
  func.func @transform_2(%arg0: i32) -> (i32, i32, i32, i32, i32) {
    %c0_i32 = arith.constant 0 : i32
    %c0_i32_0 = arith.constant 0 : i32
    %c0_i32_1 = arith.constant 0 : i32
    %c0_i32_2 = arith.constant 0 : i32
    %c0_i32_3 = arith.constant 0 : i32
    %c0_i32_4 = arith.constant 0 : i32
    return %c0_i32, %c0_i32_0, %c0_i32_1, %c0_i32_2, %c0_i32_3 : i32, i32, i32, i32, i32
  }
  func.func @transform_3(%arg0: i32) -> (i32, i32) {
    %c0_i32 = arith.constant 0 : i32
    %c0_i32_0 = arith.constant 0 : i32
    %c0_i32_1 = arith.constant 0 : i32
    return %c0_i32, %c0_i32_0 : i32, i32
  }
  func.func @transform_4(%arg0: i32) -> (i32, i32) {
    %c0_i32 = arith.constant 0 : i32
    %c0_i32_0 = arith.constant 0 : i32
    %c0_i32_1 = arith.constant 0 : i32
    return %c0_i32, %c0_i32_0 : i32, i32
  }
  func.func @transform_5(%arg0: i32) -> (i32, i32) {
    %c0_i32 = arith.constant 0 : i32
    %c0_i32_0 = arith.constant 0 : i32
    %c0_i32_1 = arith.constant 0 : i32
    return %c0_i32, %c0_i32_0 : i32, i32
  }
  func.func @transform_6(%arg0: i32) -> (i32, i32, i32) {
    %c0_i32 = arith.constant 0 : i32
    %c0_i32_0 = arith.constant 0 : i32
    %c0_i32_1 = arith.constant 0 : i32
    %c0_i32_2 = arith.constant 0 : i32
    return %c0_i32, %c0_i32_0, %c0_i32_1 : i32, i32, i32
  }
  func.func @transform_7(%arg0: i32) -> (i32, i32) {
    %c0_i32 = arith.constant 0 : i32
    %c0_i32_0 = arith.constant 0 : i32
    %c0_i32_1 = arith.constant 0 : i32
    return %c0_i32, %c0_i32_0 : i32, i32
  }
  func.func @transform_8(%arg0: i32) -> (i32, i32) {
    %c0_i32 = arith.constant 0 : i32
    %c0_i32_0 = arith.constant 0 : i32
    %c0_i32_1 = arith.constant 0 : i32
    return %c0_i32, %c0_i32_0 : i32, i32
  }
  func.func @transform_9(%arg0: i32) -> (i32, i32, i32) {
    %c0_i32 = arith.constant 0 : i32
    %c0_i32_0 = arith.constant 0 : i32
    %c0_i32_1 = arith.constant 0 : i32
    %c0_i32_2 = arith.constant 0 : i32
    return %c0_i32, %c0_i32_0, %c0_i32_1 : i32, i32, i32
  }
  func.func @transform_10(%arg0: i32) -> (i32, i32) {
    %c0_i32 = arith.constant 0 : i32
    %c0_i32_0 = arith.constant 0 : i32
    %c0_i32_1 = arith.constant 0 : i32
    return %c0_i32, %c0_i32_0 : i32, i32
  }
  func.func @transform_11(%arg0: i32) -> (i32, i32) {
    %c0_i32 = arith.constant 0 : i32
    %c0_i32_0 = arith.constant 0 : i32
    %c0_i32_1 = arith.constant 0 : i32
    return %c0_i32, %c0_i32_0 : i32, i32
  }
  func.func @transform_12(%arg0: i32) -> (i32, i32) {
    %c0_i32 = arith.constant 0 : i32
    %c0_i32_0 = arith.constant 0 : i32
    %c0_i32_1 = arith.constant 0 : i32
    return %c0_i32, %c0_i32_0 : i32, i32
  }
  func.func @transform_13(%arg0: i32) -> (i32, i32) {
    %c0_i32 = arith.constant 0 : i32
    %c0_i32_0 = arith.constant 0 : i32
    %c0_i32_1 = arith.constant 0 : i32
    return %c0_i32, %c0_i32_0 : i32, i32
  }
  func.func @transform_14(%arg0: i32) -> (i32, i32) {
    %c0_i32 = arith.constant 0 : i32
    %c0_i32_0 = arith.constant 0 : i32
    %c0_i32_1 = arith.constant 0 : i32
    return %c0_i32, %c0_i32_0 : i32, i32
  }
  func.func @transform_15(%arg0: i32) -> (i32, i32) {
    %c0_i32 = arith.constant 0 : i32
    %c0_i32_0 = arith.constant 0 : i32
    %c0_i32_1 = arith.constant 0 : i32
    return %c0_i32, %c0_i32_0 : i32, i32
  }
  func.func @transform_16(%arg0: i32) -> (i32, i32) {
    %c0_i32 = arith.constant 0 : i32
    %c0_i32_0 = arith.constant 0 : i32
    %c0_i32_1 = arith.constant 0 : i32
    return %c0_i32, %c0_i32_0 : i32, i32
  }
  func.func @transform_17(%arg0: i32) -> (i32, i32) {
    %c0_i32 = arith.constant 0 : i32
    %c0_i32_0 = arith.constant 0 : i32
    %c0_i32_1 = arith.constant 0 : i32
    return %c0_i32, %c0_i32_0 : i32, i32
  }
  func.func @transform_18(%arg0: i32) -> (i32, i32) {
    %c0_i32 = arith.constant 0 : i32
    %c0_i32_0 = arith.constant 0 : i32
    %c0_i32_1 = arith.constant 0 : i32
    return %c0_i32, %c0_i32_0 : i32, i32
  }
  func.func @transform_19(%arg0: i32) -> (i32, i32) {
    %c0_i32 = arith.constant 0 : i32
    %c0_i32_0 = arith.constant 0 : i32
    %c0_i32_1 = arith.constant 0 : i32
    return %c0_i32, %c0_i32_0 : i32, i32
  }
  func.func @transform_20(%arg0: i32) -> (i32, i32) {
    %c0_i32 = arith.constant 0 : i32
    %c0_i32_0 = arith.constant 0 : i32
    %c0_i32_1 = arith.constant 0 : i32
    return %c0_i32, %c0_i32_0 : i32, i32
  }
}

</mosaic_0001>

<bundles_post_ra>
// kernel: output_transformer_block.1
= control target key start
LH: loop header
LB: loop body
LE: loop exit
PB: predicated region body
PF: predicated region fallthrough
CT: control target
= control target key end

     0   :  { %s6675_s0 = inlined_call_operand.vmem [shape: f32[16,32], index: 0, kind: input, shape index: {}]   ;;  %s6676_s1 = inlined_call_operand.vmem [shape: f32[16,32], index: 1, kind: input, shape index: {}]   ;;  %s6677_s2 = inlined_call_operand.vmem [shape: f32[2,2,2,16,8], index: 2, kind: input, shape index: {}]   ;;  %s6678_s3 = inlined_call_operand.vmem [shape: f32[8,8], index: 3, kind: input, shape index: {}]   ;;  %s6679_s4 = inlined_call_operand.vmem [shape: f32[32,32], index: 4, kind: input, shape index: {}]   ;;  %s6680_s5 = inlined_call_operand.vmem [shape: f32[32,32], index: 5, kind: input, shape index: {}]   ;;  %s6681_s6 = inlined_call_operand.vmem [shape: f32[2,16,32], index: 6, kind: input, shape index: {}]   ;;  %s6682_s7 = inlined_call_operand.vmem [shape: f32[32,32], index: 7, kind: input, shape index: {}]   ;;  %s6683_s8 = inlined_call_operand.vmem [shape: f32[32,32], index: 8, kind: input, shape index: {}]   ;;  %s6684_s9 = inlined_call_operand.vmem [shape: f32[2,16,32], index: 9, kind: input, shape index: {}]   ;;  %s6685_s10 = inlined_call_operand.vmem [shape: f32[8,32], index: 10, kind: input, shape index: {}]   ;;  %s6686_s11 = inlined_call_operand.vmem [shape: f32[8,32], index: 11, kind: input, shape index: {}]   ;;  %s6687_s12 = inlined_call_operand.vmem [shape: f32[8,32], index: 12, kind: input, shape index: {}]   ;;  %s6688_s13 = inlined_call_operand.vmem [shape: f32[8,32], index: 13, kind: input, shape index: {}]   ;;  %s6689_s14 = inlined_call_operand.vmem [shape: f32[8,32], index: 14, kind: input, shape index: {}]   ;;  %s6690_s15 = inlined_call_operand.vmem [shape: f32[8,32], index: 15, kind: input, shape index: {}]   ;;  %s6691_s16 = inlined_call_operand.vmem [shape: bf16[32,2048], index: 16, kind: input, shape index: {}]   ;;  %s6692_s17 = inlined_call_operand.vmem [shape: f32[1,2048], index: 17, kind: input, shape index: {}]   ;;  %s6693_s18 = inlined_call_operand.vmem [shape: bf16[2048,32], index: 18, kind: input, shape index: {}]   ;;  %s6694_s19 = inlined_call_operand.vmem [shape: f32[1,32], index: 19, kind: input, shape index: {}]   ;;  %s6695_s20 = inlined_call_operand.hbm [shape: f32[16,32], index: 20, kind: output, shape index: {}]  }
   0x1   :  { %6700 = sst [smem:[#allocation6_spill]] %s6675_s0 }
   0x2   :  { %6701 = sst [smem:[#allocation7_spill]] %s6676_s1 }
   0x3   :  { %6702 = sst [smem:[#allocation8_spill]] %s6677_s2 }
   0x4   :  { %6703 = sst [smem:[#allocation9_spill]] %s6678_s3 }
   0x5   :  { %6704 = sst [smem:[#allocation10_spill]] %s6679_s4 }
   0x6   :  { %s6705_s23 = sld [smem:[#allocation10_spill]]  ;;  %vm76_vm0 = vcmask 261120   ;;  %s6706_s29 = sld [smem:[#allocation7_spill]]  ;;  %v5608_v11 = vmov 0.0|0.0  }
   0x7   :  { %s6707_s21 = sld [smem:[#allocation8_spill]] }
   0xc   :  { %v72_v0 = vld [vmem:[%s6705_s23] sm:$0xff]  ;;  %v73_v1 = vld [vmem:[%s6705_s23 + $0x8] sm:$0xff]  ;;  %v74_v2 = vld [vmem:[%s6705_s23 + $0x10] sm:$0xff] }
   0xd   :  { %v5284_v3 = vpack.c.bf16 %v73_v1, %v72_v0  ;;  %v75_v4 = vld [vmem:[%s6705_s23 + $0x18] sm:$0xff]  ;;  %v5736_v5 = vld [vmem:[%s6706_s29] sm:$0xff]  ;;  %v240_v8 = vld [vmem:[%s6707_s21 + $0x8] sm:$0xff] }
   0xe   :  { %v5288_v6 = vpack.c.bf16 %v75_v4, %v74_v2  ;;  %5096 = vmatprep.mubr.msk.f32.mxu0 %vm76_vm0, %v5736_v5  ;;  %5107 = vmatprep.mubr.msk.f32.mxu1 %vm76_vm0, %v5736_v5  ;;  %v239_v7 = vld [vmem:[%s6707_s21] sm:$0xff]  ;;  %v5751_v9 = vld [vmem:[%s6706_s29 + $0x8] sm:$0xff] }
   0xf   :  { %5285 = vmatprep.subr.bf16.mxu0 %v5284_v3  ;;  %v5301_v10 = vpack.c.bf16 %v240_v8, %v239_v7 }
  0x10   :  { %5287 = vmatpush3.bf16.msra.mxu0 %v5284_v3 }
  0x11   :  { %5289 = vmatprep.subr.bf16.mxu0 %v5288_v6 }
  0x14   :  { %5291 = vmatpush3.bf16.msra.mxu0 %v5288_v6 }
  0x15   :  { %5300 = vmatprep.subr.bf16.mxu0 %v5608_v11 }
  0x17   :  { %5097 = vmatmul.mubr.msk.f32.vlgmr.msra.gmra.mrb[0].mxu0 %vm76_vm0, %v5751_v9 }
  0x18   :  { %5302 = vmatpush3.bf16.msra.mxu0 %v5301_v10 }
  0x19   :  { %5303 = vmatprep.subr.bf16.mxu0 %v5608_v11 }
  0x1a   :  { %25 = vsyncpa [#allocation4], 0  ;;  %vm5609_vm1 = vmmov 0   ;;  %v5610_v12 = vmov 0.0   ;;  %v4607_v13 = vld [vmem:[%s6707_s21 + $0x10] sm:$0xff]  ;;  %v4608_v14 = vld [vmem:[%s6707_s21 + $0x18] sm:$0xff] }
  0x1b   :  { %5114 = vmatprep.mubr.msk.f32.mxu0 %vm5609_vm1, %v5610_v12  ;;  %vm241_vm2 = vcmask 130048   ;;  %v5304_v15 = vpack.c.bf16 %v4608_v14, %v4607_v13  ;;  %s5611_s27 = smov 112   ;;  %v158_v18 = vld [vmem:[%s6680_s5] sm:$0xff]  ;;  %v159_v19 = vld [vmem:[%s6680_s5 + $0x8] sm:$0xff]  ;;  %v160_v20 = vld [vmem:[%s6680_s5 + $0x10] sm:$0xff]  ;;  %s6708_s25 = sld [smem:[#allocation9_spill]] }
  0x1c   :  { %v5292_v21 = vpack.c.bf16 %v159_v19, %v158_v18  ;;  %v161_v22 = vld [vmem:[%s6680_s5 + $0x18] sm:$0xff]  ;;  %vm315_vm3 = vcmask 64512   ;;  %v4611_v49 = vld [vmem:[%s6681_s6 + $0x10] sm:$0xff]  ;;  %v400_v54 = vld [vmem:[%s6681_s6] sm:$0xff]  ;;  %s6709_s24 = sld [smem:[#allocation6_spill]] }
  0x1d   :  { %v5296_v23 = vpack.c.bf16 %v161_v22, %v160_v20  ;;  %v4612_v50 = vld [vmem:[%s6681_s6 + $0x18] sm:$0xff]  ;;  %v401_v55 = vld [vmem:[%s6681_s6 + $0x8] sm:$0xff]  ;;  %v4615_v61 = vld [vmem:[%s6707_s21 + $0x20] sm:$0xff] }
  0x1e   :  { %5293 = vmatprep.subr.bf16.mxu1 %v5292_v21  ;;  %v5307_v51 = vpack.c.bf16 %v4612_v50, %v4611_v49  ;;  %v5826_v57 = vpack.c.bf16 %v401_v55, %v400_v54  ;;  %v4616_v62 = vld [vmem:[%s6707_s21 + $0x28] sm:$0xff]  ;;  %v4619_v0 = vld [vmem:[%s6707_s21 + $0x30] sm:$0xff]  ;;  %v4620_v1 = vld [vmem:[%s6707_s21 + $0x38] sm:$0xff] }
  0x1f   :  { %5295 = vmatpush3.bf16.msra.mxu1 %v5292_v21  ;;  %v5313_v63 = vpack.c.bf16 %v4616_v62, %v4615_v61  ;;  %v5316_v4 = vpack.c.bf16 %v4620_v1, %v4619_v0  ;;  %v237_v1 = vld [vmem:[%s6685_s10] sm:$0xff] }
  0x20   :  { %5297 = vmatprep.subr.bf16.mxu1 %v5296_v23 }
  0x21   :  { %v5795_v25 = vld [vmem:[%s6708_s25] sm:$0xff] }
  0x23   :  { %5299 = vmatpush3.bf16.msra.mxu1 %v5296_v23 }
  0x24   :  { %5117 = vmatprep.subr.mxu1 %v5610_v12 }
  0x26   :  { %5108 = vmatmul.mubr.msk.f32.vlgmr.msra.gmra.mrb[0].mxu1 %vm76_vm0, %v5751_v9 }
  0x27   :  { %5119 = vmatprep.mubr.msk.f32.mxu1 %vm5609_vm1, %v5610_v12 }
  0xea   :  { %v5765_v16 = vpop.f32.mrb[0].mxu0 }
  0xeb   :  { %v149_v17 = vpop.f32.mrb[1].mxu0 }
  0xec   :  { %405 = vrot.lane.b32.xlu0 %v149_v17, %s5611_s27  ;;  %5115 = vmatmul.mubr.msk.f32.vlgmr.msra.gmra.mrb[2].mxu0 %vm241_vm2, %v149_v17 }
  0xed   :  { %5305 = vmatpush3.bf16.msra.mxu0 %v5304_v15  ;;  %5126 = vmatprep.mubr.msk.f32.mxu0 %vm5609_vm1, %v5610_v12 }
  0xee   :  { %5306 = vmatprep.subr.bf16.mxu0 %v5608_v11 }
  0xf9   :  { %v5801_v37 = vpop.f32.mrb[0].mxu1 }
  0xfa   :  { %v228_v38 = vpop.f32.mrb[1].mxu1 }
  0xfb   :  { %5118 = vmatpush3.msra.mxu1 %v228_v38 }
  0xfc   :  { %5129 = vmatprep.subr.mxu1 %v5610_v12 }
 0x15e   :  { %v406_v24 = vpop.permute.xlu0 %405 }
 0x15f   :  { %5127 = vmatmul.mubr.msk.f32.vlgmr.msra.gmra.mrb[4].mxu0 %vm241_vm2, %v406_v24 }
 0x160   :  { %5138 = vmatprep.mubr.msk.f32.mxu0 %vm5609_vm1, %v5610_v12  ;;  %5308 = vmatpush3.bf16.msra.mxu0 %v5307_v51 }
 0x161   :  { %5312 = vmatprep.subr.bf16.mxu0 %v5608_v11 }
 0x1bf   :  { %v311_v26 = vpop.f32.mrb[2].mxu0 }
 0x1c0   :  { %v312_v27 = vadd.f32 %v311_v26, %v5795_v25  ;;  %v5116_v28 = vpop.f32.mrb[3].mxu0 }
 0x1c2   :  { %v316_v29 = vsel %vm315_vm3, %v312_v27, -inf }
 0x1c3   :  { %317 = vmax.xlane.f32.xlu0 %v316_v29 }
 0x232   :  { %v475_v30 = vpop.f32.mrb[4].mxu0 }
 0x233   :  { %v476_v31 = vadd.f32 %v475_v30, %v5795_v25  ;;  %v5128_v32 = vpop.f32.mrb[5].mxu0 }
 0x235   :  { %v479_v33 = vsel %vm315_vm3, %v476_v31, -inf }
 0x236   :  { %480 = vmax.xlane.f32.xlu1 %v479_v33 }
 0x250   :  { %v318_v34 = vpop.xlane.xlu0 %317 }
 0x251   :  { %v319_v35 = vsub.f32 %v312_v27, %v318_v34 }
 0x253   :  { %v320_v36 = vmul.f32 1.442695, %v319_v35 }
 0x255   :  { %5536 = vpow2.f32 %v320_v36 }
 0x25f   :  { %v5537_v39 = vpop.eup %5536 }
 0x260   :  { %v322_v40 = vsel %vm315_vm3, %v5537_v39, 0.0 }
 0x261   :  { %323 = vadd.xlane.f32.xlu1 %v322_v40 }
 0x2c3   :  { %v481_v41 = vpop.xlane.xlu1 %480 }
 0x2c4   :  { %v482_v42 = vsub.f32 %v476_v31, %v481_v41 }
 0x2c6   :  { %v483_v43 = vmul.f32 1.442695, %v482_v42 }
 0x2c8   :  { %5538 = vpow2.f32 %v483_v43 }
 0x2d2   :  { %v5539_v44 = vpop.eup %5538 }
 0x2d3   :  { %v485_v45 = vsel %vm315_vm3, %v5539_v44, 0.0 }
 0x2d4   :  { %486 = vadd.xlane.f32.xlu1 %v485_v45 }
 0x2e5   :  { %491 = vrot.lane.b32.xlu1 %v228_v38, %s5611_s27 }
 0x2e9   :  { %920 = vrot.lane.b32.xlu1 %v5765_v16, %s5611_s27 }
 0x2ee   :  { %v324_v46 = vpop.xlane.xlu1 %323 }
 0x2ef   :  { %5540 = vrcp.f32 %v324_v46 }
 0x2f9   :  { %v5541_v47 = vpop.eup %5540 }
 0x2fa   :  { %v326_v48 = vmul.f32 %v5541_v47, %v5537_v39 }
 0x2fc   :  { %5120 = vmatmul.mubr.msk.f32.vlgmr.msra.gmra.mrb[2].mxu1 %vm315_vm3, %v326_v48 }
 0x2fd   :  { %5131 = vmatprep.mubr.msk.f32.mxu1 %vm5609_vm1, %v5610_v12 }
 0x361   :  { %v487_v52 = vpop.xlane.xlu1 %486 }
 0x362   :  { %5542 = vrcp.f32 %v487_v52 }
 0x365   :  { %v492_v53 = vpop.permute.xlu1 %491 }
 0x366   :  { %5130 = vmatpush3.msra.mxu1 %v492_v53 }
 0x367   :  { %5309 = vmatprep.subr.bf16.mxu1 %v5608_v11 }
 0x369   :  { %v921_v6 = vpop.permute.xlu1 %920 }
 0x36c   :  { %v5543_v56 = vpop.eup %5542 }
 0x36d   :  { %v489_v58 = vmul.f32 %v5543_v56, %v5539_v44 }
 0x36f   :  { %5132 = vmatmul.mubr.msk.f32.vlgmr.msra.gmra.mrb[4].mxu1 %vm315_vm3, %v489_v58 }
 0x370   :  { %5311 = vmatpush3.bf16.msra.mxu1 %v5826_v57  ;;  %5145 = vmatprep.mubr.msk.f32.mxu1 %vm5609_vm1, %v5610_v12 }
 0x371   :  { %5155 = vmatprep.subr.mxu1 %v5610_v12 }
 0x3cf   :  { %v396_v59 = vpop.f32.mrb[2].mxu1 }
 0x3d0   :  { %v5121_v60 = vpop.f32.mrb[3].mxu1  ;;  %5146 = vmatmul.mubr.msk.f32.vlgmr.msra.gmra.mrb[6].mxu1 %vm241_vm2, %v396_v59 }
 0x3d1   :  { %5156 = vmatpush3.msra.mxu1 %v5801_v37  ;;  %5157 = vmatprep.mubr.msk.f32.mxu1 %vm5609_vm1, %v5610_v12 }
 0x3d2   :  { %5167 = vmatprep.subr.mxu1 %v5610_v12 }
 0x442   :  { %v563_v2 = vpop.f32.mrb[4].mxu1 }
 0x443   :  { %v5133_v3 = vpop.f32.mrb[5].mxu1  ;;  %5139 = vmatmul.mubr.msk.f32.vlgmr.msra.gmra.mrb[6].mxu0 %vm241_vm2, %v563_v2 }
 0x444   :  { %5314 = vmatpush3.bf16.msra.mxu0 %v5313_v63  ;;  %5152 = vmatprep.mubr.msk.f32.mxu0 %vm5609_vm1, %v5610_v12 }
 0x445   :  { %5315 = vmatprep.subr.bf16.mxu0 %v5608_v11 }
 0x447   :  { %5153 = vmatmul.mubr.msk.f32.vlgmr.msra.gmra.mrb[8].mxu0 %vm241_vm2, %v5765_v16 }
 0x448   :  { %5317 = vmatpush3.bf16.msra.mxu0 %v5316_v4  ;;  %5164 = vmatprep.mubr.msk.f32.mxu0 %vm5609_vm1, %v5610_v12  ;;  %v238_v4 = vld [vmem:[%s6686_s11] sm:$0xff] }
 0x449   :  { %5318 = vmatprep.subr.bf16.mxu0 %v5608_v11 }
 0x44b   :  { %5165 = vmatmul.mubr.msk.f32.vlgmr.msra.gmra.mrb[10].mxu0 %vm241_vm2, %v921_v6 }
 0x44c   :  { %5320 = vmatpush3.bf16.msra.mxu0 %v5307_v51  ;;  %5176 = vmatprep.mubr.msk.f32.mxu0 %vm5609_vm1, %v5610_v12 }
 0x4a3   :  { %v712_v7 = vpop.f32.mrb[6].mxu1 }
 0x4a4   :  { %v5147_v8 = vpop.f32.mrb[7].mxu1 }
 0x516   :  { %v639_v10 = vpop.f32.mrb[6].mxu0 }
 0x517   :  { %v713_v13 = vadd.f32 %v712_v7, %v639_v10  ;;  %v5140_v14 = vpop.f32.mrb[7].mxu0 }
 0x51a   :  { %v827_v15 = vpop.f32.mrb[8].mxu0 }
 0x51b   :  { %v828_v16 = vadd.f32 %v827_v15, %v5795_v25  ;;  %v5154_v17 = vpop.f32.mrb[9].mxu0 }
 0x51d   :  { %v831_v18 = vsel %vm315_vm3, %v828_v16, -inf }
 0x51e   :  { %832 = vmax.xlane.f32.xlu1 %v831_v18  ;;  %v990_v19 = vpop.f32.mrb[10].mxu0 }
 0x51f   :  { %v991_v20 = vadd.f32 %v990_v19, %v5795_v25  ;;  %v5166_v21 = vpop.f32.mrb[11].mxu0  ;;  %v716_v25 = vadd.f32 %v713_v13, %v5736_v5 }
 0x521   :  { %v994_v22 = vsel %vm315_vm3, %v991_v20, -inf  ;;  %v717_v34 = vsel %vm76_vm0, %v716_v25, 0.0 }
 0x522   :  { %995 = vmax.xlane.f32.xlu0 %v994_v22 }
 0x5ab   :  { %v833_v23 = vpop.xlane.xlu1 %832 }
 0x5ac   :  { %v834_v24 = vsub.f32 %v828_v16, %v833_v23 }
 0x5ae   :  { %v835_v26 = vmul.f32 1.442695, %v834_v24 }
 0x5af   :  { %v996_v27 = vpop.xlane.xlu0 %995 }
 0x5b0   :  { %5544 = vpow2.f32 %v835_v26  ;;  %v997_v28 = vsub.f32 %v991_v20, %v996_v27 }
 0x5b2   :  { %v998_v29 = vmul.f32 1.442695, %v997_v28 }
 0x5b4   :  { %5546 = vpow2.f32 %v998_v29 }
 0x5ba   :  { %v5545_v30 = vpop.eup %5544 }
 0x5bb   :  { %v837_v31 = vsel %vm315_vm3, %v5545_v30, 0.0 }
 0x5bc   :  { %838 = vadd.xlane.f32.xlu0 %v837_v31 }
 0x5be   :  { %v5547_v32 = vpop.eup %5546 }
 0x5bf   :  { %v1000_v33 = vsel %vm315_vm3, %v5547_v32, 0.0 }
 0x5c0   :  { %1001 = vadd.xlane.f32.xlu0 %v1000_v33 }
 0x5d6   :  { %1006 = vrot.lane.b32.xlu0 %v5801_v37, %s5611_s27 }
 0x5f5   :  { %718 = vadd.xlane.f32.xlu0 %v717_v34  ;;  %v1272_v34 = vld [vmem:[%s6682_s7 + $0x8] sm:$0xff] }
 0x649   :  { %v839_v35 = vpop.xlane.xlu0 %838 }
 0x64a   :  { %5548 = vrcp.f32 %v839_v35 }
 0x64d   :  { %v1002_v36 = vpop.xlane.xlu0 %1001 }
 0x64e   :  { %5550 = vrcp.f32 %v1002_v36 }
 0x651   :  { %v1007_v40 = vpop.permute.xlu0 %1006 }
 0x654   :  { %v5549_v38 = vpop.eup %5548 }
 0x655   :  { %v841_v39 = vmul.f32 %v5549_v38, %v5545_v30  ;;  %v1273_v38 = vld [vmem:[%s6682_s7 + $0x10] sm:$0xff] }
 0x657   :  { %5158 = vmatmul.mubr.msk.f32.vlgmr.msra.gmra.mrb[8].mxu1 %vm315_vm3, %v841_v39  ;;  %v1274_v39 = vld [vmem:[%s6682_s7 + $0x18] sm:$0xff] }
 0x658   :  { %v5551_v41 = vpop.eup %5550  ;;  %5168 = vmatpush3.msra.mxu1 %v1007_v40  ;;  %5169 = vmatprep.mubr.msk.f32.mxu1 %vm5609_vm1, %v5610_v12 }
 0x659   :  { %v1004_v37 = vmul.f32 %v5551_v41, %v5547_v32  ;;  %5321 = vmatprep.subr.bf16.mxu1 %v5608_v11  ;;  %v5328_v41 = vpack.c.bf16 %v1274_v39, %v1273_v38  ;;  %v4643_v38 = vld [vmem:[%s6707_s21 + $0x60] sm:$0xff]  ;;  %v4644_v39 = vld [vmem:[%s6707_s21 + $0x68] sm:$0xff] }
 0x65b   :  { %5170 = vmatmul.mubr.msk.f32.vlgmr.msra.gmra.mrb[10].mxu1 %vm315_vm3, %v1004_v37 }
 0x65c   :  { %5323 = vmatpush3.bf16.msra.mxu1 %v5826_v57  ;;  %5183 = vmatprep.mubr.msk.f32.mxu1 %vm5609_vm1, %v5610_v12 }
 0x682   :  { %v719_v5 = vpop.xlane.xlu0 %718 }
 0x683   :  { %v720_v42 = vrot.slane %v719_v5, 4 }
 0x685   :  { %v721_v43 = vadd.f32 %v720_v42, %v719_v5 }
 0x687   :  { %v722_v44 = vrot.slane %v721_v43, 2 }
 0x689   :  { %v723_v45 = vadd.f32 %v722_v44, %v721_v43 }
 0x68b   :  { %v724_v46 = vrot.slane %v723_v45, 1 }
 0x68d   :  { %v725_v47 = vadd.f32 %v724_v46, %v723_v45 }
 0x68f   :  { %5364 = vpush %v725_v47  ;;  %v4631_v47 = vld [vmem:[%s6707_s21 + $0x40] sm:$0xff] }
 0x6c0   :  { %s5365_s28 = spop %5364 }
 0x6c1   :  { %s729_s4 = smul.f32 0.00390625, %s5365_s28 }
 0x6c3   :  { %v730_v48 = vstv %s729_s4 }
 0x6c4   :  { %v731_v49 = vsub.f32 %v716_v25, %v730_v48  ;;  %v1271_v25 = vld [vmem:[%s6682_s7] sm:$0xff]  ;;  %v4632_v48 = vld [vmem:[%s6707_s21 + $0x48] sm:$0xff] }
 0x6c5   :  { %v5324_v36 = vpack.c.bf16 %v1272_v34, %v1271_v25 }
 0x6c6   :  { %v732_v50 = vmul.f32 %v731_v49, %v731_v49 }
 0x6c7   :  { %5325 = vmatprep.subr.bf16.mxu0 %v5324_v36 }
 0x6c8   :  { %v733_v51 = vsel %vm76_vm0, %v732_v50, 0.0 }
 0x6c9   :  { %734 = vadd.xlane.f32.xlu1 %v733_v51  ;;  %v4635_v51 = vld [vmem:[%s6707_s21 + $0x50] sm:$0xff] }
 0x72a   :  { %v911_v52 = vpop.f32.mrb[8].mxu1 }
 0x72b   :  { %v5159_v53 = vpop.f32.mrb[9].mxu1  ;;  %5184 = vmatmul.mubr.msk.f32.vlgmr.msra.gmra.mrb[12].mxu1 %vm241_vm2, %v911_v52  ;;  %v4636_v52 = vld [vmem:[%s6707_s21 + $0x58] sm:$0xff] }
 0x72c   :  { %v5344_v53 = vpack.c.bf16 %v4636_v52, %v4635_v51 }
 0x72e   :  { %v1078_v54 = vpop.f32.mrb[10].mxu1 }
 0x72f   :  { %v5171_v55 = vpop.f32.mrb[11].mxu1  ;;  %5177 = vmatmul.mubr.msk.f32.vlgmr.msra.gmra.mrb[12].mxu0 %vm241_vm2, %v1078_v54 }
 0x730   :  { %5327 = vmatpush3.bf16.msra.mxu0 %v5324_v36 }
 0x731   :  { %5329 = vmatprep.subr.bf16.mxu0 %v5328_v41 }
 0x734   :  { %5331 = vmatpush3.bf16.msra.mxu0 %v5328_v41  ;;  %v4647_v41 = vld [vmem:[%s6707_s21 + $0x70] sm:$0xff] }
 0x735   :  { %5340 = vmatprep.subr.bf16.mxu0 %v5608_v11 }
 0x756   :  { %v735_v56 = vpop.xlane.xlu1 %734 }
 0x757   :  { %v736_v57 = vrot.slane %v735_v56, 4 }
 0x759   :  { %v737_v58 = vadd.f32 %v736_v57, %v735_v56  ;;  %v1356_v56 = vld [vmem:[%s6683_s8] sm:$0xff]  ;;  %v1357_v57 = vld [vmem:[%s6683_s8 + $0x8] sm:$0xff] }
 0x75b   :  { %v738_v59 = vrot.slane %v737_v58, 2 }
 0x75d   :  { %v739_v60 = vadd.f32 %v738_v59, %v737_v58  ;;  %v1358_v58 = vld [vmem:[%s6683_s8 + $0x10] sm:$0xff]  ;;  %v5332_v59 = vpack.c.bf16 %v1357_v57, %v1356_v56 }
 0x75f   :  { %v740_v61 = vrot.slane %v739_v60, 1  ;;  %5333 = vmatprep.subr.bf16.mxu1 %v5332_v59 }
 0x760   :  { %5335 = vmatpush3.bf16.msra.mxu1 %v5332_v59 }
 0x761   :  { %v741_v62 = vadd.f32 %v740_v61, %v739_v60  ;;  %v1359_v60 = vld [vmem:[%s6683_s8 + $0x18] sm:$0xff]  ;;  %v67_v61 = vld [vmem:[%s6709_s24] sm:$0xff] }
 0x762   :  { %5205 = vmatprep.mubr.msk.f32.mxu1 %vm76_vm0, %v67_v61 }
 0x763   :  { %5366 = vpush %v741_v62  ;;  %v5336_v62 = vpack.c.bf16 %v1359_v60, %v1358_v58 }
 0x765   :  { %5337 = vmatprep.subr.bf16.mxu1 %v5336_v62 }
 0x766   :  { %5339 = vmatpush3.bf16.msra.mxu1 %v5336_v62 }
 0x767   :  { %5215 = vmatprep.subr.mxu1 %v5610_v12 }
 0x794   :  { %s5367_s30 = spop %5366 }
 0x795   :  { %s745_s0 = smul.f32 0.00390625, %s5367_s30 }
 0x797   :  { %s746_s1 = sadd.f32 1e-05, %s745_s0 }
 0x799   :  { %v747_v63 = vstv %s746_s1 }
 0x79a   :  { %5552 = vrsqrt.f32 %v747_v63  ;;  %v68_v63 = vld [vmem:[%s6709_s24 + $0x8] sm:$0xff] }
 0x79b   :  { %5206 = vmatmul.mubr.msk.f32.vlgmr.msra.gmra.mrb[14].mxu1 %vm76_vm0, %v68_v63 }
 0x79c   :  { %5217 = vmatprep.mubr.msk.f32.mxu1 %vm5609_vm1, %v5610_v12 }
 0x7a4   :  { %v5553_v0 = vpop.eup %5552 }
 0x7a5   :  { %5368 = vpush %v5553_v0 }
 0x7d6   :  { %s5369_s22 = spop %5368 }
 0x7d7   :  { %v750_v2 = vstv %s5369_s22 }
 0x7d8   :  { %v751_v3 = vmul.f32 %v750_v2, %v731_v49  ;;  %v5341_v49 = vpack.c.bf16 %v4632_v48, %v4631_v47 }
 0x7da   :  { %v752_v6 = vmul.f32 %v751_v3, %v237_v1 }
 0x7dc   :  { %v753_v7 = vadd.f32 %v752_v6, %v238_v4 }
 0x7de   :  { %754 = vst.msk [vmem:[#allocation2] sm:$0xff] %vm76_vm0, %v753_v7 }
 0x7e5   :  { %v1269_v8 = vld [vmem:[#allocation2] sm:$0xff] }
 0x7e6   :  { %5194 = vmatprep.mubr.msk.f32.mxu0 %vm76_vm0, %v1269_v8 }
 0x7fe   :  { %v1226_v10 = vpop.f32.mrb[12].mxu1 }
 0x7ff   :  { %v5185_v13 = vpop.f32.mrb[13].mxu1 }
 0x802   :  { %v1153_v14 = vpop.f32.mrb[12].mxu0 }
 0x803   :  { %v1227_v15 = vadd.f32 %v1226_v10, %v1153_v14  ;;  %v5178_v16 = vpop.f32.mrb[13].mxu0 }
 0x805   :  { %v1230_v17 = vadd.f32 %v1227_v15, %v5751_v9 }
 0x807   :  { %v1231_v18 = vsel %vm76_vm0, %v1230_v17, 0.0 }
 0x808   :  { %1232 = vadd.xlane.f32.xlu1 %v1231_v18 }
 0x86e   :  { %v5959_v14 = vpop.f32.mrb[14].mxu1 }
 0x86f   :  { %v1432_v15 = vpop.f32.mrb[15].mxu1 }
 0x870   :  { %5216 = vmatpush3.msra.mxu1 %v1432_v15 }
 0x871   :  { %5227 = vmatprep.subr.mxu1 %v5610_v12 }
 0x895   :  { %v1233_v19 = vpop.xlane.xlu1 %1232 }
 0x896   :  { %v1234_v20 = vrot.slane %v1233_v19, 4 }
 0x898   :  { %v1235_v21 = vadd.f32 %v1234_v20, %v1233_v19 }
 0x89a   :  { %v1236_v22 = vrot.slane %v1235_v21, 2 }
 0x89c   :  { %v1237_v23 = vadd.f32 %v1236_v22, %v1235_v21 }
 0x89e   :  { %v1238_v24 = vrot.slane %v1237_v23, 1 }
 0x8a0   :  { %v1239_v26 = vadd.f32 %v1238_v24, %v1237_v23 }
 0x8a2   :  { %5370 = vpush %v1239_v26 }
 0x8d3   :  { %s5371_s10 = spop %5370 }
 0x8d4   :  { %s1243_s11 = smul.f32 0.00390625, %s5371_s10 }
 0x8d6   :  { %v1244_v27 = vstv %s1243_s11 }
 0x8d7   :  { %v1245_v28 = vsub.f32 %v1230_v17, %v1244_v27  ;;  %v4639_v27 = vld [vmem:[%s6684_s9 + $0x10] sm:$0xff] }
 0x8d9   :  { %v1246_v29 = vmul.f32 %v1245_v28, %v1245_v28 }
 0x8db   :  { %v1247_v30 = vsel %vm76_vm0, %v1246_v29, 0.0 }
 0x8dc   :  { %1248 = vadd.xlane.f32.xlu1 %v1247_v30 }
 0x969   :  { %v1249_v9 = vpop.xlane.xlu1 %1248 }
 0x96a   :  { %v1250_v31 = vrot.slane %v1249_v9, 4 }
 0x96c   :  { %v1251_v32 = vadd.f32 %v1250_v31, %v1249_v9  ;;  %v1603_v31 = vld [vmem:[%s6684_s9] sm:$0xff] }
 0x96e   :  { %v1252_v33 = vrot.slane %v1251_v32, 2 }
 0x970   :  { %v1253_v35 = vadd.f32 %v1252_v33, %v1251_v32  ;;  %v1604_v32 = vld [vmem:[%s6684_s9 + $0x8] sm:$0xff] }
 0x971   :  { %v5984_v25 = vpack.c.bf16 %v1604_v32, %v1603_v31 }
 0x972   :  { %v1254_v40 = vrot.slane %v1253_v35, 1 }
 0x974   :  { %v1255_v37 = vadd.f32 %v1254_v40, %v1253_v35  ;;  %v5353_v40 = vpack.c.bf16 %v4644_v39, %v4643_v38  ;;  %v6044_v38 = vld [vmem:[%s6687_s12] sm:$0xff] }
 0x976   :  { %5372 = vpush %v1255_v37  ;;  %v4648_v37 = vld [vmem:[%s6707_s21 + $0x78] sm:$0xff] }
 0x9a7   :  { %s5373_s1 = spop %5372 }
 0x9a8   :  { %s1259_s22 = smul.f32 0.00390625, %s5373_s1 }
 0x9aa   :  { %s1260_s6 = sadd.f32 1e-05, %s1259_s22 }
 0x9ac   :  { %v1261_v5 = vstv %s1260_s6 }
 0x9ad   :  { %5554 = vrsqrt.f32 %v1261_v5 }
 0x9b7   :  { %v5555_v42 = vpop.eup %5554 }
 0x9b8   :  { %5374 = vpush %v5555_v42 }
 0x9e9   :  { %s5375_s23 = spop %5374 }
 0x9ea   :  { %v1264_v43 = vstv %s5375_s23 }
 0x9eb   :  { %v1265_v44 = vmul.f32 %v1264_v43, %v1245_v28  ;;  %v4640_v28 = vld [vmem:[%s6684_s9 + $0x18] sm:$0xff]  ;;  %v5356_v43 = vpack.c.bf16 %v4648_v37, %v4647_v41  ;;  %v6049_v41 = vld [vmem:[%s6688_s13] sm:$0xff] }
 0x9ec   :  { %v5347_v29 = vpack.c.bf16 %v4640_v28, %v4639_v27 }
 0x9ed   :  { %v1266_v45 = vmul.f32 %v1265_v44, %v237_v1 }
 0x9ef   :  { %v1267_v46 = vadd.f32 %v1266_v45, %v238_v4 }
 0x9f1   :  { %1268 = vst.msk [vmem:[#allocation2 + $0x8] sm:$0xff] %vm76_vm0, %v1267_v46 }
 0x9f8   :  { %v1270_v50 = vld [vmem:[#allocation2 + $0x8] sm:$0xff] }
 0x9f9   :  { %5195 = vmatmul.mubr.msk.f32.vlgmr.msra.gmra.mrb[14].mxu0 %vm76_vm0, %v1270_v50 }
 0x9fa   :  { %5342 = vmatpush3.bf16.msra.mxu0 %v5341_v49  ;;  %5212 = vmatprep.mubr.msk.f32.mxu0 %vm5609_vm1, %v5610_v12 }
 0x9fb   :  { %5343 = vmatprep.subr.bf16.mxu0 %v5608_v11 }
 0xacc   :  { %v5924_v54 = vpop.f32.mrb[14].mxu0 }
 0xacd   :  { %v1347_v55 = vpop.f32.mrb[15].mxu0 }
 0xace   :  { %1608 = vrot.lane.b32.xlu1 %v1347_v55, %s5611_s27  ;;  %5213 = vmatmul.mubr.msk.f32.vlgmr.msra.gmra.mrb[16].mxu0 %vm241_vm2, %v1347_v55 }
 0xacf   :  { %5345 = vmatpush3.bf16.msra.mxu0 %v5344_v53  ;;  %5224 = vmatprep.mubr.msk.f32.mxu0 %vm5609_vm1, %v5610_v12 }
 0xad0   :  { %5346 = vmatprep.subr.bf16.mxu0 %v5608_v11 }
 0xb40   :  { %v1609_v0 = vpop.permute.xlu1 %1608 }
 0xb41   :  { %5225 = vmatmul.mubr.msk.f32.vlgmr.msra.gmra.mrb[18].mxu0 %vm241_vm2, %v1609_v0 }
 0xb42   :  { %5236 = vmatprep.mubr.msk.f32.mxu0 %vm5609_vm1, %v5610_v12  ;;  %5348 = vmatpush3.bf16.msra.mxu0 %v5347_v29 }
 0xb43   :  { %5352 = vmatprep.subr.bf16.mxu0 %v5608_v11 }
 0xba1   :  { %v1515_v1 = vpop.f32.mrb[16].mxu0 }
 0xba2   :  { %v5214_v2 = vpop.f32.mrb[17].mxu0  ;;  %v1519_v3 = vsel %vm315_vm3, %v1515_v1, -inf }
 0xba3   :  { %1520 = vmax.xlane.f32.xlu1 %v1519_v3  ;;  %v5580_v2 = vld [vmem:[%s6706_s29] sm:$0xff] }
 0xc14   :  { %v1678_v4 = vpop.f32.mrb[18].mxu0 }
 0xc15   :  { %v5226_v6 = vpop.f32.mrb[19].mxu0  ;;  %v1682_v7 = vsel %vm315_vm3, %v1678_v4, -inf }
 0xc16   :  { %1683 = vmax.xlane.f32.xlu0 %v1682_v7 }
 0xc30   :  { %v1521_v8 = vpop.xlane.xlu1 %1520 }
 0xc31   :  { %v1522_v10 = vsub.f32 %v1515_v1, %v1521_v8 }
 0xc33   :  { %v1523_v13 = vmul.f32 1.442695, %v1522_v10 }
 0xc35   :  { %5556 = vpow2.f32 %v1523_v13 }
 0xc3f   :  { %v5557_v16 = vpop.eup %5556 }
 0xc40   :  { %v1525_v17 = vsel %vm315_vm3, %v5557_v16, 0.0 }
 0xc41   :  { %1526 = vadd.xlane.f32.xlu0 %v1525_v17 }
 0xca3   :  { %v1684_v18 = vpop.xlane.xlu0 %1683 }
 0xca4   :  { %v1685_v19 = vsub.f32 %v1678_v4, %v1684_v18 }
 0xca6   :  { %v1686_v20 = vmul.f32 1.442695, %v1685_v19 }
 0xca8   :  { %5558 = vpow2.f32 %v1686_v20 }
 0xcb2   :  { %v5559_v21 = vpop.eup %5558 }
 0xcb3   :  { %v1688_v22 = vsel %vm315_vm3, %v5559_v21, 0.0 }
 0xcb4   :  { %1689 = vadd.xlane.f32.xlu0 %v1688_v22 }
 0xcca   :  { %1694 = vrot.lane.b32.xlu0 %v1432_v15, %s5611_s27 }
 0xcce   :  { %v1527_v23 = vpop.xlane.xlu0 %1526  ;;  %2123 = vrot.lane.b32.xlu0 %v5924_v54, %s5611_s27 }
 0xccf   :  { %5560 = vrcp.f32 %v1527_v23 }
 0xcd9   :  { %v5561_v24 = vpop.eup %5560 }
 0xcda   :  { %v1529_v26 = vmul.f32 %v5561_v24, %v5557_v16 }
 0xcdc   :  { %5218 = vmatmul.mubr.msk.f32.vlgmr.msra.gmra.mrb[16].mxu1 %vm315_vm3, %v1529_v26 }
 0xcdd   :  { %5229 = vmatprep.mubr.msk.f32.mxu1 %vm5609_vm1, %v5610_v12 }
 0xd41   :  { %v1690_v30 = vpop.xlane.xlu0 %1689 }
 0xd42   :  { %5562 = vrcp.f32 %v1690_v30 }
 0xd45   :  { %v1695_v9 = vpop.permute.xlu0 %1694 }
 0xd46   :  { %5228 = vmatpush3.msra.mxu1 %v1695_v9 }
 0xd47   :  { %5349 = vmatprep.subr.bf16.mxu1 %v5608_v11 }
 0xd49   :  { %v2124_v44 = vpop.permute.xlu0 %2123 }
 0xd4c   :  { %v5563_v33 = vpop.eup %5562 }
 0xd4d   :  { %v1692_v34 = vmul.f32 %v5563_v33, %v5559_v21 }
 0xd4f   :  { %5230 = vmatmul.mubr.msk.f32.vlgmr.msra.gmra.mrb[18].mxu1 %vm315_vm3, %v1692_v34 }
 0xd50   :  { %5351 = vmatpush3.bf16.msra.mxu1 %v5984_v25  ;;  %5243 = vmatprep.mubr.msk.f32.mxu1 %vm5609_vm1, %v5610_v12 }
 0xd51   :  { %5253 = vmatprep.subr.mxu1 %v5610_v12 }
 0xdaf   :  { %v1599_v35 = vpop.f32.mrb[16].mxu1 }
 0xdb0   :  { %v5219_v36 = vpop.f32.mrb[17].mxu1  ;;  %5244 = vmatmul.mubr.msk.f32.vlgmr.msra.gmra.mrb[20].mxu1 %vm241_vm2, %v1599_v35 }
 0xdb1   :  { %5254 = vmatpush3.msra.mxu1 %v5959_v14  ;;  %5255 = vmatprep.mubr.msk.f32.mxu1 %vm5609_vm1, %v5610_v12 }
 0xdb2   :  { %5265 = vmatprep.subr.mxu1 %v5610_v12 }
 0xe22   :  { %v1766_v5 = vpop.f32.mrb[18].mxu1 }
 0xe23   :  { %v5231_v42 = vpop.f32.mrb[19].mxu1  ;;  %5237 = vmatmul.mubr.msk.f32.vlgmr.msra.gmra.mrb[20].mxu0 %vm241_vm2, %v1766_v5 }
 0xe24   :  { %5354 = vmatpush3.bf16.msra.mxu0 %v5353_v40  ;;  %5250 = vmatprep.mubr.msk.f32.mxu0 %vm5609_vm1, %v5610_v12 }
 0xe25   :  { %5355 = vmatprep.subr.bf16.mxu0 %v5608_v11 }
 0xe27   :  { %5251 = vmatmul.mubr.msk.f32.vlgmr.msra.gmra.mrb[22].mxu0 %vm241_vm2, %v5924_v54 }
 0xe28   :  { %5357 = vmatpush3.bf16.msra.mxu0 %v5356_v43  ;;  %5262 = vmatprep.mubr.msk.f32.mxu0 %vm5609_vm1, %v5610_v12 }
 0xe29   :  { %5358 = vmatprep.subr.bf16.mxu0 %v5608_v11 }
 0xe2b   :  { %5263 = vmatmul.mubr.msk.f32.vlgmr.msra.gmra.mrb[24].mxu0 %vm241_vm2, %v2124_v44 }
 0xe2c   :  { %5360 = vmatpush3.bf16.msra.mxu0 %v5347_v29  ;;  %5274 = vmatprep.mubr.msk.f32.mxu0 %vm5609_vm1, %v5610_v12 }
 0xe83   :  { %v1915_v45 = vpop.f32.mrb[20].mxu1 }
 0xe84   :  { %v5245_v46 = vpop.f32.mrb[21].mxu1 }
 0xef6   :  { %v1842_v47 = vpop.f32.mrb[20].mxu0 }
 0xef7   :  { %v1916_v48 = vadd.f32 %v1915_v45, %v1842_v47  ;;  %v5238_v49 = vpop.f32.mrb[21].mxu0  ;;  %v5581_v47 = vld [vmem:[%s6706_s29 + $0x8] sm:$0xff] }
 0xef9   :  { %v1919_v3 = vadd.f32 %v5580_v2, %v1916_v48  ;;  %v2475_v2 = vld [vmem:[%s6691_s16] sm:$0xff] }
 0xefa   :  { %v2030_v50 = vpop.f32.mrb[22].mxu0 }
 0xefb   :  { %v5252_v51 = vpop.f32.mrb[23].mxu0  ;;  %v2034_v52 = vsel %vm315_vm3, %v2030_v50, -inf  ;;  %v1920_v4 = vsel %vm76_vm0, %v1919_v3, 0.0 }
 0xefc   :  { %2035 = vmax.xlane.f32.xlu1 %v2034_v52 }
 0xefe   :  { %v2193_v53 = vpop.f32.mrb[24].mxu0 }
 0xeff   :  { %v5264_v54 = vpop.f32.mrb[25].mxu0  ;;  %v2197_v55 = vsel %vm315_vm3, %v2193_v53, -inf }
 0xf00   :  { %2198 = vmax.xlane.f32.xlu0 %v2197_v55 }
 0xf89   :  { %v2036_v56 = vpop.xlane.xlu1 %2035 }
 0xf8a   :  { %v2037_v57 = vsub.f32 %v2030_v50, %v2036_v56 }
 0xf8c   :  { %v2038_v58 = vmul.f32 1.442695, %v2037_v57 }
 0xf8d   :  { %v2199_v59 = vpop.xlane.xlu0 %2198 }
 0xf8e   :  { %5564 = vpow2.f32 %v2038_v58  ;;  %v2200_v60 = vsub.f32 %v2193_v53, %v2199_v59 }
 0xf90   :  { %v2201_v61 = vmul.f32 1.442695, %v2200_v60 }
 0xf92   :  { %5566 = vpow2.f32 %v2201_v61 }
 0xf98   :  { %v5565_v62 = vpop.eup %5564 }
 0xf99   :  { %v2040_v63 = vsel %vm315_vm3, %v5565_v62, 0.0 }
 0xf9a   :  { %2041 = vadd.xlane.f32.xlu1 %v2040_v63 }
 0xf9c   :  { %v5567_v0 = vpop.eup %5566 }
 0xf9d   :  { %v2203_v1 = vsel %vm315_vm3, %v5567_v0, 0.0 }
 0xf9e   :  { %2204 = vadd.xlane.f32.xlu1 %v2203_v1 }
 0xfaf   :  { %2209 = vrot.lane.b32.xlu1 %v5959_v14, %s5611_s27 }
 0xfd3   :  { %1921 = vadd.xlane.f32.xlu1 %v1920_v4  ;;  %v2476_v4 = vld [vmem:[%s6691_s16 + $0x8] sm:$0xff] }
0x1027   :  { %v2042_v6 = vpop.xlane.xlu1 %2041 }
0x1028   :  { %5568 = vrcp.f32 %v2042_v6 }
0x102b   :  { %v2205_v7 = vpop.xlane.xlu1 %2204 }
0x102c   :  { %5570 = vrcp.f32 %v2205_v7 }
0x102f   :  { %v2210_v13 = vpop.permute.xlu1 %2209 }
0x1032   :  { %v5569_v8 = vpop.eup %5568 }
0x1033   :  { %v2044_v10 = vmul.f32 %v5569_v8, %v5565_v62 }
0x1035   :  { %5256 = vmatmul.mubr.msk.f32.vlgmr.msra.gmra.mrb[22].mxu1 %vm315_vm3, %v2044_v10  ;;  %v2484_v10 = vld [vmem:[%s6691_s16 + $0x48] sm:$0xff] }
0x1036   :  { %v5571_v15 = vpop.eup %5570  ;;  %5266 = vmatpush3.msra.mxu1 %v2210_v13  ;;  %5267 = vmatprep.mubr.msk.f32.mxu1 %vm5609_vm1, %v5610_v12  ;;  %v2491_v13 = vld [vmem:[%s6691_s16 + $0x80] sm:$0xff] }
0x1037   :  { %v2207_v14 = vmul.f32 %v5571_v15, %v5567_v0  ;;  %5361 = vmatprep.subr.bf16.mxu1 %v5608_v11  ;;  %v2499_v15 = vld [vmem:[%s6691_s16 + $0xc0] sm:$0xff] }
0x1039   :  { %5268 = vmatmul.mubr.msk.f32.vlgmr.msra.gmra.mrb[24].mxu1 %vm315_vm3, %v2207_v14  ;;  %v5612_v14 = vmov 0  }
0x103a   :  { %5363 = vmatpush3.bf16.msra.mxu1 %v5984_v25  ;;  %5281 = vmatprep.mubr.msk.f32.mxu1 %vm5609_vm1, %v5610_v12 }
0x1060   :  { %v1922_v16 = vpop.xlane.xlu1 %1921 }
0x1061   :  { %v1923_v17 = vrot.slane %v1922_v16, 4 }
0x1063   :  { %v1924_v18 = vadd.f32 %v1923_v17, %v1922_v16  ;;  %v4657_v16 = vcombine.low %v2476_v4, %v2484_v10  ;;  %v4658_v17 = vcombine.high %v2476_v4, %v2484_v10  ;;  %v2497_v4 = vld [vmem:[%s6691_s16 + $0xb0] sm:$0xff] }
0x1065   :  { %v1925_v19 = vrot.slane %v1924_v18, 2  ;;  %2797 = vmatprep.subr.bf16.mxu1 %v4658_v17 }
0x1067   :  { %v1926_v20 = vadd.f32 %v1925_v19, %v1924_v18  ;;  %v4672_v18 = vcombine.high %v2491_v13, %v2499_v15  ;;  %v2492_v19 = vld [vmem:[%s6691_s16 + $0x88] sm:$0xff] }
0x1069   :  { %v1927_v21 = vrot.slane %v1926_v20, 1 }
0x106b   :  { %v1928_v22 = vadd.f32 %v1927_v21, %v1926_v20  ;;  %v2500_v20 = vld [vmem:[%s6691_s16 + $0xc8] sm:$0xff] }
0x106d   :  { %5376 = vpush %v1928_v22  ;;  %v4674_v22 = vcombine.high %v2492_v19, %v2500_v20 }
0x109e   :  { %s5377_s27 = spop %5376 }
0x109f   :  { %s1932_s5 = smul.f32 0.00390625, %s5377_s27 }
0x10a1   :  { %v1933_v23 = vstv %s1932_s5  ;;  %s5613_s5 = smov [#allocation3]  }
0x10a2   :  { %v1934_v24 = vsub.f32 %v1919_v3, %v1933_v23  ;;  %v2483_v3 = vld [vmem:[%s6691_s16 + $0x40] sm:$0xff]  ;;  %v4671_v23 = vcombine.low %v2491_v13, %v2499_v15 }
0x10a3   :  { %v4655_v7 = vcombine.low %v2475_v2, %v2483_v3  ;;  %v4656_v8 = vcombine.high %v2475_v2, %v2483_v3 }
0x10a4   :  { %v1935_v11 = vmul.f32 %v1934_v24, %v1934_v24 }
0x10a5   :  { %2754 = vmatprep.subr.bf16.mxu0 %v4656_v8  ;;  %v2506_v8 = vld [vmem:[%s6691_s16 + $0xf8] sm:$0xff] }
0x10a6   :  { %v1936_v26 = vsel %vm76_vm0, %v1935_v11, 0.0  ;;  %v2477_v11 = vld [vmem:[%s6691_s16 + $0x10] sm:$0xff] }
0x10a7   :  { %1937 = vadd.xlane.f32.xlu0 %v1936_v26  ;;  %v2485_v26 = vld [vmem:[%s6691_s16 + $0x50] sm:$0xff] }
0x1108   :  { %v2114_v27 = vpop.f32.mrb[22].mxu1 }
0x1109   :  { %v5257_v28 = vpop.f32.mrb[23].mxu1  ;;  %5282 = vmatmul.mubr.msk.f32.vlgmr.msra.gmra.mrb[26].mxu1 %vm241_vm2, %v2114_v27  ;;  %v2478_v27 = vld [vmem:[%s6691_s16 + $0x18] sm:$0xff] }
0x110a   :  { %2829 = vmatprep.mubr.bf16.mxu1 %v5612_v14  ;;  %2798 = vmatpush1.bf16.msra.mxu1 %v4657_v16  ;;  %v4660_v28 = vcombine.high %v2477_v11, %v2485_v26 }
0x110b   :  { %2799 = vmatprep.subr.bf16.mxu1 %v4674_v22  ;;  %v5411_v22 = vld [vmem:[%s6693_s18 + $0x80] sm:$0xff]  }
0x110c   :  { %v2281_v12 = vpop.f32.mrb[24].mxu1 }
0x110d   :  { %v5269_v29 = vpop.f32.mrb[25].mxu1  ;;  %5275 = vmatmul.mubr.msk.f32.vlgmr.msra.gmra.mrb[26].mxu0 %vm241_vm2, %v2281_v12  ;;  %v2486_v12 = vld [vmem:[%s6691_s16 + $0x58] sm:$0xff] }
0x110e   :  { %2786 = vmatprep.mubr.bf16.mxu0 %v5612_v14  ;;  %2755 = vmatpush1.bf16.msra.mxu0 %v4655_v7  ;;  %v4659_v29 = vcombine.low %v2477_v11, %v2485_v26  ;;  %v2498_v7 = vld [vmem:[%s6691_s16 + $0xb8] sm:$0xff]  ;;  %v5415_v11 = vld [vmem:[%s6693_s18 + $0x88] sm:$0xff]   ;;  %v5416_v26 = vld [vmem:[%s6693_s18 + $0x50] sm:$0xff]  }
0x110f   :  { %2756 = vmatprep.subr.bf16.mxu0 %v4672_v18  ;;  %v4686_v16 = vcombine.high %v2498_v7, %v2506_v8  ;;  %v4685_v18 = vcombine.low %v2498_v7, %v2506_v8 }
0x1112   :  { %2757 = vmatpush1.bf16.msra.mxu0 %v4671_v23  ;;  %v5412_v23 = vld [vmem:[%s6693_s18 + $0x48] sm:$0xff]  }
0x1113   :  { %2840 = vmatprep.subr.bf16.mxu0 %v4660_v28  ;;  %v5418_v28 = vld [vmem:[%s6693_s18 + $0x10] sm:$0xff]  }
0x1134   :  { %v1938_v30 = vpop.xlane.xlu0 %1937 }
0x1135   :  { %v1939_v9 = vrot.slane %v1938_v30, 4 }
0x1137   :  { %v1940_v31 = vadd.f32 %v1939_v9, %v1938_v30  ;;  %v4661_v30 = vcombine.low %v2478_v27, %v2486_v12  ;;  %v4662_v9 = vcombine.high %v2478_v27, %v2486_v12  ;;  %v5417_v27 = vld [vmem:[%s6693_s18 + $0xd0] sm:$0xff]  }
0x1138   :  { %v5419_v12 = vld [vmem:[%s6693_s18 + $0x90] sm:$0xff]  }
0x1139   :  { %v1941_v32 = vrot.slane %v1940_v31, 2 }
0x113b   :  { %v1942_v33 = vadd.f32 %v1941_v32, %v1940_v31 }
0x113d   :  { %v1943_v25 = vrot.slane %v1942_v33, 1 }
0x113f   :  { %v1944_v34 = vadd.f32 %v1943_v25, %v1942_v33 }
0x1141   :  { %5378 = vpush %v1944_v34 }
0x1172   :  { %s5379_s10 = spop %5378 }
0x1173   :  { %s1948_s8 = smul.f32 0.00390625, %s5379_s10  ;;  %s4590_s10 = sshll.u32 %s5613_s5, 4  ;;  %s4591_s10 = int_to_ptr.vmem [resolvable:$true] %s4590_s10 }
0x1174   :  { %p5589_p1 = scmp.lt.s32.totalorder %s4591_s10, %s4591_s10 }
0x1175   :  { %s1949_s11 = sadd.f32 1e-05, %s1948_s8  ;;  %s5584_s8 = scalar_lea.vmem %s4591_s10, 256 }
0x1176   :  { %p5585_p0 = scmp.ne.s32.totalorder %s4591_s10, %s5584_s8  ;;  %p5590_p2 = scmp.lt.s32.totalorder %s5584_s8, %s5584_s8 }
0x1177   :  { %v1950_v35 = vstv %s1949_s11 }
0x1178   :  { %5572 = vrsqrt.f32 %v1950_v35  ;;  %p5591_p3 = por %p5590_p2, %p5589_p1 }
0x117a   :  { %p5592_p4 = pnand %p5591_p3, %p5585_p0 }
0x1182   :  { %v5573_v36 = vpop.eup %5572 }
0x1183   :  { %5380 = vpush %v5573_v36  ;;  %v2493_v36 = vld [vmem:[%s6691_s16 + $0x90] sm:$0xff] }
0x11b4   :  { %s5381_s2 = spop %5380 }
0x11b5   :  { %v1953_v39 = vstv %s5381_s2 }
0x11b6   :  { %v1954_v40 = vmul.f32 %v1953_v39, %v1934_v24  ;;  %v4673_v24 = vcombine.low %v2492_v19, %v2500_v20  ;;  %v2501_v39 = vld [vmem:[%s6691_s16 + $0xd0] sm:$0xff]  ;;  %v5408_v19 = vld [vmem:[%s6693_s18 + $0x40] sm:$0xff]  }
0x11b7   :  { %v5409_v20 = vld [vmem:[%s6693_s18 + $0xc0] sm:$0xff]  }
0x11b8   :  { %v1955_v37 = vmul.f32 %v1954_v40, %v6044_v38  ;;  %2800 = vmatpush1.bf16.msra.mxu1 %v4673_v24  ;;  %v2494_v40 = vld [vmem:[%s6691_s16 + $0x98] sm:$0xff]  ;;  %v5414_v24 = vld [vmem:[%s6693_s18 + $0x8] sm:$0xff]  }
0x11b9   :  { %2883 = vmatprep.subr.bf16.mxu1 %v4662_v9  ;;  %v5422_v9 = vld [vmem:[%s6693_s18 + $0x18] sm:$0xff]  }
0x11ba   :  { %v1956_v5 = vadd.f32 %v1955_v37, %v6049_v41 }
0x11bc   :  { %1957 = vst.msk [vmem:[#allocation2] sm:$0xff] %vm76_vm0, %v1956_v5 }
0x11c3   :  { %v2472_v37 = vld [vmem:[#allocation2] sm:$0xff] }
0x11dc   :  { %v2429_v42 = vpop.f32.mrb[26].mxu1 }
0x11dd   :  { %v5283_v43 = vpop.f32.mrb[27].mxu1 }
0x11e0   :  { %v2356_v44 = vpop.f32.mrb[26].mxu0 }
0x11e1   :  { %v2430_v45 = vadd.f32 %v2429_v42, %v2356_v44  ;;  %v5276_v46 = vpop.f32.mrb[27].mxu0  ;;  %v4676_v42 = vcombine.high %v2493_v36, %v2501_v39  ;;  %v2479_v44 = vld [vmem:[%s6691_s16 + $0x20] sm:$0xff] }
0x11e2   :  { %v2480_v46 = vld [vmem:[%s6691_s16 + $0x28] sm:$0xff] }
0x11e3   :  { %v2433_v48 = vadd.f32 %v5581_v47, %v2430_v45  ;;  %v2487_v45 = vld [vmem:[%s6691_s16 + $0x60] sm:$0xff]  ;;  %v2488_v47 = vld [vmem:[%s6691_s16 + $0x68] sm:$0xff] }
0x11e5   :  { %v2434_v49 = vsel %vm76_vm0, %v2433_v48, 0.0 }
0x11e6   :  { %2435 = vadd.xlane.f32.xlu0 %v2434_v49 }
0x1273   :  { %v2436_v50 = vpop.xlane.xlu0 %2435 }
0x1274   :  { %v2437_v51 = vrot.slane %v2436_v50, 4 }
0x1276   :  { %v2438_v52 = vadd.f32 %v2437_v51, %v2436_v50  ;;  %v4664_v50 = vcombine.high %v2479_v44, %v2487_v45  ;;  %v4666_v51 = vcombine.high %v2480_v46, %v2488_v47 }
0x1278   :  { %v2439_v53 = vrot.slane %v2438_v52, 2 }
0x127a   :  { %v2440_v54 = vadd.f32 %v2439_v53, %v2438_v52  ;;  %v2495_v52 = vld [vmem:[%s6691_s16 + $0xa0] sm:$0xff] }
0x127b   :  { %v2503_v53 = vld [vmem:[%s6691_s16 + $0xe0] sm:$0xff] }
0x127c   :  { %v2441_v55 = vrot.slane %v2440_v54, 1 }
0x127e   :  { %v2442_v56 = vadd.f32 %v2441_v55, %v2440_v54  ;;  %v2496_v54 = vld [vmem:[%s6691_s16 + $0xa8] sm:$0xff] }
0x127f   :  { %v2504_v55 = vld [vmem:[%s6691_s16 + $0xe8] sm:$0xff] }
0x1280   :  { %5382 = vpush %v2442_v56  ;;  %v4663_v56 = vcombine.low %v2479_v44, %v2487_v45  ;;  %v5438_v44 = vld [vmem:[%s6693_s18 + $0x38] sm:$0xff]  }
0x1281   :  { %v5439_v45 = vld [vmem:[%s6693_s18 + $0xb8] sm:$0xff]  }
0x12b1   :  { %s5383_s13 = spop %5382 }
0x12b2   :  { %s2446_s9 = smul.f32 0.00390625, %s5383_s13 }
0x12b4   :  { %v2447_v57 = vstv %s2446_s9 }
0x12b5   :  { %v2448_v58 = vsub.f32 %v2433_v48, %v2447_v57  ;;  %v4675_v48 = vcombine.low %v2493_v36, %v2501_v39  ;;  %v4665_v57 = vcombine.low %v2480_v46, %v2488_v47  ;;  %v5429_v36 = vld [vmem:[%s6693_s18 + $0xe8] sm:$0xff]   ;;  %v5440_v46 = vld [vmem:[%s6693_s18 + $0x140] sm:$0xff]  }
0x12b6   :  { %v5430_v39 = vld [vmem:[%s6693_s18 + $0x28] sm:$0xff]   ;;  %v5441_v47 = vld [vmem:[%s6693_s18 + $0x1c0] sm:$0xff]  }
0x12b7   :  { %v2449_v59 = vmul.f32 %v2448_v58, %v2448_v58 }
0x12b9   :  { %v2450_v60 = vsel %vm76_vm0, %v2449_v59, 0.0  ;;  %v4682_v59 = vcombine.high %v2496_v54, %v2504_v55 }
0x12ba   :  { %2451 = vadd.xlane.f32.xlu0 %v2450_v60  ;;  %v2481_v60 = vld [vmem:[%s6691_s16 + $0x30] sm:$0xff] }
0x1347   :  { %v2452_v61 = vpop.xlane.xlu0 %2451 }
0x1348   :  { %v2453_v62 = vrot.slane %v2452_v61, 4 }
0x134a   :  { %v2454_v63 = vadd.f32 %v2453_v62, %v2452_v61  ;;  %v2489_v61 = vld [vmem:[%s6691_s16 + $0x70] sm:$0xff]  ;;  %v2482_v62 = vld [vmem:[%s6691_s16 + $0x38] sm:$0xff] }
0x134b   :  { %v4668_v2 = vcombine.high %v2481_v60, %v2489_v61  ;;  %v4667_v10 = vcombine.low %v2481_v60, %v2489_v61 }
0x134c   :  { %v2455_v0 = vrot.slane %v2454_v63, 2 }
0x134e   :  { %v2456_v1 = vadd.f32 %v2455_v0, %v2454_v63  ;;  %v2490_v63 = vld [vmem:[%s6691_s16 + $0x78] sm:$0xff]  ;;  %v4679_v0 = vcombine.low %v2495_v52, %v2503_v53 }
0x134f   :  { %v4670_v3 = vcombine.high %v2482_v62, %v2490_v63  ;;  %v4669_v13 = vcombine.low %v2482_v62, %v2490_v63 }
0x1350   :  { %v2457_v6 = vrot.slane %v2456_v1, 1 }
0x1352   :  { %v2458_v21 = vadd.f32 %v2457_v6, %v2456_v1  ;;  %v4681_v1 = vcombine.low %v2496_v54, %v2504_v55  ;;  %v2505_v6 = vld [vmem:[%s6691_s16 + $0xf0] sm:$0xff]  ;;  %v2507_v55 = vld [vmem:[%s6692_s17] sm:$0xff] }
0x1353   :  { %v4684_v15 = vcombine.high %v2497_v4, %v2505_v6  ;;  %v4683_v17 = vcombine.low %v2497_v4, %v2505_v6 }
0x1354   :  { %5384 = vpush %v2458_v21  ;;  %v5410_v21 = vld [vmem:[%s6693_s18] sm:$0xff]  }
0x1385   :  { %s5385_s29 = spop %5384 }
0x1386   :  { %s2462_s30 = smul.f32 0.00390625, %s5385_s29 }
0x1388   :  { %s2463_s0 = sadd.f32 1e-05, %s2462_s30 }
0x138a   :  { %v2464_v31 = vstv %s2463_s0 }
0x138b   :  { %5574 = vrsqrt.f32 %v2464_v31  ;;  %v5423_v31 = vld [vmem:[%s6693_s18 + $0x98] sm:$0xff]  }
0x1395   :  { %v5575_v32 = vpop.eup %5574 }
0x1396   :  { %5386 = vpush %v5575_v32  ;;  %v5424_v32 = vld [vmem:[%s6693_s18 + $0x60] sm:$0xff]  }
0x13c7   :  { %s5387_s1 = spop %5386 }
0x13c8   :  { %v2467_v33 = vstv %s5387_s1 }
0x13c9   :  { %v2468_v25 = vmul.f32 %v2467_v33, %v2448_v58  ;;  %v4680_v58 = vcombine.high %v2495_v52, %v2503_v53  ;;  %v5425_v33 = vld [vmem:[%s6693_s18 + $0xe0] sm:$0xff]  }
0x13cb   :  { %v2469_v34 = vmul.f32 %v2468_v25, %v6044_v38  ;;  %v2502_v38 = vld [vmem:[%s6691_s16 + $0xd8] sm:$0xff]  ;;  %v5426_v25 = vld [vmem:[%s6693_s18 + $0x20] sm:$0xff]  }
0x13cc   :  { %v4678_v43 = vcombine.high %v2494_v40, %v2502_v38  ;;  %v4677_v49 = vcombine.low %v2494_v40, %v2502_v38  ;;  %v5431_v40 = vld [vmem:[%s6693_s18 + $0xa8] sm:$0xff]   ;;  %v5432_v38 = vld [vmem:[%s6693_s18 + $0x70] sm:$0xff]  }
0x13cd   :  { %v2470_v35 = vadd.f32 %v2469_v34, %v6049_v41  ;;  %v5427_v34 = vld [vmem:[%s6693_s18 + $0xa0] sm:$0xff]  }
0x13cf   :  { %2471 = vst.msk [vmem:[#allocation2 + $0x8] sm:$0xff] %vm76_vm0, %v2470_v35  ;;  %v5428_v35 = vld [vmem:[%s6693_s18 + $0x68] sm:$0xff]  }
0x13d6   :  { %v2473_v41 = vld [vmem:[#allocation2 + $0x8] sm:$0xff] }
0x13d7   :  { %v6112_v5 = vpack.c.bf16 %v2473_v41, %v2472_v37  ;;  %v5433_v37 = vld [vmem:[%s6693_s18 + $0xf0] sm:$0xff]  }
0x13d8   :  { %v5434_v41 = vld [vmem:[%s6693_s18 + $0x30] sm:$0xff]  }
0x13d9   :  { %4687 = vmatmul.mubr.msk.bf16.vlgmr.msra.gmra.mrb[28].mxu0 %vm76_vm0, %v6112_v5  ;;  %4688 = vmatmul.mubr.msk.bf16.vlgmr.msra.gmra.mrb[28].mxu1 %vm76_vm0, %v6112_v5 }
0x13da   :  { %2841 = vmatpush1.bf16.msra.mxu0 %v4659_v29  ;;  %2884 = vmatpush1.bf16.msra.mxu1 %v4661_v30  ;;  %v5420_v29 = vld [vmem:[%s6693_s18 + $0x58] sm:$0xff]  }
0x13db   :  { %2842 = vmatprep.subr.bf16.mxu0 %v4676_v42  ;;  %2885 = vmatprep.subr.bf16.mxu1 %v4678_v43  ;;  %v5421_v30 = vld [vmem:[%s6693_s18 + $0xd8] sm:$0xff]  }
0x13dc   :  { %2872 = vmatprep.mubr.bf16.mxu0 %v5612_v14  ;;  %2915 = vmatprep.mubr.bf16.mxu1 %v5612_v14  ;;  %v5436_v42 = vld [vmem:[%s6693_s18 + $0x78] sm:$0xff]  }
0x13dd   :  { %v5437_v43 = vld [vmem:[%s6693_s18 + $0xf8] sm:$0xff]  }
0x13de   :  { %2843 = vmatpush1.bf16.msra.mxu0 %v4675_v48  ;;  %2886 = vmatpush1.bf16.msra.mxu1 %v4677_v49  ;;  %v2511_v48 = vlaneseq }
0x13df   :  { %2926 = vmatprep.subr.bf16.mxu0 %v4664_v50  ;;  %2969 = vmatprep.subr.bf16.mxu1 %v4666_v51  ;;  %v6292_v51 = vld [vmem:[%s6692_s17 + $0x8] sm:$0xff] }
0x13e0   :  { %v6286_v49 = vshrl.u32 %v2511_v48, 7 }
0x13e1   :  { %4689 = vmatmul.mubr.msk.bf16.vlgmr.msra.gmra.mrb[32].mxu0 %vm76_vm0, %v6112_v5  ;;  %4690 = vmatmul.mubr.msk.bf16.vlgmr.msra.gmra.mrb[32].mxu1 %vm76_vm0, %v6112_v5 }
0x13e2   :  { %2927 = vmatpush1.bf16.msra.mxu0 %v4663_v56  ;;  %2970 = vmatpush1.bf16.msra.mxu1 %v4665_v57  ;;  %v2537_v50 = vsub.s32 6, %v6286_v49  ;;  %v2513_v53 = vsub.s32 0, %v6286_v49  ;;  %v2521_v54 = vsub.s32 2, %v6286_v49  ;;  %v2517_v56 = vsub.s32 1, %v6286_v49 }
0x13e3   :  { %2928 = vmatprep.subr.bf16.mxu0 %v4680_v58  ;;  %2971 = vmatprep.subr.bf16.mxu1 %v4682_v59  ;;  %v2525_v57 = vsub.s32 3, %v6286_v49  ;;  %v2529_v62 = vsub.s32 4, %v6286_v49 }
0x13e4   :  { %2958 = vmatprep.mubr.bf16.mxu0 %v5612_v14  ;;  %3001 = vmatprep.mubr.bf16.mxu1 %v5612_v14  ;;  %v6295_v52 = vrot.slane %v6292_v51, %v2537_v50  ;;  %v2514_v58 = vrot.slane %v2507_v55, %v2513_v53  ;;  %v2522_v59 = vrot.slane %v2507_v55, %v2521_v54 }
0x13e5   :  { %v2518_v60 = vrot.slane %v2507_v55, %v2517_v56  ;;  %v2526_v61 = vrot.slane %v2507_v55, %v2525_v57  ;;  %v2554_v48 = vrot.slane %v6292_v51, %v2521_v54  ;;  %v5447_v54 = vld [vmem:[%s6693_s18 + $0x188] sm:$0xff]  }
0x13e6   :  { %2929 = vmatpush1.bf16.msra.mxu0 %v4679_v0  ;;  %2972 = vmatpush1.bf16.msra.mxu1 %v4681_v1  ;;  %v2533_v1 = vsub.s32 5, %v6286_v49 }
0x13e7   :  { %3012 = vmatprep.subr.bf16.mxu0 %v4668_v2  ;;  %3055 = vmatprep.subr.bf16.mxu1 %v4670_v3  ;;  %v2541_v2 = vsub.s32 7, %v6286_v49 }
0x13e9   :  { %4691 = vmatmul.mubr.msk.bf16.vlgmr.msra.gmra.mrb[36].mxu0 %vm76_vm0, %v6112_v5  ;;  %4692 = vmatmul.mubr.msk.bf16.vlgmr.msra.gmra.mrb[36].mxu1 %vm76_vm0, %v6112_v5 }
0x13ea   :  { %3013 = vmatpush1.bf16.msra.mxu0 %v4667_v10  ;;  %3056 = vmatpush1.bf16.msra.mxu1 %v4669_v13 }
0x13eb   :  { %3014 = vmatprep.subr.bf16.mxu0 %v4684_v15  ;;  %3057 = vmatprep.subr.bf16.mxu1 %v4686_v16 }
0x13ec   :  { %3044 = vmatprep.mubr.bf16.mxu0 %v5612_v14  ;;  %3087 = vmatprep.mubr.bf16.mxu1 %v5612_v14  ;;  %v5413_v14 = vld [vmem:[%s6693_s18 + $0xc8] sm:$0xff]  }
0x13ee   :  { %3015 = vmatpush1.bf16.msra.mxu0 %v4683_v17  ;;  %3058 = vmatpush1.bf16.msra.mxu1 %v4685_v18 }
0x13ef   :  { %4912 = vmatprep.subr.bf16.mxu0 %v5408_v19  ;;  %4934 = vmatprep.subr.bf16.mxu1 %v5409_v20  ;;  %v2530_v20 = vrot.slane %v2507_v55, %v2529_v62 }
0x13f1   :  { %4693 = vmatmul.mubr.msk.bf16.vlgmr.msra.gmra.mrb[40].mxu0 %vm76_vm0, %v6112_v5  ;;  %4694 = vmatmul.mubr.msk.bf16.vlgmr.msra.gmra.mrb[40].mxu1 %vm76_vm0, %v6112_v5  ;;  %v5435_v5 = vld [vmem:[%s6693_s18 + $0xb0] sm:$0xff]  }
0x13f2   :  { %4913 = vmatpush3.bf16.msra.mxu0 %v5410_v21  ;;  %4935 = vmatpush3.bf16.msra.mxu1 %v5411_v22  ;;  %v2538_v21 = vrot.slane %v2507_v55, %v2537_v50 }
0x13f3   :  { %4914 = vmatprep.subr.bf16.mxu0 %v5412_v23  ;;  %4936 = vmatprep.subr.bf16.mxu1 %v5413_v14  ;;  %v2534_v14 = vrot.slane %v2507_v55, %v2533_v1 }
0x13f6   :  { %4915 = vmatpush3.bf16.msra.mxu0 %v5414_v24  ;;  %4937 = vmatpush3.bf16.msra.mxu1 %v5415_v11  ;;  %v2542_v24 = vrot.slane %v2507_v55, %v2541_v2 }
0x13f7   :  { %4916 = vmatprep.subr.bf16.mxu0 %v5416_v26  ;;  %4938 = vmatprep.subr.bf16.mxu1 %v5417_v27 }
0x13fa   :  { %4917 = vmatpush3.bf16.msra.mxu0 %v5418_v28  ;;  %4939 = vmatpush3.bf16.msra.mxu1 %v5419_v12 }
0x13fb   :  { %4918 = vmatprep.subr.bf16.mxu0 %v5420_v29  ;;  %4940 = vmatprep.subr.bf16.mxu1 %v5421_v30 }
0x13fe   :  { %4919 = vmatpush3.bf16.msra.mxu0 %v5422_v9  ;;  %4941 = vmatpush3.bf16.msra.mxu1 %v5423_v31 }
0x13ff   :  { %4920 = vmatprep.subr.bf16.mxu0 %v5424_v32  ;;  %4942 = vmatprep.subr.bf16.mxu1 %v5425_v33 }
0x1402   :  { %4921 = vmatpush3.bf16.msra.mxu0 %v5426_v25  ;;  %4943 = vmatpush3.bf16.msra.mxu1 %v5427_v34 }
0x1403   :  { %4922 = vmatprep.subr.bf16.mxu0 %v5428_v35  ;;  %4944 = vmatprep.subr.bf16.mxu1 %v5429_v36  ;;  %v5442_v36 = vld [vmem:[%s6693_s18 + $0x100] sm:$0xff]  }
0x1406   :  { %4923 = vmatpush3.bf16.msra.mxu0 %v5430_v39  ;;  %4945 = vmatpush3.bf16.msra.mxu1 %v5431_v40  ;;  %v5443_v39 = vld [vmem:[%s6693_s18 + $0x180] sm:$0xff]  }
0x1407   :  { %4924 = vmatprep.subr.bf16.mxu0 %v5432_v38  ;;  %4946 = vmatprep.subr.bf16.mxu1 %v5433_v37 }
0x140a   :  { %4925 = vmatpush3.bf16.msra.mxu0 %v5434_v41  ;;  %4947 = vmatpush3.bf16.msra.mxu1 %v5435_v5  ;;  %v5444_v5 = vld [vmem:[%s6693_s18 + $0x148] sm:$0xff]  }
0x140b   :  { %4926 = vmatprep.subr.bf16.mxu0 %v5436_v42  ;;  %4948 = vmatprep.subr.bf16.mxu1 %v5437_v43  ;;  %v5445_v42 = vld [vmem:[%s6693_s18 + $0x1c8] sm:$0xff]   ;;  %v2546_v43 = vrot.slane %v6292_v51, %v2513_v53 }
0x140e   :  { %4927 = vmatpush3.bf16.msra.mxu0 %v5438_v44  ;;  %4949 = vmatpush3.bf16.msra.mxu1 %v5439_v45 }
0x140f   :  { %4956 = vmatprep.subr.bf16.mxu0 %v5440_v46  ;;  %4978 = vmatprep.subr.bf16.mxu1 %v5441_v47 }
0x14ac   :  { %v2788_v63 = vpop.f32.mrb[28].mxu0  ;;  %v2831_v0 = vpop.f32.mrb[28].mxu1 }
0x14ad   :  { %v2789_v3 = vadd.f32 %v2788_v63, %v2514_v58  ;;  %v2832_v4 = vadd.f32 %v2831_v0, %v2522_v59  ;;  %v2790_v6 = vpop.f32.mrb[29].mxu0  ;;  %v2833_v7 = vpop.f32.mrb[29].mxu1  ;;  %v5446_v63 = vld [vmem:[%s6693_s18 + $0x108] sm:$0xff]   ;;  %v2558_v0 = vrot.slane %v6292_v51, %v2525_v57 }
0x14ae   :  { %v2791_v8 = vadd.f32 %v2790_v6, %v2518_v60  ;;  %v2834_v10 = vadd.f32 %v2833_v7, %v2526_v61  ;;  %v2792_v13 = vpop.f32.mrb[30].mxu0  ;;  %v2835_v15 = vpop.f32.mrb[30].mxu1  ;;  %v5448_v7 = vld [vmem:[%s6693_s18 + $0x150] sm:$0xff]  }
0x14af   :  { %v2793_v16 = vadd.f32 %v2792_v13, %v2514_v58  ;;  %v2836_v17 = vadd.f32 %v2835_v15, %v2522_v59  ;;  %v2794_v18 = vpop.f32.mrb[31].mxu0  ;;  %v2837_v19 = vpop.f32.mrb[31].mxu1  ;;  %v3098_v11 = vmax.f32 %v2789_v3, 0.0  ;;  %v3100_v26 = vmax.f32 %v2832_v4, 0.0 }
0x14b0   :  { %v2795_v22 = vadd.f32 %v2794_v18, %v2518_v60  ;;  %v2838_v23 = vadd.f32 %v2837_v19, %v2526_v61  ;;  %v3099_v12 = vmax.f32 %v2791_v8, 0.0  ;;  %v3101_v29 = vmax.f32 %v2834_v10, 0.0  ;;  %v5449_v8 = vld [vmem:[%s6693_s18 + $0x1d0] sm:$0xff]  }
0x14b1   :  { %v3114_v27 = vmax.f32 %v2793_v16, 0.0  ;;  %v3116_v28 = vmax.f32 %v2836_v17, 0.0  ;;  %v2550_v60 = vrot.slane %v6292_v51, %v2517_v56 }
0x14b2   :  { %v3115_v30 = vmax.f32 %v2795_v22, 0.0  ;;  %v3117_v9 = vmax.f32 %v2838_v23, 0.0  ;;  %v5450_v22 = vld [vmem:[%s6693_s18 + $0x110] sm:$0xff]  }
0x14b3   :  { %v3130_v31 = vpack.c.bf16 %v3114_v27, %v3098_v11  ;;  %v3132_v32 = vpack.c.bf16 %v3116_v28, %v3100_v26  ;;  %v5451_v23 = vld [vmem:[%s6693_s18 + $0x190] sm:$0xff]   ;;  %v5452_v27 = vld [vmem:[%s6693_s18 + $0x158] sm:$0xff]  }
0x14b4   :  { %v3131_v33 = vpack.c.bf16 %v3115_v30, %v3099_v12  ;;  %v3133_v25 = vpack.c.bf16 %v3117_v9, %v3101_v29  ;;  %v2874_v34 = vpop.f32.mrb[32].mxu0  ;;  %v2917_v35 = vpop.f32.mrb[32].mxu1  ;;  %v5453_v28 = vld [vmem:[%s6693_s18 + $0x1d8] sm:$0xff]  }
0x14b5   :  { %v2875_v40 = vadd.f32 %v2874_v34, %v2530_v20  ;;  %v2918_v38 = vadd.f32 %v2917_v35, %v2538_v21  ;;  %v2876_v37 = vpop.f32.mrb[33].mxu0  ;;  %v2919_v41 = vpop.f32.mrb[33].mxu1  ;;  %v2562_v34 = vrot.slane %v6292_v51, %v2529_v62  ;;  %v2566_v35 = vrot.slane %v6292_v51, %v2533_v1 }
0x14b6   :  { %v2877_v44 = vadd.f32 %v2876_v37, %v2534_v14  ;;  %v2920_v45 = vadd.f32 %v2919_v41, %v2542_v24  ;;  %v2878_v46 = vpop.f32.mrb[34].mxu0  ;;  %v2921_v47 = vpop.f32.mrb[34].mxu1  ;;  %4209 = vmatprep.mubr.bf16.mxu0 %v3131_v33  ;;  %4250 = vmatprep.mubr.bf16.mxu1 %v3133_v25  ;;  %v2574_v62 = vrot.slane %v6292_v51, %v2541_v2 }
0x14b7   :  { %v2879_v50 = vadd.f32 %v2878_v46, %v2530_v20  ;;  %v2922_v55 = vadd.f32 %v2921_v47, %v2538_v21  ;;  %v2880_v58 = vpop.f32.mrb[35].mxu0  ;;  %v2923_v59 = vpop.f32.mrb[35].mxu1  ;;  %4210 = vmatmul.mubr.bf16.vlgmr.msra.gmra.mrb[44].mxu0 %v3130_v31  ;;  %4251 = vmatmul.mubr.bf16.vlgmr.msra.gmra.mrb[44].mxu1 %v3132_v32  ;;  %v3102_v3 = vmax.f32 %v2875_v40, 0.0  ;;  %v3104_v4 = vmax.f32 %v2918_v38, 0.0  ;;  %v5454_v40 = vld [vmem:[%s6693_s18 + $0x118] sm:$0xff]  }
0x14b8   :  { %v2881_v61 = vadd.f32 %v2880_v58, %v2534_v14  ;;  %v2924_v53 = vadd.f32 %v2923_v59, %v2542_v24  ;;  %4957 = vmatpush3.bf16.msra.mxu0 %v5442_v36  ;;  %4979 = vmatpush3.bf16.msra.mxu1 %v5443_v39  ;;  %v3103_v10 = vmax.f32 %v2877_v44, 0.0  ;;  %v3105_v13 = vmax.f32 %v2920_v45, 0.0  ;;  %v5455_v38 = vld [vmem:[%s6693_s18 + $0x198] sm:$0xff]   ;;  %v5458_v58 = vld [vmem:[%s6693_s18 + $0x120] sm:$0xff]  }
0x14b9   :  { %v3118_v6 = vmax.f32 %v2879_v50, 0.0  ;;  %v3120_v56 = vmax.f32 %v2922_v55, 0.0  ;;  %4958 = vmatprep.subr.bf16.mxu0 %v5444_v5  ;;  %4980 = vmatprep.subr.bf16.mxu1 %v5445_v42  ;;  %v5456_v42 = vld [vmem:[%s6693_s18 + $0x160] sm:$0xff]  }
0x14ba   :  { %v3119_v15 = vmax.f32 %v2881_v61, 0.0  ;;  %v3121_v16 = vmax.f32 %v2924_v53, 0.0  ;;  %v5459_v59 = vld [vmem:[%s6693_s18 + $0x1a0] sm:$0xff]  }
0x14bb   :  { %v6349_v17 = vpack.c.bf16 %v3118_v6, %v3102_v3  ;;  %v6351_v57 = vpack.c.bf16 %v3120_v56, %v3104_v4 }
0x14bc   :  { %v3135_v18 = vpack.c.bf16 %v3119_v15, %v3103_v10  ;;  %v3137_v19 = vpack.c.bf16 %v3121_v16, %v3105_v13  ;;  %4959 = vmatpush3.bf16.msra.mxu0 %v5446_v63  ;;  %4981 = vmatpush3.bf16.msra.mxu1 %v5447_v54  ;;  %v2960_v20 = vpop.f32.mrb[36].mxu0  ;;  %v3003_v21 = vpop.f32.mrb[36].mxu1  ;;  %v5460_v54 = vld [vmem:[%s6693_s18 + $0x168] sm:$0xff]  }
0x14bd   :  { %v2961_v14 = vadd.f32 %v2960_v20, %v2546_v43  ;;  %v3004_v24 = vadd.f32 %v3003_v21, %v2554_v48  ;;  %v2962_v11 = vpop.f32.mrb[37].mxu0  ;;  %v3005_v26 = vpop.f32.mrb[37].mxu1  ;;  %4960 = vmatprep.subr.bf16.mxu0 %v5448_v7  ;;  %4982 = vmatprep.subr.bf16.mxu1 %v5449_v8 }
0x14be   :  { %v2963_v12 = vadd.f32 %v2962_v11, %v2550_v60  ;;  %v3006_v29 = vadd.f32 %v3005_v26, %v2558_v0  ;;  %v2964_v30 = vpop.f32.mrb[38].mxu0  ;;  %v3007_v9 = vpop.f32.mrb[38].mxu1  ;;  %4291 = vmatprep.mubr.bf16.mxu0 %v3135_v18  ;;  %4332 = vmatprep.mubr.bf16.mxu1 %v3137_v19  ;;  %v5462_v18 = vld [vmem:[%s6693_s18 + $0x128] sm:$0xff]  }
0x14bf   :  { %v2965_v31 = vadd.f32 %v2964_v30, %v2546_v43  ;;  %v3008_v32 = vadd.f32 %v3007_v9, %v2554_v48  ;;  %v2966_v33 = vpop.f32.mrb[39].mxu0  ;;  %v3009_v25 = vpop.f32.mrb[39].mxu1  ;;  %v3106_v37 = vmax.f32 %v2961_v14, 0.0  ;;  %v3108_v41 = vmax.f32 %v3004_v24, 0.0  ;;  %v5457_v43 = vld [vmem:[%s6693_s18 + $0x1e0] sm:$0xff]   ;;  %v5463_v19 = vld [vmem:[%s6693_s18 + $0x1a8] sm:$0xff]  }
0x14c0   :  { %v2967_v36 = vadd.f32 %v2966_v33, %v2550_v60  ;;  %v3010_v39 = vadd.f32 %v3009_v25, %v2558_v0  ;;  %4961 = vmatpush3.bf16.msra.mxu0 %v5450_v22  ;;  %4983 = vmatpush3.bf16.msra.mxu1 %v5451_v23  ;;  %v3107_v44 = vmax.f32 %v2963_v12, 0.0  ;;  %v3109_v45 = vmax.f32 %v3006_v29, 0.0  ;;  %v5461_v0 = vld [vmem:[%s6693_s18 + $0x1e8] sm:$0xff]   ;;  %v5465_v14 = vld [vmem:[%s6693_s18 + $0x1f0] sm:$0xff]   ;;  %v5469_v33 = vld [vmem:[%s6693_s18 + $0x1f8] sm:$0xff]  }
0x14c1   :  { %v3122_v5 = vmax.f32 %v2965_v31, 0.0  ;;  %v3124_v1 = vmax.f32 %v3008_v32, 0.0  ;;  %4962 = vmatprep.subr.bf16.mxu0 %v5452_v27  ;;  %4984 = vmatprep.subr.bf16.mxu1 %v5453_v28  ;;  %v5466_v9 = vld [vmem:[%s6693_s18 + $0x130] sm:$0xff]   ;;  %v5468_v32 = vld [vmem:[%s6693_s18 + $0x178] sm:$0xff]  }
0x14c2   :  { %v3123_v46 = vmax.f32 %v2967_v36, 0.0  ;;  %v3125_v49 = vmax.f32 %v3010_v39, 0.0  ;;  %v5467_v31 = vld [vmem:[%s6693_s18 + $0x1b0] sm:$0xff]   ;;  %v5470_v25 = vld [vmem:[%s6693_s18 + $0x138] sm:$0xff]   ;;  %v5473_v36 = vld [vmem:[%s6693_s18 + $0x2c0] sm:$0xff]  }
0x14c3   :  { %v6386_v47 = vpack.c.bf16 %v3122_v5, %v3106_v37  ;;  %v6388_v51 = vpack.c.bf16 %v3124_v1, %v3108_v41  ;;  %v5474_v39 = vld [vmem:[%s6693_s18 + $0x200] sm:$0xff]   ;;  %v5478_v37 = vld [vmem:[%s6693_s18 + $0x208] sm:$0xff]   ;;  %v5482_v5 = vld [vmem:[%s6693_s18 + $0x210] sm:$0xff]  }
0x14c4   :  { %v6390_v2 = vpack.c.bf16 %v3123_v46, %v3107_v44  ;;  %v6392_v48 = vpack.c.bf16 %v3125_v49, %v3109_v45  ;;  %4963 = vmatpush3.bf16.msra.mxu0 %v5454_v40  ;;  %4985 = vmatpush3.bf16.msra.mxu1 %v5455_v38  ;;  %v3046_v50 = vpop.f32.mrb[40].mxu0  ;;  %v3089_v55 = vpop.f32.mrb[40].mxu1  ;;  %v5475_v40 = vld [vmem:[%s6693_s18 + $0x280] sm:$0xff]   ;;  %v5476_v38 = vld [vmem:[%s6693_s18 + $0x248] sm:$0xff]   ;;  %v5483_v1 = vld [vmem:[%s6693_s18 + $0x290] sm:$0xff]  }
0x14c5   :  { %v3047_v60 = vadd.f32 %v3046_v50, %v2562_v34  ;;  %v3090_v61 = vadd.f32 %v3089_v55, %v6295_v52  ;;  %v3048_v53 = vpop.f32.mrb[41].mxu0  ;;  %v3091_v63 = vpop.f32.mrb[41].mxu1  ;;  %4964 = vmatprep.subr.bf16.mxu0 %v5456_v42  ;;  %4986 = vmatprep.subr.bf16.mxu1 %v5457_v43  ;;  %v5479_v41 = vld [vmem:[%s6693_s18 + $0x288] sm:$0xff]   ;;  %v5484_v42 = vld [vmem:[%s6693_s18 + $0x258] sm:$0xff]   ;;  %v5488_v46 = vld [vmem:[%s6693_s18 + $0x260] sm:$0xff]  }
0x14c6   :  { %v3049_v3 = vadd.f32 %v3048_v53, %v2566_v35  ;;  %v3092_v4 = vadd.f32 %v3091_v63, %v2574_v62  ;;  %v3050_v6 = vpop.f32.mrb[42].mxu0  ;;  %v3093_v56 = vpop.f32.mrb[42].mxu1  ;;  %v5485_v43 = vld [vmem:[%s6693_s18 + $0x2d8] sm:$0xff]   ;;  %v5489_v49 = vld [vmem:[%s6693_s18 + $0x2e0] sm:$0xff]   ;;  %v5492_v50 = vld [vmem:[%s6693_s18 + $0x268] sm:$0xff]  }
0x14c7   :  { %v3051_v7 = vadd.f32 %v3050_v6, %v2562_v34  ;;  %v3094_v8 = vadd.f32 %v3093_v56, %v6295_v52  ;;  %v3052_v10 = vpop.f32.mrb[43].mxu0  ;;  %v3095_v13 = vpop.f32.mrb[43].mxu1  ;;  %v3110_v20 = vmax.f32 %v3047_v60, 0.0  ;;  %v3112_v21 = vmax.f32 %v3090_v61, 0.0  ;;  %v5464_v52 = vld [vmem:[%s6693_s18 + $0x170] sm:$0xff]   ;;  %v5471_v34 = vld [vmem:[%s6693_s18 + $0x1b8] sm:$0xff]  }
0x14c8   :  { %v3053_v15 = vadd.f32 %v3052_v10, %v2566_v35  ;;  %v3096_v16 = vadd.f32 %v3095_v13, %v2574_v62  ;;  %4965 = vmatpush3.bf16.msra.mxu0 %v5458_v58  ;;  %4987 = vmatpush3.bf16.msra.mxu1 %v5459_v59  ;;  %v3111_v24 = vmax.f32 %v3049_v3, 0.0  ;;  %v3113_v11 = vmax.f32 %v3092_v4, 0.0  ;;  %v5472_v35 = vld [vmem:[%s6693_s18 + $0x240] sm:$0xff]   ;;  %v5477_v62 = vld [vmem:[%s6693_s18 + $0x2c8] sm:$0xff]   ;;  %v5486_v44 = vld [vmem:[%s6693_s18 + $0x218] sm:$0xff]  }
0x14c9   :  { %v3126_v22 = vmax.f32 %v3051_v7, 0.0  ;;  %v3128_v23 = vmax.f32 %v3094_v8, 0.0  ;;  %4966 = vmatprep.subr.bf16.mxu0 %v5460_v54  ;;  %4988 = vmatprep.subr.bf16.mxu1 %v5461_v0  ;;  %v5487_v45 = vld [vmem:[%s6693_s18 + $0x298] sm:$0xff]   ;;  %v5493_v55 = vld [vmem:[%s6693_s18 + $0x2e8] sm:$0xff]   ;;  %v5496_v60 = vld [vmem:[%s6693_s18 + $0x270] sm:$0xff]  }
0x14ca   :  { %v3127_v26 = vmax.f32 %v3053_v15, 0.0  ;;  %v3129_v27 = vmax.f32 %v3096_v16, 0.0  ;;  %v5494_v58 = vld [vmem:[%s6693_s18 + $0x228] sm:$0xff]   ;;  %v5497_v61 = vld [vmem:[%s6693_s18 + $0x2f0] sm:$0xff]   ;;  %v5500_v54 = vld [vmem:[%s6693_s18 + $0x278] sm:$0xff]  }
0x14cb   :  { %v6420_v28 = vpack.c.bf16 %v3126_v22, %v3110_v20  ;;  %v6422_v12 = vpack.c.bf16 %v3128_v23, %v3112_v21  ;;  %v5495_v59 = vld [vmem:[%s6693_s18 + $0x2a8] sm:$0xff]   ;;  %v5498_v53 = vld [vmem:[%s6693_s18 + $0x230] sm:$0xff]   ;;  %v5501_v0 = vld [vmem:[%s6693_s18 + $0x2f8] sm:$0xff]  }
0x14cc   :  { %v6424_v29 = vpack.c.bf16 %v3127_v26, %v3111_v24  ;;  %v6426_v30 = vpack.c.bf16 %v3129_v27, %v3113_v11  ;;  %4967 = vmatpush3.bf16.msra.mxu0 %v5462_v18  ;;  %4989 = vmatpush3.bf16.msra.mxu1 %v5463_v19  ;;  %v5499_v63 = vld [vmem:[%s6693_s18 + $0x2b0] sm:$0xff]   ;;  %v5502_v3 = vld [vmem:[%s6693_s18 + $0x238] sm:$0xff]   ;;  %v5504_v6 = vld [vmem:[%s6693_s18 + $0x340] sm:$0xff]  }
0x14cd   :  { %4968 = vmatprep.subr.bf16.mxu0 %v5464_v52  ;;  %4990 = vmatprep.subr.bf16.mxu1 %v5465_v14  ;;  %v5503_v4 = vld [vmem:[%s6693_s18 + $0x2b8] sm:$0xff]   ;;  %v5505_v56 = vld [vmem:[%s6693_s18 + $0x3c0] sm:$0xff]   ;;  %v5508_v10 = vld [vmem:[%s6693_s18 + $0x348] sm:$0xff]  }
0x14ce   :  { %v5506_v7 = vld [vmem:[%s6693_s18 + $0x300] sm:$0xff]   ;;  %v5509_v13 = vld [vmem:[%s6693_s18 + $0x3c8] sm:$0xff]   ;;  %v5514_v18 = vld [vmem:[%s6693_s18 + $0x310] sm:$0xff]  }
0x14cf   :  { %v5507_v8 = vld [vmem:[%s6693_s18 + $0x380] sm:$0xff]   ;;  %v5510_v15 = vld [vmem:[%s6693_s18 + $0x308] sm:$0xff]   ;;  %v5515_v19 = vld [vmem:[%s6693_s18 + $0x390] sm:$0xff]  }
0x14d0   :  { %4969 = vmatpush3.bf16.msra.mxu0 %v5466_v9  ;;  %4991 = vmatpush3.bf16.msra.mxu1 %v5467_v31  ;;  %v5511_v16 = vld [vmem:[%s6693_s18 + $0x388] sm:$0xff]   ;;  %v5516_v20 = vld [vmem:[%s6693_s18 + $0x358] sm:$0xff]   ;;  %v5520_v52 = vld [vmem:[%s6693_s18 + $0x360] sm:$0xff]  }
0x14d1   :  { %4970 = vmatprep.subr.bf16.mxu0 %v5468_v32  ;;  %4992 = vmatprep.subr.bf16.mxu1 %v5469_v33  ;;  %v5517_v21 = vld [vmem:[%s6693_s18 + $0x3d8] sm:$0xff]   ;;  %v5521_v14 = vld [vmem:[%s6693_s18 + $0x3e0] sm:$0xff]   ;;  %v5524_v26 = vld [vmem:[%s6693_s18 + $0x368] sm:$0xff]  }
0x14d2   :  { %v5518_v22 = vld [vmem:[%s6693_s18 + $0x318] sm:$0xff]   ;;  %v5522_v24 = vld [vmem:[%s6693_s18 + $0x320] sm:$0xff]   ;;  %v5525_v27 = vld [vmem:[%s6693_s18 + $0x3e8] sm:$0xff]  }
0x14d3   :  { %v5519_v23 = vld [vmem:[%s6693_s18 + $0x398] sm:$0xff]   ;;  %v5523_v11 = vld [vmem:[%s6693_s18 + $0x3a0] sm:$0xff]   ;;  %v5528_v9 = vld [vmem:[%s6693_s18 + $0x370] sm:$0xff]  }
0x14d4   :  { %4971 = vmatpush3.bf16.msra.mxu0 %v5470_v25  ;;  %4993 = vmatpush3.bf16.msra.mxu1 %v5471_v34  ;;  %v5529_v31 = vld [vmem:[%s6693_s18 + $0x3f0] sm:$0xff]   ;;  %v5532_v25 = vld [vmem:[%s6693_s18 + $0x378] sm:$0xff]  }
0x14d5   :  { %5000 = vmatprep.subr.bf16.mxu0 %v5472_v35  ;;  %5022 = vmatprep.subr.bf16.mxu1 %v5473_v36  ;;  %v5530_v32 = vld [vmem:[%s6693_s18 + $0x330] sm:$0xff]   ;;  %v5533_v34 = vld [vmem:[%s6693_s18 + $0x3f8] sm:$0xff]  }
0x14d6   :  { %v5531_v33 = vld [vmem:[%s6693_s18 + $0x3b0] sm:$0xff]   ;;  %v5534_v35 = vld [vmem:[%s6693_s18 + $0x338] sm:$0xff]  }
0x14d7   :  { %4292 = vmatmul.mubr.bf16.vlgmr.msra.gmra.mrb[48].mxu0 %v6349_v17  ;;  %4333 = vmatmul.mubr.bf16.vlgmr.msra.gmra.mrb[48].mxu1 %v6351_v57  ;;  %v5480_v17 = vld [vmem:[%s6693_s18 + $0x250] sm:$0xff]   ;;  %v5535_v36 = vld [vmem:[%s6693_s18 + $0x3b8] sm:$0xff]  }
0x14d8   :  { %5001 = vmatpush3.bf16.msra.mxu0 %v5474_v39  ;;  %4373 = vmatprep.mubr.bf16.mxu0 %v6390_v2  ;;  %v5481_v57 = vld [vmem:[%s6693_s18 + $0x2d0] sm:$0xff]   ;;  %v5490_v2 = vld [vmem:[%s6693_s18 + $0x220] sm:$0xff]  }
0x14d9   :  { %5023 = vmatpush3.bf16.msra.mxu1 %v5475_v40  ;;  %4414 = vmatprep.mubr.bf16.mxu1 %v6392_v48  ;;  %v5491_v48 = vld [vmem:[%s6693_s18 + $0x2a0] sm:$0xff]  }
0x14da   :  { %5002 = vmatprep.subr.bf16.mxu0 %v5476_v38  ;;  %5024 = vmatprep.subr.bf16.mxu1 %v5477_v62  ;;  %v4695_v38 = vld [vmem:[%s6694_s19] ss:$0 sm:$0xff] }
0x14dc   :  { %5003 = vmatpush3.bf16.msra.mxu0 %v5478_v37 }
0x14dd   :  { %5025 = vmatpush3.bf16.msra.mxu1 %v5479_v41  ;;  %5004 = vmatprep.subr.bf16.mxu0 %v5480_v17 }
0x14de   :  { %5026 = vmatprep.subr.bf16.mxu1 %v5481_v57 }
0x14e0   :  { %5005 = vmatpush3.bf16.msra.mxu0 %v5482_v5 }
0x14e1   :  { %5027 = vmatpush3.bf16.msra.mxu1 %v5483_v1  ;;  %5006 = vmatprep.subr.bf16.mxu0 %v5484_v42 }
0x14e2   :  { %5028 = vmatprep.subr.bf16.mxu1 %v5485_v43 }
0x14e4   :  { %5007 = vmatpush3.bf16.msra.mxu0 %v5486_v44 }
0x14e5   :  { %5029 = vmatpush3.bf16.msra.mxu1 %v5487_v45  ;;  %5008 = vmatprep.subr.bf16.mxu0 %v5488_v46 }
0x14e6   :  { %5030 = vmatprep.subr.bf16.mxu1 %v5489_v49 }
0x14e8   :  { %5009 = vmatpush3.bf16.msra.mxu0 %v5490_v2 }
0x14e9   :  { %5031 = vmatpush3.bf16.msra.mxu1 %v5491_v48  ;;  %5010 = vmatprep.subr.bf16.mxu0 %v5492_v50 }
0x14ea   :  { %5032 = vmatprep.subr.bf16.mxu1 %v5493_v55 }
0x14ec   :  { %5011 = vmatpush3.bf16.msra.mxu0 %v5494_v58 }
0x14ed   :  { %5033 = vmatpush3.bf16.msra.mxu1 %v5495_v59  ;;  %5012 = vmatprep.subr.bf16.mxu0 %v5496_v60 }
0x14ee   :  { %5034 = vmatprep.subr.bf16.mxu1 %v5497_v61 }
0x14f0   :  { %5013 = vmatpush3.bf16.msra.mxu0 %v5498_v53 }
0x14f1   :  { %5035 = vmatpush3.bf16.msra.mxu1 %v5499_v63  ;;  %5014 = vmatprep.subr.bf16.mxu0 %v5500_v54 }
0x14f2   :  { %5036 = vmatprep.subr.bf16.mxu1 %v5501_v0 }
0x14f4   :  { %5015 = vmatpush3.bf16.msra.mxu0 %v5502_v3 }
0x14f5   :  { %5037 = vmatpush3.bf16.msra.mxu1 %v5503_v4  ;;  %5044 = vmatprep.subr.bf16.mxu0 %v5504_v6 }
0x14f6   :  { %5066 = vmatprep.subr.bf16.mxu1 %v5505_v56 }
0x14f7   :  { %4374 = vmatmul.mubr.bf16.vlgmr.msra.gmra.mrb[52].mxu0 %v6386_v47  ;;  %v5512_v47 = vld [vmem:[%s6693_s18 + $0x350] sm:$0xff]  }
0x14f8   :  { %4415 = vmatmul.mubr.bf16.vlgmr.msra.gmra.mrb[52].mxu1 %v6388_v51  ;;  %5045 = vmatpush3.bf16.msra.mxu0 %v5506_v7  ;;  %v5513_v51 = vld [vmem:[%s6693_s18 + $0x3d0] sm:$0xff]  }
0x14f9   :  { %4455 = vmatprep.mubr.bf16.mxu0 %v6424_v29  ;;  %5067 = vmatpush3.bf16.msra.mxu1 %v5507_v8  ;;  %v5526_v29 = vld [vmem:[%s6693_s18 + $0x328] sm:$0xff]  }
0x14fa   :  { %4496 = vmatprep.mubr.bf16.mxu1 %v6426_v30  ;;  %5046 = vmatprep.subr.bf16.mxu0 %v5508_v10  ;;  %v5527_v30 = vld [vmem:[%s6693_s18 + $0x3a8] sm:$0xff]  }
0x14fb   :  { %5068 = vmatprep.subr.bf16.mxu1 %v5509_v13 }
0x14fc   :  { %5047 = vmatpush3.bf16.msra.mxu0 %v5510_v15 }
0x14fd   :  { %5069 = vmatpush3.bf16.msra.mxu1 %v5511_v16  ;;  %5048 = vmatprep.subr.bf16.mxu0 %v5512_v47 }
0x14fe   :  { %5070 = vmatprep.subr.bf16.mxu1 %v5513_v51 }
0x1500   :  { %5049 = vmatpush3.bf16.msra.mxu0 %v5514_v18 }
0x1501   :  { %5071 = vmatpush3.bf16.msra.mxu1 %v5515_v19  ;;  %5050 = vmatprep.subr.bf16.mxu0 %v5516_v20 }
0x1502   :  { %5072 = vmatprep.subr.bf16.mxu1 %v5517_v21 }
0x1504   :  { %5051 = vmatpush3.bf16.msra.mxu0 %v5518_v22 }
0x1505   :  { %5073 = vmatpush3.bf16.msra.mxu1 %v5519_v23  ;;  %5052 = vmatprep.subr.bf16.mxu0 %v5520_v52 }
0x1506   :  { %5074 = vmatprep.subr.bf16.mxu1 %v5521_v14 }
0x1508   :  { %5053 = vmatpush3.bf16.msra.mxu0 %v5522_v24 }
0x1509   :  { %5075 = vmatpush3.bf16.msra.mxu1 %v5523_v11  ;;  %5054 = vmatprep.subr.bf16.mxu0 %v5524_v26 }
0x150a   :  { %5076 = vmatprep.subr.bf16.mxu1 %v5525_v27 }
0x150c   :  { %5055 = vmatpush3.bf16.msra.mxu0 %v5526_v29 }
0x150d   :  { %5077 = vmatpush3.bf16.msra.mxu1 %v5527_v30  ;;  %5056 = vmatprep.subr.bf16.mxu0 %v5528_v9 }
0x150e   :  { %5078 = vmatprep.subr.bf16.mxu1 %v5529_v31 }
0x1510   :  { %5057 = vmatpush3.bf16.msra.mxu0 %v5530_v32 }
0x1511   :  { %5079 = vmatpush3.bf16.msra.mxu1 %v5531_v33  ;;  %5058 = vmatprep.subr.bf16.mxu0 %v5532_v25 }
0x1512   :  { %5080 = vmatprep.subr.bf16.mxu1 %v5533_v34 }
0x1514   :  { %5059 = vmatpush3.bf16.msra.mxu0 %v5534_v35 }
0x1515   :  { %5081 = vmatpush3.bf16.msra.mxu1 %v5535_v36 }
0x1517   :  { %4456 = vmatmul.mubr.bf16.vlgmr.msra.gmra.mrb[56].mxu0 %v6420_v28 }
0x1518   :  { %4497 = vmatmul.mubr.bf16.vlgmr.msra.gmra.mrb[56].mxu1 %v6422_v12 }
0x158a   :  { %v4928_v39 = vpop.f32.mrb[44].mxu0  ;;  %v4950_v40 = vpop.f32.mrb[44].mxu1 }
0x158b   :  { %v4929_v62 = vpop.f32.mrb[45].mxu0  ;;  %v4951_v37 = vpop.f32.mrb[45].mxu1 }
0x158c   :  { %v4930_v41 = vadd.f32 %v4929_v62, %v4928_v39  ;;  %v4952_v17 = vadd.f32 %v4951_v37, %v4950_v40  ;;  %v4931_v57 = vpop.f32.mrb[46].mxu0  ;;  %v4953_v5 = vpop.f32.mrb[46].mxu1  ;;  %v5582_v40 = vld [vmem:[#allocation2] sm:$0xff] }
0x158d   :  { %v4932_v1 = vpop.f32.mrb[47].mxu0  ;;  %v4954_v42 = vpop.f32.mrb[47].mxu1 }
0x158e   :  { %v4212_v43 = vadd.f32 %v4930_v41, %v4695_v38  ;;  %v4933_v44 = vadd.f32 %v4932_v1, %v4931_v57  ;;  %v4955_v45 = vadd.f32 %v4954_v42, %v4953_v5 }
0x1590   :  { %v4253_v28 = vadd.f32 %v4952_v17, %v4212_v43  ;;  %v4215_v46 = vadd.f32 %v4933_v44, %v4695_v38 }
0x1592   :  { %v4256_v12 = vadd.f32 %v4955_v45, %v4215_v46  ;;  %v5583_v46 = vld [vmem:[#allocation2 + $0x8] sm:$0xff] }
0x15aa   :  { %v4972_v49 = vpop.f32.mrb[48].mxu0  ;;  %v4994_v2 = vpop.f32.mrb[48].mxu1 }
0x15ab   :  { %v4973_v48 = vpop.f32.mrb[49].mxu0  ;;  %v4995_v50 = vpop.f32.mrb[49].mxu1 }
0x15ac   :  { %v4974_v55 = vadd.f32 %v4973_v48, %v4972_v49  ;;  %v4996_v58 = vadd.f32 %v4995_v50, %v4994_v2  ;;  %v4975_v59 = vpop.f32.mrb[50].mxu0  ;;  %v4997_v60 = vpop.f32.mrb[50].mxu1 }
0x15ad   :  { %v4976_v61 = vpop.f32.mrb[51].mxu0  ;;  %v4998_v53 = vpop.f32.mrb[51].mxu1 }
0x15ae   :  { %v4294_v63 = vadd.f32 %v4974_v55, %v4253_v28  ;;  %v4977_v54 = vadd.f32 %v4976_v61, %v4975_v59  ;;  %v4999_v0 = vadd.f32 %v4998_v53, %v4997_v60 }
0x15b0   :  { %v4335_v3 = vadd.f32 %v4996_v58, %v4294_v63  ;;  %v4297_v4 = vadd.f32 %v4977_v54, %v4256_v12 }
0x15b2   :  { %v4338_v6 = vadd.f32 %v4999_v0, %v4297_v4 }
0x15ca   :  { %v5016_v56 = vpop.f32.mrb[52].mxu0 }
0x15cb   :  { %v5038_v7 = vpop.f32.mrb[52].mxu1  ;;  %v5017_v8 = vpop.f32.mrb[53].mxu0 }
0x15cc   :  { %v5018_v10 = vadd.f32 %v5017_v8, %v5016_v56  ;;  %v5039_v13 = vpop.f32.mrb[53].mxu1  ;;  %v5019_v15 = vpop.f32.mrb[54].mxu0 }
0x15cd   :  { %v5040_v16 = vadd.f32 %v5039_v13, %v5038_v7  ;;  %v5041_v47 = vpop.f32.mrb[54].mxu1  ;;  %v5020_v51 = vpop.f32.mrb[55].mxu0  ;;  %v4505_v7 = vld [vmem:[%s6689_s14] sm:$0xff] }
0x15ce   :  { %v4376_v18 = vadd.f32 %v5018_v10, %v4335_v3  ;;  %v5021_v19 = vadd.f32 %v5020_v51, %v5019_v15  ;;  %v5042_v20 = vpop.f32.mrb[55].mxu1  ;;  %v4506_v13 = vld [vmem:[%s6690_s15] sm:$0xff] }
0x15cf   :  { %v5043_v21 = vadd.f32 %v5042_v20, %v5041_v47 }
0x15d0   :  { %v4417_v22 = vadd.f32 %v5040_v16, %v4376_v18  ;;  %v4379_v23 = vadd.f32 %v5021_v19, %v4338_v6 }
0x15d2   :  { %v4420_v52 = vadd.f32 %v5043_v21, %v4379_v23 }
0x15ea   :  { %v5060_v14 = vpop.f32.mrb[56].mxu0 }
0x15eb   :  { %v5082_v24 = vpop.f32.mrb[56].mxu1  ;;  %v5061_v11 = vpop.f32.mrb[57].mxu0 }
0x15ec   :  { %v5062_v26 = vadd.f32 %v5061_v11, %v5060_v14  ;;  %v5083_v27 = vpop.f32.mrb[57].mxu1  ;;  %v5063_v29 = vpop.f32.mrb[58].mxu0 }
0x15ed   :  { %v5084_v30 = vadd.f32 %v5083_v27, %v5082_v24  ;;  %v5085_v9 = vpop.f32.mrb[58].mxu1  ;;  %v5064_v31 = vpop.f32.mrb[59].mxu0 }
0x15ee   :  { %v4458_v32 = vadd.f32 %v5062_v26, %v4417_v22  ;;  %v5065_v33 = vadd.f32 %v5064_v31, %v5063_v29  ;;  %v5086_v25 = vpop.f32.mrb[59].mxu1 }
0x15ef   :  { %v5087_v34 = vadd.f32 %v5086_v25, %v5085_v9 }
0x15f0   :  { %v4499_v35 = vadd.f32 %v5084_v30, %v4458_v32  ;;  %v4461_v36 = vadd.f32 %v5065_v33, %v4420_v52 }
0x15f2   :  { %v4502_v39 = vadd.f32 %v5087_v34, %v4461_v36  ;;  %v4507_v38 = vadd.f32 %v5582_v40, %v4499_v35 }
0x15f4   :  { %v4508_v62 = vsel %vm76_vm0, %v4507_v38, 0.0  ;;  %v4546_v12 = vadd.f32 %v5583_v46, %v4502_v39 }
0x15f5   :  { %4509 = vadd.xlane.f32.xlu0 %v4508_v62 }
0x15f6   :  { %v4547_v49 = vsel %vm76_vm0, %v4546_v12, 0.0 }
0x1682   :  { %v4510_v37 = vpop.xlane.xlu0 %4509 }
0x1683   :  { %v4511_v41 = vrot.slane %v4510_v37, 4 }
0x1685   :  { %v4512_v17 = vadd.f32 %v4511_v41, %v4510_v37 }
0x1687   :  { %v4513_v57 = vrot.slane %v4512_v17, 2 }
0x1689   :  { %v4514_v5 = vadd.f32 %v4513_v57, %v4512_v17 }
0x168b   :  { %v4515_v1 = vrot.slane %v4514_v5, 1 }
0x168d   :  { %v4516_v42 = vadd.f32 %v4515_v1, %v4514_v5 }
0x168f   :  { %5388 = vpush %v4516_v42 }
0x16c0   :  { %s5389_s18 = spop %5388 }
0x16c1   :  { %s4520_s19 = smul.f32 0.00390625, %s5389_s18 }
0x16c3   :  { %v4521_v43 = vstv %s4520_s19 }
0x16c4   :  { %v4522_v44 = vsub.f32 %v4507_v38, %v4521_v43 }
0x16c6   :  { %v4523_v45 = vmul.f32 %v4522_v44, %v4522_v44 }
0x16c8   :  { %v4524_v28 = vsel %vm76_vm0, %v4523_v45, 0.0 }
0x16c9   :  { %4525 = vadd.xlane.f32.xlu0 %v4524_v28 }
0x16cd   :  { %4548 = vadd.xlane.f32.xlu0 %v4547_v49 }
0x1756   :  { %v4526_v2 = vpop.xlane.xlu0 %4525 }
0x1757   :  { %v4527_v48 = vrot.slane %v4526_v2, 4 }
0x1759   :  { %v4528_v50 = vadd.f32 %v4527_v48, %v4526_v2 }
0x175a   :  { %v4549_v61 = vpop.xlane.xlu0 %4548 }
0x175b   :  { %v4529_v55 = vrot.slane %v4528_v50, 2  ;;  %v4550_v53 = vrot.slane %v4549_v61, 4 }
0x175d   :  { %v4530_v58 = vadd.f32 %v4529_v55, %v4528_v50  ;;  %v4551_v63 = vadd.f32 %v4550_v53, %v4549_v61 }
0x175f   :  { %v4531_v59 = vrot.slane %v4530_v58, 1  ;;  %v4552_v54 = vrot.slane %v4551_v63, 2 }
0x1761   :  { %v4532_v60 = vadd.f32 %v4531_v59, %v4530_v58  ;;  %v4553_v3 = vadd.f32 %v4552_v54, %v4551_v63 }
0x1763   :  { %5390 = vpush %v4532_v60  ;;  %v4554_v4 = vrot.slane %v4553_v3, 1 }
0x1765   :  { %v4555_v56 = vadd.f32 %v4554_v4, %v4553_v3 }
0x1794   :  { %s5391_s9 = spop %5390 }
0x1795   :  { %s4536_s29 = smul.f32 0.00390625, %s5391_s9 }
0x1797   :  { %s4537_s30 = sadd.f32 1e-05, %s4536_s29 }
0x1799   :  { %v4538_v0 = vstv %s4537_s30 }
0x179a   :  { %5576 = vrsqrt.f32 %v4538_v0 }
0x17a4   :  { %v5577_v6 = vpop.eup %5576 }
0x17a5   :  { %5392 = vpush %v5577_v6 }
0x17a6   :  { %5394 = vpush %v4555_v56 }
0x17d6   :  { %s5393_s0 = spop %5392 }
0x17d7   :  { %v4541_v8 = vstv %s5393_s0  ;;  %s5395_s6 = spop %5394 }
0x17d8   :  { %v4542_v10 = vmul.f32 %v4541_v8, %v4522_v44  ;;  %s4559_s23 = smul.f32 0.00390625, %s5395_s6 }
0x17da   :  { %v4543_v15 = vmul.f32 %v4542_v10, %v4505_v7  ;;  %v4560_v16 = vstv %s4559_s23 }
0x17db   :  { %v4561_v47 = vsub.f32 %v4546_v12, %v4560_v16 }
0x17dc   :  { %v4544_v51 = vadd.f32 %v4543_v15, %v4506_v13 }
0x17dd   :  { %v4562_v18 = vmul.f32 %v4561_v47, %v4561_v47 }
0x17de   :  { %4545 = vst.msk [vmem:[#allocation3] sm:$0xff] %vm76_vm0, %v4544_v51 }
0x17df   :  { %v4563_v19 = vsel %vm76_vm0, %v4562_v18, 0.0 }
0x17e0   :  { %4564 = vadd.xlane.f32.xlu0 %v4563_v19 }
0x186d   :  { %v4565_v20 = vpop.xlane.xlu0 %4564 }
0x186e   :  { %v4566_v21 = vrot.slane %v4565_v20, 4 }
0x1870   :  { %v4567_v22 = vadd.f32 %v4566_v21, %v4565_v20 }
0x1872   :  { %v4568_v23 = vrot.slane %v4567_v22, 2 }
0x1874   :  { %v4569_v52 = vadd.f32 %v4568_v23, %v4567_v22 }
0x1876   :  { %v4570_v14 = vrot.slane %v4569_v52, 1 }
0x1878   :  { %v4571_v24 = vadd.f32 %v4570_v14, %v4569_v52 }
0x187a   :  { %5396 = vpush %v4571_v24 }
0x18ab   :  { %s5397_s14 = spop %5396 }
0x18ac   :  { %s4575_s15 = smul.f32 0.00390625, %s5397_s14 }
0x18ae   :  { %s4576_s24 = sadd.f32 1e-05, %s4575_s15 }
0x18b0   :  { %v4577_v11 = vstv %s4576_s24 }
0x18b1   :  { %5578 = vrsqrt.f32 %v4577_v11 }
0x18bb   :  { %v5579_v26 = vpop.eup %5578 }
0x18bc   :  { %5398 = vpush %v5579_v26 }
0x18ed   :  { %s5399_s27 = spop %5398 }
0x18ee   :  { %v4580_v27 = vstv %s5399_s27 }
0x18ef   :  { %v4581_v29 = vmul.f32 %v4580_v27, %v4561_v47 }
0x18f1   :  { %v4582_v30 = vmul.f32 %v4581_v29, %v4505_v7 }
0x18f3   :  { %v4583_v9 = vadd.f32 %v4582_v30, %v4506_v13 }
0x18f5   :  { %4584 = vst.msk [vmem:[#allocation3 + $0x8] sm:$0xff] %vm76_vm0, %v4583_v9 }
0x18f6   :  { %5595 = shalt.err (!%p5592_p4)
}
0x18f7   :  { %s5596_s25 = scalar_lea.hbm %s6695_s20, 256 }
0x18f8   :  { %p5597_p5 = scmp.ne.s32.totalorder %s6695_s20, %s5596_s25  ;;  %p5600_p6 = scmp.lt.u32.totalorder %s5596_s25, %s6695_s20 }
0x18fa   :  { %p5602_p7 = pnand %p5600_p6, %p5597_p5 }
0x18fc   :  { %5605 = shalt.err (!%p5602_p7)
}
0x18fd   :  { %s5614_s16 = smov 128   ;;  %s5615_s12 = smov 8  }
0x18fe   :  { %4596 = dma.vmem_to_hbm [thread:$0]  %s4591_s10, 256, %s6695_s20, [#allocation4], %s5614_s16, %s5614_s16, %s5615_s12  }
0x18ff   :  { %5606 = dma.done.wait [#allocation4], 256  }
0x1900   :  { %5607 = vsyncadd [#allocation4], 4294967040 }
0x1901   :  { %4600 = vsyncpa [#allocation4], 1 }

</bundles_post_ra>
